<compile_context>
chip_gen: v7x
topology: tpu7x:2x2x1
jax: 0.10.0
libtpu: 0.0.40
codegen_flags: <defaults>
</compile_context>

<pallas_src>
import functools

import jax
import jax.numpy as jnp
from jax.experimental import pallas as pl
from jax.experimental.pallas import tpu as pltpu


_SUBLANE = 8
_LANE_CANDIDATES = (4096, 2048, 1024, 512, 256, 128)
_PAD_LANES = 1024                       # used only when nothing above divides n
_TARGET_BLOCK_BYTES = 2 * 1024 * 1024   # ~2 MiB per block (safe on v5e/v6e/v7x)
_MIN_PALLAS_ELEMS = 1024                # below this, plain XLA is cheaper


# ---------------------------------------------------------------------------
# Pallas kernels (pure elementwise hot path; cast happens in-kernel)
# ---------------------------------------------------------------------------

def _uniform_quantize_kernel(x_ref, o_ref, *, q, inv_q):
    x = x_ref[...].astype(jnp.float32)
    o_ref[...] = (jnp.round(x * q) * inv_q).astype(o_ref.dtype)


def _sign_kernel(x_ref, o_ref):
    x = x_ref[...].astype(jnp.float32)
    o_ref[...] = jnp.sign(x).astype(o_ref.dtype)


# ---------------------------------------------------------------------------
# Plain-JAX reference (also used as the tiny-tensor fast path)
# ---------------------------------------------------------------------------

def quantizer_ref(x, k: int, name: str):
    xf = x.astype(jnp.float32)
    if name == "weight" and k == 1:
        out = jnp.sign(xf)
    else:
        q = float(2 ** k - 1)
        out = jnp.round(xf * q) * (1.0 / q)
    return out.astype(x.dtype)


# ---------------------------------------------------------------------------
# Wrapper: Quantizer.forward equivalent
# ---------------------------------------------------------------------------

def _pick_lanes(n: int):
    """Largest lane width that divides n (no padding needed), else None."""
    for lanes in _LANE_CANDIDATES:
        if n % lanes == 0:
            return lanes
    return None


def _row_block(rows: int, lanes: int, itemsize: int) -> int:
    """Rows per block: ~_TARGET_BLOCK_BYTES, multiple of 8, >=2 grid steps."""
    rb = _TARGET_BLOCK_BYTES // (lanes * itemsize)
    rb = max(_SUBLANE, (rb // _SUBLANE) * _SUBLANE)
    if rows >= 2 * _SUBLANE:
        # Keep at least two grid steps so a v7x megacore can split the work.
        half = -(-rows // 2)
        half = -(-half // _SUBLANE) * _SUBLANE
        rb = min(rb, half)
    return int(rb)


def quantizer_forward(x, k: int, name: str):
    """JAX/Pallas equivalent of Quantizer(k, name)(x) forward pass."""
    orig_shape = x.shape
    orig_dtype = x.dtype
    n = x.size
    if n == 0:
        return x

    use_sign = (name == "weight" and k == 1)

    # Tiny tensors: launch/reshape overhead dwarfs the work -> plain XLA.
    if n < _MIN_PALLAS_ELEMS:
        return quantizer_ref(x, k, name)

    x_flat = x.reshape(-1)

    lanes = _pick_lanes(n)
    padded_n = n
    if lanes is None:
        # Ragged size: pad only up to the next lane-row multiple.
        lanes = _PAD_LANES
        padded_n = -(-n // lanes) * lanes
        x_flat = jnp.pad(x_flat, (0, padded_n - n))
    rows = padded_n // lanes
    x2d = x_flat.reshape(rows, lanes)

    if use_sign:
        kernel = _sign_kernel
    else:
        q = float(2 ** k - 1)
        kernel = functools.partial(_uniform_quantize_kernel, q=q, inv_q=1.0 / q)

    rb = _row_block(rows, lanes, jnp.dtype(orig_dtype).itemsize)
    grid = (pl.cdiv(rows, rb),)

    out2d = pl.pallas_call(
        kernel,
        out_shape=jax.ShapeDtypeStruct((rows, lanes), orig_dtype),
        grid_spec=pltpu.PrefetchScalarGridSpec(
            num_scalar_prefetch=0,
            grid=grid,
            in_specs=[pl.BlockSpec((rb, lanes), lambda i: (i, 0))],
            out_specs=pl.BlockSpec((rb, lanes), lambda i: (i, 0)),
        ),
        compiler_params=pltpu.CompilerParams(
            dimension_semantics=("parallel",),
            vmem_limit_bytes=32 * 1024 * 1024,
        ),
    )(x2d)

    out = out2d.reshape(-1)
    if padded_n != n:
        out = out[:n]
    return out.reshape(orig_shape)


# ---------------------------------------------------------------------------
# Self-check
# ---------------------------------------------------------------------------

if __name__ == "__main__":
    key = jax.random.PRNGKey(0)
    k1, k2, k3, k4, k5 = jax.random.split(key, 5)

    # Activation-style input (NCHW), values in [0, 1] as DoReFa activations are.
    x_act = jax.random.uniform(k1, (2, 4, 16, 16), dtype=jnp.float32)        # Pallas path
    # Weight-style inputs (OIHW), values in [-1, 1].
    x_w_small = jax.random.uniform(k2, (4, 4, 3, 3), dtype=jnp.float32) * 2 - 1   # tiny fallback
    x_w_big = jax.random.uniform(k3, (64, 32, 3, 3), dtype=jnp.float32) * 2 - 1   # Pallas sign path
    # Larger activation to exercise the big-block path + bf16 in-kernel cast.
    x_act_big = jax.random.uniform(k4, (4, 64, 32, 32), dtype=jnp.bfloat16)
    # Ragged element count (not a multiple of 128) to exercise the pad path.
    x_ragged = jax.random.uniform(k5, (3, 5, 7, 11), dtype=jnp.float32)

    cases = [
        (x_act, 2, "activation"),
        (x_w_small, 1, "weight"),
        (x_w_big, 1, "weight"),
        (x_act_big, 4, "activation"),
        (x_ragged, 3, "activation"),
    ]

    for x, kk, nm in cases:
        out = quantizer_forward(x, k=kk, name=nm)
        jax.block_until_ready(out)
        ref = quantizer_ref(x, k=kk, name=nm)
        assert out.shape == x.shape and out.dtype == x.dtype
        assert jnp.allclose(out.astype(jnp.float32), ref.astype(jnp.float32),
                            atol=1e-2 if x.dtype == jnp.bfloat16 else 1e-6), (nm, kk)

    print("KERNEL_OK")
</pallas_src>

<mosaic_0001>
module attributes {stable_mosaic.version = 11 : i64} {
  func.func @_uniform_quantize_kernel(%arg0: i32, %arg1: memref<256x2048xf32, #tpu.memory_space<vmem>>, %arg2: memref<256x2048xf32, #tpu.memory_space<vmem>>) attributes {dimension_semantics = [#tpu.dimension_semantics<parallel>], iteration_bounds = array<i64: 1>, scalar_prefetch = 0 : i64, scratch_operands = 0 : i64, tpu.core_type = #tpu.core_type<tc>, window_params = [{transform_indices = @transform_0, window_bounds = array<i64: 256, 2048>}, {transform_indices = @transform_1, window_bounds = array<i64: 256, 2048>}]} {
    %c0 = arith.constant 0 : index
    %c0_0 = arith.constant 0 : index
    %0 = vector.load %arg1[%c0, %c0_0] : memref<256x2048xf32, #tpu.memory_space<vmem>>, vector<256x2048xf32>
    %cst = arith.constant 3.000000e+00 : f32
    %1 = vector.broadcast %cst : f32 to vector<256x2048xf32>
    %2 = arith.mulf %0, %1 : vector<256x2048xf32>
    %3 = math.roundeven %2 : vector<256x2048xf32>
    %cst_1 = arith.constant 0.333333343 : f32
    %4 = vector.broadcast %cst_1 : f32 to vector<256x2048xf32>
    %5 = arith.mulf %3, %4 : vector<256x2048xf32>
    %c0_2 = arith.constant 0 : index
    %c0_3 = arith.constant 0 : index
    %6 = vector.load %arg2[%c0_2, %c0_3] : memref<256x2048xf32, #tpu.memory_space<vmem>>, vector<256x2048xf32>
    tpu.vector_store %arg2[%c0_2, %c0_3], %5 {strides = array<i32>} : memref<256x2048xf32, #tpu.memory_space<vmem>>, vector<256x2048xf32>,
    return
  }
  func.func @transform_0(%arg0: i32) -> (i32, i32) {
    %c0_i32 = arith.constant 0 : i32
    %c0_i32_0 = arith.constant 0 : i32
    return %arg0, %c0_i32 : i32, i32
  }
  func.func @transform_1(%arg0: i32) -> (i32, i32) {
    %c0_i32 = arith.constant 0 : i32
    %c0_i32_0 = arith.constant 0 : i32
    return %arg0, %c0_i32 : i32, i32
  }
}

</mosaic_0001>

<bundles_post_ra>
// kernel: tpu_custom_call.1
= control target key start
LH: loop header
LB: loop body
LE: loop exit
PB: predicated region body
PF: predicated region fallthrough
CT: control target
= control target key end

     0   :  { %6 = vsyncpa [#allocation3], 0  ;;  %s3208_s0 = inlined_call_operand.hbm [shape: f32[1,2048], index: 0, kind: input, shape index: {}]   ;;  %s3209_s1 = inlined_call_operand.hbm [shape: f32[1,2048], index: 1, kind: output, shape index: {}]  }
   0x1   :  { %7 = vsyncpa [#allocation4], 0 }
   0x2   :  { %12 = vsyncadd [#allocation3], 65280  ;;  %s3164_s6 = smov [#allocation2]   ;;  %s3116_s10 = scalar_lea.hbm %s3208_s0, 256 }
   0x3   :  { %s13_s7 = sshll.u32 %s3164_s6, 4  ;;  %p3117_p0 = scmp.ne.s32.totalorder %s3208_s0, %s3116_s10  ;;  %s14_s7 = int_to_ptr.vmem [resolvable:$true] %s13_s7 }
   0x4   :  { %p3120_p1 = scmp.lt.u32.totalorder %s3116_s10, %s3208_s0 }
   0x6   :  { %p3122_p2 = pnand %p3120_p1, %p3117_p0 }
   0x8   :  { %3125 = shalt.err (!%p3122_p2)
}
   0x9   :  { %s3126_s15 = scalar_lea.vmem %s14_s7, 256  ;;  %s3130_s16 = scalar_lea.vmem %s14_s7, 65536 }
   0xa   :  { %p3127_p3 = scmp.ne.s32.totalorder %s14_s7, %s3126_s15  ;;  %p3131_p4 = scmp.lt.s32.totalorder %s14_s7, %s14_s7 }
   0xb   :  { %p3132_p5 = scmp.lt.s32.totalorder %s3130_s16, %s3126_s15 }
   0xd   :  { %p3133_p6 = por %p3132_p5, %p3131_p4 }
   0xf   :  { %p3134_p7 = pnand %p3133_p6, %p3127_p3 }
  0x11   :  { %3137 = shalt.err (!%p3134_p7)
}
  0x12   :  { %s3165_s17 = smov 256   ;;  %s3166_s18 = smov 16  }
  0x13   :  { %19 = dma.hbm_to_vmem [thread:$0]  %s3208_s0, 256, %s14_s7, [#allocation3], %s3165_s17, %s3165_s17, %s3166_s18  }
  0x14   :  { %3160 = dma.done.wait [#allocation3], 65536  }
  0x15   :  { %3161 = vsyncadd [#allocation3], 4294901760  ;;  %v23_v0 = vld [vmem:[#allocation2] sm:$0xff]  ;;  %v24_v1 = vld [vmem:[#allocation2 + $0x8] sm:$0xff] }
  0x16   :  { %v25_v2 = vld [vmem:[#allocation2 + $0x10] sm:$0xff]  ;;  %v535_v3 = vmul.f32 3.0, %v23_v0  ;;  %v536_v4 = vmul.f32 3.0, %v24_v1  ;;  %v26_v6 = vld [vmem:[#allocation2 + $0x18] sm:$0xff]  ;;  %v27_v7 = vld [vmem:[#allocation2 + $0x20] sm:$0xff] }
  0x17   :  { %v537_v5 = vmul.f32 3.0, %v25_v2  ;;  %v28_v8 = vld [vmem:[#allocation2 + $0x28] sm:$0xff]  ;;  %v538_v9 = vmul.f32 3.0, %v26_v6  ;;  %v539_v10 = vmul.f32 3.0, %v27_v7  ;;  %v29_v12 = vld [vmem:[#allocation2 + $0x30] sm:$0xff]  ;;  %v30_v13 = vld [vmem:[#allocation2 + $0x38] sm:$0xff] }
  0x18   :  { %v540_v11 = vmul.f32 3.0, %v28_v8  ;;  %v31_v14 = vld [vmem:[#allocation2 + $0x40] sm:$0xff]  ;;  %v2600_v15 = vround.rtne.f32 %v535_v3  ;;  %v2601_v16 = vround.rtne.f32 %v536_v4  ;;  %v541_v18 = vmul.f32 3.0, %v29_v12  ;;  %v32_v19 = vld [vmem:[#allocation2 + $0x48] sm:$0xff]  ;;  %v33_v20 = vld [vmem:[#allocation2 + $0x50] sm:$0xff] }
  0x19   :  { %v2602_v17 = vround.rtne.f32 %v537_v5  ;;  %v34_v21 = vld [vmem:[#allocation2 + $0x58] sm:$0xff]  ;;  %v2603_v22 = vround.rtne.f32 %v538_v9  ;;  %v2604_v23 = vround.rtne.f32 %v539_v10  ;;  %v542_v25 = vmul.f32 3.0, %v30_v13  ;;  %v35_v26 = vld [vmem:[#allocation2 + $0x60] sm:$0xff]  ;;  %v36_v27 = vld [vmem:[#allocation2 + $0x68] sm:$0xff] }
  0x1a   :  { %v2605_v24 = vround.rtne.f32 %v540_v11  ;;  %v37_v28 = vld [vmem:[#allocation2 + $0x70] sm:$0xff]  ;;  %v1559_v29 = vmul.f32 0.33333334, %v2600_v15  ;;  %v1560_v30 = vmul.f32 0.33333334, %v2601_v16  ;;  %v2606_v32 = vround.rtne.f32 %v541_v18  ;;  %v38_v41 = vld [vmem:[#allocation2 + $0x78] sm:$0xff] }
  0x1b   :  { %v1561_v31 = vmul.f32 0.33333334, %v2602_v17  ;;  %v1562_v33 = vmul.f32 0.33333334, %v2603_v22  ;;  %v1563_v34 = vmul.f32 0.33333334, %v2604_v23  ;;  %v2607_v36 = vround.rtne.f32 %v542_v25 }
  0x1c   :  { %v1564_v35 = vmul.f32 0.33333334, %v2605_v24  ;;  %2071 = vst [vmem:[#allocation5] sm:$0xff] %v1559_v29  ;;  %2072 = vst [vmem:[#allocation5 + $0x8] sm:$0xff] %v1560_v30  ;;  %v1565_v37 = vmul.f32 0.33333334, %v2606_v32 }
  0x1d   :  { %2073 = vst [vmem:[#allocation5 + $0x10] sm:$0xff] %v1561_v31  ;;  %v543_v38 = vmul.f32 3.0, %v31_v14  ;;  %v544_v39 = vmul.f32 3.0, %v32_v19  ;;  %v545_v40 = vmul.f32 3.0, %v33_v20  ;;  %2074 = vst [vmem:[#allocation5 + $0x18] sm:$0xff] %v1562_v33  ;;  %v546_v43 = vmul.f32 3.0, %v34_v21 }
  0x1e   :  { %2075 = vst [vmem:[#allocation5 + $0x20] sm:$0xff] %v1563_v34  ;;  %2076 = vst [vmem:[#allocation5 + $0x28] sm:$0xff] %v1564_v35  ;;  %v1566_v42 = vmul.f32 0.33333334, %v2607_v36  ;;  %v547_v44 = vmul.f32 3.0, %v35_v26  ;;  %v548_v45 = vmul.f32 3.0, %v36_v27 }
  0x1f   :  { %v39_v46 = vld [vmem:[#allocation2 + $0x80] sm:$0xff]  ;;  %2077 = vst [vmem:[#allocation5 + $0x30] sm:$0xff] %v1565_v37  ;;  %v2608_v47 = vround.rtne.f32 %v543_v38  ;;  %v2609_v48 = vround.rtne.f32 %v544_v39  ;;  %v2610_v49 = vround.rtne.f32 %v545_v40  ;;  %v549_v50 = vmul.f32 3.0, %v37_v28  ;;  %v40_v51 = vld [vmem:[#allocation2 + $0x88] sm:$0xff]  ;;  %v41_v52 = vld [vmem:[#allocation2 + $0x90] sm:$0xff] }
  0x20   :  { %v42_v53 = vld [vmem:[#allocation2 + $0x98] sm:$0xff]  ;;  %2078 = vst [vmem:[#allocation5 + $0x38] sm:$0xff] %v1566_v42  ;;  %v2611_v54 = vround.rtne.f32 %v546_v43  ;;  %v2612_v55 = vround.rtne.f32 %v547_v44  ;;  %v2613_v56 = vround.rtne.f32 %v548_v45  ;;  %v550_v57 = vmul.f32 3.0, %v38_v41  ;;  %v43_v58 = vld [vmem:[#allocation2 + $0xa0] sm:$0xff]  ;;  %v44_v59 = vld [vmem:[#allocation2 + $0xa8] sm:$0xff] }
  0x21   :  { %v45_v60 = vld [vmem:[#allocation2 + $0xb0] sm:$0xff]  ;;  %v1567_v61 = vmul.f32 0.33333334, %v2608_v47  ;;  %v1568_v62 = vmul.f32 0.33333334, %v2609_v48  ;;  %v2614_v0 = vround.rtne.f32 %v549_v50  ;;  %v551_v6 = vmul.f32 3.0, %v39_v46 }
  0x22   :  { %v1569_v63 = vmul.f32 0.33333334, %v2610_v49  ;;  %v1570_v1 = vmul.f32 0.33333334, %v2611_v54  ;;  %v1571_v2 = vmul.f32 0.33333334, %v2612_v55  ;;  %v2615_v4 = vround.rtne.f32 %v550_v57 }
  0x23   :  { %v1572_v3 = vmul.f32 0.33333334, %v2613_v56  ;;  %2079 = vst [vmem:[#allocation5 + $0x40] sm:$0xff] %v1567_v61  ;;  %2080 = vst [vmem:[#allocation5 + $0x48] sm:$0xff] %v1568_v62  ;;  %v1573_v5 = vmul.f32 0.33333334, %v2614_v0  ;;  %v2616_v15 = vround.rtne.f32 %v551_v6 }
  0x24   :  { %2081 = vst [vmem:[#allocation5 + $0x50] sm:$0xff] %v1569_v63  ;;  %v552_v7 = vmul.f32 3.0, %v40_v51  ;;  %v553_v8 = vmul.f32 3.0, %v41_v52  ;;  %v46_v9 = vld [vmem:[#allocation2 + $0xb8] sm:$0xff]  ;;  %2082 = vst [vmem:[#allocation5 + $0x58] sm:$0xff] %v1570_v1  ;;  %v554_v11 = vmul.f32 3.0, %v42_v53 }
  0x25   :  { %2083 = vst [vmem:[#allocation5 + $0x60] sm:$0xff] %v1571_v2  ;;  %2084 = vst [vmem:[#allocation5 + $0x68] sm:$0xff] %v1572_v3  ;;  %v1574_v10 = vmul.f32 0.33333334, %v2615_v4  ;;  %v555_v12 = vmul.f32 3.0, %v43_v58  ;;  %v556_v13 = vmul.f32 3.0, %v44_v59 }
  0x26   :  { %v47_v14 = vld [vmem:[#allocation2 + $0xc0] sm:$0xff]  ;;  %2085 = vst [vmem:[#allocation5 + $0x70] sm:$0xff] %v1573_v5  ;;  %v2617_v16 = vround.rtne.f32 %v552_v7  ;;  %v2618_v17 = vround.rtne.f32 %v553_v8  ;;  %v557_v18 = vmul.f32 3.0, %v45_v60  ;;  %v48_v19 = vld [vmem:[#allocation2 + $0xc8] sm:$0xff]  ;;  %v49_v20 = vld [vmem:[#allocation2 + $0xd0] sm:$0xff]  ;;  %v2619_v22 = vround.rtne.f32 %v554_v11 }
  0x27   :  { %v50_v21 = vld [vmem:[#allocation2 + $0xd8] sm:$0xff]  ;;  %2086 = vst [vmem:[#allocation5 + $0x78] sm:$0xff] %v1574_v10  ;;  %v2620_v23 = vround.rtne.f32 %v555_v12  ;;  %v2621_v24 = vround.rtne.f32 %v556_v13  ;;  %v558_v25 = vmul.f32 3.0, %v46_v9  ;;  %v51_v26 = vld [vmem:[#allocation2 + $0xe0] sm:$0xff]  ;;  %v52_v27 = vld [vmem:[#allocation2 + $0xe8] sm:$0xff]  ;;  %v559_v38 = vmul.f32 3.0, %v47_v14 }
  0x28   :  { %v53_v28 = vld [vmem:[#allocation2 + $0xf0] sm:$0xff]  ;;  %v1575_v29 = vmul.f32 0.33333334, %v2616_v15  ;;  %v1576_v30 = vmul.f32 0.33333334, %v2617_v16  ;;  %v2622_v32 = vround.rtne.f32 %v557_v18  ;;  %v560_v39 = vmul.f32 3.0, %v48_v19 }
  0x29   :  { %v1577_v31 = vmul.f32 0.33333334, %v2618_v17  ;;  %v1578_v33 = vmul.f32 0.33333334, %v2619_v22  ;;  %v1579_v34 = vmul.f32 0.33333334, %v2620_v23  ;;  %v2623_v36 = vround.rtne.f32 %v558_v25 }
  0x2a   :  { %v1580_v35 = vmul.f32 0.33333334, %v2621_v24  ;;  %2087 = vst [vmem:[#allocation5 + $0x80] sm:$0xff] %v1575_v29  ;;  %2088 = vst [vmem:[#allocation5 + $0x88] sm:$0xff] %v1576_v30  ;;  %v1581_v37 = vmul.f32 0.33333334, %v2622_v32  ;;  %v2624_v47 = vround.rtne.f32 %v559_v38  ;;  %v2625_v48 = vround.rtne.f32 %v560_v39 }
  0x2b   :  { %2089 = vst [vmem:[#allocation5 + $0x90] sm:$0xff] %v1577_v31  ;;  %v561_v40 = vmul.f32 3.0, %v49_v20  ;;  %v54_v41 = vld [vmem:[#allocation2 + $0xf8] sm:$0xff]  ;;  %2090 = vst [vmem:[#allocation5 + $0x98] sm:$0xff] %v1578_v33  ;;  %v1582_v42 = vmul.f32 0.33333334, %v2623_v36 }
  0x2c   :  { %2091 = vst [vmem:[#allocation5 + $0xa0] sm:$0xff] %v1579_v34  ;;  %2092 = vst [vmem:[#allocation5 + $0xa8] sm:$0xff] %v1580_v35  ;;  %v562_v43 = vmul.f32 3.0, %v50_v21  ;;  %v563_v44 = vmul.f32 3.0, %v51_v26  ;;  %v564_v45 = vmul.f32 3.0, %v52_v27  ;;  %v55_v46 = vld [vmem:[#allocation2 + $0x100] sm:$0xff] }
  0x2d   :  { %2093 = vst [vmem:[#allocation5 + $0xb0] sm:$0xff] %v1581_v37  ;;  %v2626_v49 = vround.rtne.f32 %v561_v40  ;;  %v565_v50 = vmul.f32 3.0, %v53_v28  ;;  %v56_v51 = vld [vmem:[#allocation2 + $0x108] sm:$0xff]  ;;  %v57_v52 = vld [vmem:[#allocation2 + $0x110] sm:$0xff]  ;;  %v58_v53 = vld [vmem:[#allocation2 + $0x118] sm:$0xff]  ;;  %v566_v57 = vmul.f32 3.0, %v54_v41 }
  0x2e   :  { %2094 = vst [vmem:[#allocation5 + $0xb8] sm:$0xff] %v1582_v42  ;;  %v2627_v54 = vround.rtne.f32 %v562_v43  ;;  %v2628_v55 = vround.rtne.f32 %v563_v44  ;;  %v2629_v56 = vround.rtne.f32 %v564_v45  ;;  %v59_v58 = vld [vmem:[#allocation2 + $0x120] sm:$0xff]  ;;  %v60_v59 = vld [vmem:[#allocation2 + $0x128] sm:$0xff]  ;;  %v61_v60 = vld [vmem:[#allocation2 + $0x130] sm:$0xff]  ;;  %v1583_v61 = vmul.f32 0.33333334, %v2624_v47 }
  0x2f   :  { %v1584_v62 = vmul.f32 0.33333334, %v2625_v48  ;;  %v1585_v63 = vmul.f32 0.33333334, %v2626_v49  ;;  %v2630_v0 = vround.rtne.f32 %v565_v50  ;;  %v2631_v4 = vround.rtne.f32 %v566_v57  ;;  %v62_v9 = vld [vmem:[#allocation2 + $0x138] sm:$0xff]  ;;  %v63_v14 = vld [vmem:[#allocation2 + $0x140] sm:$0xff] }
  0x30   :  { %v1586_v1 = vmul.f32 0.33333334, %v2627_v54  ;;  %v1587_v2 = vmul.f32 0.33333334, %v2628_v55  ;;  %v1588_v3 = vmul.f32 0.33333334, %v2629_v56 }
  0x31   :  { %2095 = vst [vmem:[#allocation5 + $0xc0] sm:$0xff] %v1583_v61  ;;  %2096 = vst [vmem:[#allocation5 + $0xc8] sm:$0xff] %v1584_v62  ;;  %v1589_v5 = vmul.f32 0.33333334, %v2630_v0  ;;  %v567_v6 = vmul.f32 3.0, %v55_v46  ;;  %v568_v7 = vmul.f32 3.0, %v56_v51 }
  0x32   :  { %2097 = vst [vmem:[#allocation5 + $0xd0] sm:$0xff] %v1585_v63  ;;  %v569_v8 = vmul.f32 3.0, %v57_v52  ;;  %2098 = vst [vmem:[#allocation5 + $0xd8] sm:$0xff] %v1586_v1  ;;  %v1590_v10 = vmul.f32 0.33333334, %v2631_v4  ;;  %v570_v11 = vmul.f32 3.0, %v58_v53 }
  0x33   :  { %2099 = vst [vmem:[#allocation5 + $0xe0] sm:$0xff] %v1587_v2  ;;  %2100 = vst [vmem:[#allocation5 + $0xe8] sm:$0xff] %v1588_v3  ;;  %v571_v12 = vmul.f32 3.0, %v59_v58  ;;  %v572_v13 = vmul.f32 3.0, %v60_v59  ;;  %v2632_v15 = vround.rtne.f32 %v567_v6  ;;  %v2633_v16 = vround.rtne.f32 %v568_v7  ;;  %v64_v19 = vld [vmem:[#allocation2 + $0x148] sm:$0xff]  ;;  %v65_v20 = vld [vmem:[#allocation2 + $0x150] sm:$0xff] }
  0x34   :  { %2101 = vst [vmem:[#allocation5 + $0xf0] sm:$0xff] %v1589_v5  ;;  %v2634_v17 = vround.rtne.f32 %v569_v8  ;;  %v573_v18 = vmul.f32 3.0, %v61_v60  ;;  %v66_v21 = vld [vmem:[#allocation2 + $0x158] sm:$0xff]  ;;  %2102 = vst [vmem:[#allocation5 + $0xf8] sm:$0xff] %v1590_v10  ;;  %v2635_v22 = vround.rtne.f32 %v570_v11  ;;  %v574_v25 = vmul.f32 3.0, %v62_v9  ;;  %v67_v26 = vld [vmem:[#allocation2 + $0x160] sm:$0xff] }
  0x35   :  { %v2636_v23 = vround.rtne.f32 %v571_v12  ;;  %v2637_v24 = vround.rtne.f32 %v572_v13  ;;  %v68_v27 = vld [vmem:[#allocation2 + $0x168] sm:$0xff]  ;;  %v69_v28 = vld [vmem:[#allocation2 + $0x170] sm:$0xff]  ;;  %v1591_v29 = vmul.f32 0.33333334, %v2632_v15  ;;  %v1592_v30 = vmul.f32 0.33333334, %v2633_v16 }
  0x36   :  { %v1593_v31 = vmul.f32 0.33333334, %v2634_v17  ;;  %v2638_v32 = vround.rtne.f32 %v573_v18  ;;  %v1594_v33 = vmul.f32 0.33333334, %v2635_v22  ;;  %v2639_v36 = vround.rtne.f32 %v574_v25  ;;  %v70_v41 = vld [vmem:[#allocation2 + $0x178] sm:$0xff]  ;;  %v71_v46 = vld [vmem:[#allocation2 + $0x180] sm:$0xff] }
  0x37   :  { %v1595_v34 = vmul.f32 0.33333334, %v2636_v23  ;;  %v1596_v35 = vmul.f32 0.33333334, %v2637_v24  ;;  %2103 = vst [vmem:[#allocation5 + $0x100] sm:$0xff] %v1591_v29  ;;  %2104 = vst [vmem:[#allocation5 + $0x108] sm:$0xff] %v1592_v30 }
  0x38   :  { %2105 = vst [vmem:[#allocation5 + $0x110] sm:$0xff] %v1593_v31  ;;  %v1597_v37 = vmul.f32 0.33333334, %v2638_v32  ;;  %v575_v38 = vmul.f32 3.0, %v63_v14  ;;  %v576_v39 = vmul.f32 3.0, %v64_v19  ;;  %v577_v40 = vmul.f32 3.0, %v65_v20 }
  0x39   :  { %2106 = vst [vmem:[#allocation5 + $0x118] sm:$0xff] %v1594_v33  ;;  %2107 = vst [vmem:[#allocation5 + $0x120] sm:$0xff] %v1595_v34  ;;  %v1598_v42 = vmul.f32 0.33333334, %v2639_v36  ;;  %v578_v43 = vmul.f32 3.0, %v66_v21  ;;  %v579_v44 = vmul.f32 3.0, %v67_v26 }
  0x3a   :  { %2108 = vst [vmem:[#allocation5 + $0x128] sm:$0xff] %v1596_v35  ;;  %v580_v45 = vmul.f32 3.0, %v68_v27  ;;  %2109 = vst [vmem:[#allocation5 + $0x130] sm:$0xff] %v1597_v37  ;;  %v2640_v47 = vround.rtne.f32 %v575_v38  ;;  %v2641_v48 = vround.rtne.f32 %v576_v39  ;;  %v2642_v49 = vround.rtne.f32 %v577_v40  ;;  %v72_v51 = vld [vmem:[#allocation2 + $0x188] sm:$0xff]  ;;  %v73_v52 = vld [vmem:[#allocation2 + $0x190] sm:$0xff] }
  0x3b   :  { %v581_v50 = vmul.f32 3.0, %v69_v28  ;;  %v74_v53 = vld [vmem:[#allocation2 + $0x198] sm:$0xff]  ;;  %2110 = vst [vmem:[#allocation5 + $0x138] sm:$0xff] %v1598_v42  ;;  %v2643_v54 = vround.rtne.f32 %v578_v43  ;;  %v2644_v55 = vround.rtne.f32 %v579_v44  ;;  %v582_v57 = vmul.f32 3.0, %v70_v41  ;;  %v75_v58 = vld [vmem:[#allocation2 + $0x1a0] sm:$0xff]  ;;  %v76_v59 = vld [vmem:[#allocation2 + $0x1a8] sm:$0xff] }
  0x3c   :  { %v2645_v56 = vround.rtne.f32 %v580_v45  ;;  %v77_v60 = vld [vmem:[#allocation2 + $0x1b0] sm:$0xff]  ;;  %v1599_v61 = vmul.f32 0.33333334, %v2640_v47  ;;  %v1600_v62 = vmul.f32 0.33333334, %v2641_v48  ;;  %v583_v6 = vmul.f32 3.0, %v71_v46 }
  0x3d   :  { %v1601_v63 = vmul.f32 0.33333334, %v2642_v49  ;;  %v2646_v0 = vround.rtne.f32 %v581_v50  ;;  %v1602_v1 = vmul.f32 0.33333334, %v2643_v54  ;;  %v1603_v2 = vmul.f32 0.33333334, %v2644_v55 }
  0x3e   :  { %v1604_v3 = vmul.f32 0.33333334, %v2645_v56  ;;  %v2647_v4 = vround.rtne.f32 %v582_v57  ;;  %2111 = vst [vmem:[#allocation5 + $0x140] sm:$0xff] %v1599_v61  ;;  %2112 = vst [vmem:[#allocation5 + $0x148] sm:$0xff] %v1600_v62  ;;  %v584_v7 = vmul.f32 3.0, %v72_v51  ;;  %v585_v8 = vmul.f32 3.0, %v73_v52 }
  0x3f   :  { %2113 = vst [vmem:[#allocation5 + $0x150] sm:$0xff] %v1601_v63  ;;  %v1605_v5 = vmul.f32 0.33333334, %v2646_v0  ;;  %v78_v9 = vld [vmem:[#allocation2 + $0x1b8] sm:$0xff]  ;;  %2114 = vst [vmem:[#allocation5 + $0x158] sm:$0xff] %v1602_v1  ;;  %v586_v11 = vmul.f32 3.0, %v74_v53  ;;  %v2648_v15 = vround.rtne.f32 %v583_v6 }
  0x40   :  { %2115 = vst [vmem:[#allocation5 + $0x160] sm:$0xff] %v1603_v2  ;;  %2116 = vst [vmem:[#allocation5 + $0x168] sm:$0xff] %v1604_v3  ;;  %v1606_v10 = vmul.f32 0.33333334, %v2647_v4  ;;  %v587_v12 = vmul.f32 3.0, %v75_v58  ;;  %v588_v13 = vmul.f32 3.0, %v76_v59  ;;  %v2649_v16 = vround.rtne.f32 %v584_v7 }
  0x41   :  { %v79_v14 = vld [vmem:[#allocation2 + $0x1c0] sm:$0xff]  ;;  %2117 = vst [vmem:[#allocation5 + $0x170] sm:$0xff] %v1605_v5  ;;  %v2650_v17 = vround.rtne.f32 %v585_v8  ;;  %v589_v18 = vmul.f32 3.0, %v77_v60  ;;  %v80_v19 = vld [vmem:[#allocation2 + $0x1c8] sm:$0xff]  ;;  %v81_v20 = vld [vmem:[#allocation2 + $0x1d0] sm:$0xff]  ;;  %v2651_v22 = vround.rtne.f32 %v586_v11  ;;  %v590_v25 = vmul.f32 3.0, %v78_v9 }
  0x42   :  { %v82_v21 = vld [vmem:[#allocation2 + $0x1d8] sm:$0xff]  ;;  %2118 = vst [vmem:[#allocation5 + $0x178] sm:$0xff] %v1606_v10  ;;  %v2652_v23 = vround.rtne.f32 %v587_v12  ;;  %v2653_v24 = vround.rtne.f32 %v588_v13  ;;  %v83_v26 = vld [vmem:[#allocation2 + $0x1e0] sm:$0xff]  ;;  %v84_v27 = vld [vmem:[#allocation2 + $0x1e8] sm:$0xff]  ;;  %v1607_v29 = vmul.f32 0.33333334, %v2648_v15 }
  0x43   :  { %v85_v28 = vld [vmem:[#allocation2 + $0x1f0] sm:$0xff]  ;;  %v1608_v30 = vmul.f32 0.33333334, %v2649_v16  ;;  %v1609_v31 = vmul.f32 0.33333334, %v2650_v17  ;;  %v2654_v32 = vround.rtne.f32 %v589_v18  ;;  %v2655_v36 = vround.rtne.f32 %v590_v25  ;;  %v86_v41 = vld [vmem:[#allocation2 + $0x1f8] sm:$0xff] }
  0x44   :  { %v1610_v33 = vmul.f32 0.33333334, %v2651_v22  ;;  %v1611_v34 = vmul.f32 0.33333334, %v2652_v23  ;;  %v1612_v35 = vmul.f32 0.33333334, %v2653_v24 }
  0x45   :  { %2119 = vst [vmem:[#allocation5 + $0x180] sm:$0xff] %v1607_v29  ;;  %2120 = vst [vmem:[#allocation5 + $0x188] sm:$0xff] %v1608_v30  ;;  %v1613_v37 = vmul.f32 0.33333334, %v2654_v32  ;;  %v591_v38 = vmul.f32 3.0, %v79_v14  ;;  %v592_v39 = vmul.f32 3.0, %v80_v19 }
  0x46   :  { %2121 = vst [vmem:[#allocation5 + $0x190] sm:$0xff] %v1609_v31  ;;  %v593_v40 = vmul.f32 3.0, %v81_v20  ;;  %2122 = vst [vmem:[#allocation5 + $0x198] sm:$0xff] %v1610_v33  ;;  %v1614_v42 = vmul.f32 0.33333334, %v2655_v36  ;;  %v594_v43 = vmul.f32 3.0, %v82_v21 }
  0x47   :  { %2123 = vst [vmem:[#allocation5 + $0x1a0] sm:$0xff] %v1611_v34  ;;  %2124 = vst [vmem:[#allocation5 + $0x1a8] sm:$0xff] %v1612_v35  ;;  %v595_v44 = vmul.f32 3.0, %v83_v26  ;;  %v596_v45 = vmul.f32 3.0, %v84_v27  ;;  %v87_v46 = vld [vmem:[#allocation2 + $0x200] sm:$0xff]  ;;  %v2656_v47 = vround.rtne.f32 %v591_v38  ;;  %v2657_v48 = vround.rtne.f32 %v592_v39  ;;  %v88_v51 = vld [vmem:[#allocation2 + $0x208] sm:$0xff] }
  0x48   :  { %2125 = vst [vmem:[#allocation5 + $0x1b0] sm:$0xff] %v1613_v37  ;;  %v2658_v49 = vround.rtne.f32 %v593_v40  ;;  %v597_v50 = vmul.f32 3.0, %v85_v28  ;;  %v89_v52 = vld [vmem:[#allocation2 + $0x210] sm:$0xff]  ;;  %v90_v53 = vld [vmem:[#allocation2 + $0x218] sm:$0xff]  ;;  %2126 = vst [vmem:[#allocation5 + $0x1b8] sm:$0xff] %v1614_v42  ;;  %v2659_v54 = vround.rtne.f32 %v594_v43  ;;  %v598_v57 = vmul.f32 3.0, %v86_v41 }
  0x49   :  { %v2660_v55 = vround.rtne.f32 %v595_v44  ;;  %v2661_v56 = vround.rtne.f32 %v596_v45  ;;  %v91_v58 = vld [vmem:[#allocation2 + $0x220] sm:$0xff]  ;;  %v92_v59 = vld [vmem:[#allocation2 + $0x228] sm:$0xff]  ;;  %v93_v60 = vld [vmem:[#allocation2 + $0x230] sm:$0xff]  ;;  %v1615_v61 = vmul.f32 0.33333334, %v2656_v47  ;;  %v599_v6 = vmul.f32 3.0, %v87_v46 }
  0x4a   :  { %v1616_v62 = vmul.f32 0.33333334, %v2657_v48  ;;  %v1617_v63 = vmul.f32 0.33333334, %v2658_v49  ;;  %v2662_v0 = vround.rtne.f32 %v597_v50  ;;  %v1618_v1 = vmul.f32 0.33333334, %v2659_v54 }
  0x4b   :  { %v1619_v2 = vmul.f32 0.33333334, %v2660_v55  ;;  %v1620_v3 = vmul.f32 0.33333334, %v2661_v56  ;;  %v2663_v4 = vround.rtne.f32 %v598_v57  ;;  %2127 = vst [vmem:[#allocation5 + $0x1c0] sm:$0xff] %v1615_v61  ;;  %v600_v7 = vmul.f32 3.0, %v88_v51 }
  0x4c   :  { %2128 = vst [vmem:[#allocation5 + $0x1c8] sm:$0xff] %v1616_v62  ;;  %2129 = vst [vmem:[#allocation5 + $0x1d0] sm:$0xff] %v1617_v63  ;;  %v1621_v5 = vmul.f32 0.33333334, %v2662_v0  ;;  %v601_v8 = vmul.f32 3.0, %v89_v52  ;;  %v94_v9 = vld [vmem:[#allocation2 + $0x238] sm:$0xff]  ;;  %v2664_v15 = vround.rtne.f32 %v599_v6 }
  0x4d   :  { %2130 = vst [vmem:[#allocation5 + $0x1d8] sm:$0xff] %v1618_v1  ;;  %2131 = vst [vmem:[#allocation5 + $0x1e0] sm:$0xff] %v1619_v2  ;;  %v1622_v10 = vmul.f32 0.33333334, %v2663_v4  ;;  %v602_v11 = vmul.f32 3.0, %v90_v53  ;;  %v603_v12 = vmul.f32 3.0, %v91_v58  ;;  %v2665_v16 = vround.rtne.f32 %v600_v7 }
  0x4e   :  { %2132 = vst [vmem:[#allocation5 + $0x1e8] sm:$0xff] %v1620_v3  ;;  %v604_v13 = vmul.f32 3.0, %v92_v59  ;;  %v95_v14 = vld [vmem:[#allocation2 + $0x240] sm:$0xff]  ;;  %2133 = vst [vmem:[#allocation5 + $0x1f0] sm:$0xff] %v1621_v5  ;;  %v2666_v17 = vround.rtne.f32 %v601_v8  ;;  %v605_v18 = vmul.f32 3.0, %v93_v60  ;;  %v96_v19 = vld [vmem:[#allocation2 + $0x248] sm:$0xff] }
  0x4f   :  { %v97_v20 = vld [vmem:[#allocation2 + $0x250] sm:$0xff]  ;;  %v98_v21 = vld [vmem:[#allocation2 + $0x258] sm:$0xff]  ;;  %2134 = vst [vmem:[#allocation5 + $0x1f8] sm:$0xff] %v1622_v10  ;;  %v2667_v22 = vround.rtne.f32 %v602_v11  ;;  %v2668_v23 = vround.rtne.f32 %v603_v12  ;;  %v606_v25 = vmul.f32 3.0, %v94_v9  ;;  %v99_v26 = vld [vmem:[#allocation2 + $0x260] sm:$0xff]  ;;  %v607_v38 = vmul.f32 3.0, %v95_v14 }
  0x50   :  { %v2669_v24 = vround.rtne.f32 %v604_v13  ;;  %v100_v27 = vld [vmem:[#allocation2 + $0x268] sm:$0xff]  ;;  %v101_v28 = vld [vmem:[#allocation2 + $0x270] sm:$0xff]  ;;  %v1623_v29 = vmul.f32 0.33333334, %v2664_v15  ;;  %v1624_v30 = vmul.f32 0.33333334, %v2665_v16  ;;  %v2670_v32 = vround.rtne.f32 %v605_v18 }
  0x51   :  { %v1625_v31 = vmul.f32 0.33333334, %v2666_v17  ;;  %v1626_v33 = vmul.f32 0.33333334, %v2667_v22  ;;  %v1627_v34 = vmul.f32 0.33333334, %v2668_v23  ;;  %v2671_v36 = vround.rtne.f32 %v606_v25 }
  0x52   :  { %v1628_v35 = vmul.f32 0.33333334, %v2669_v24  ;;  %2135 = vst [vmem:[#allocation5 + $0x200] sm:$0xff] %v1623_v29  ;;  %2136 = vst [vmem:[#allocation5 + $0x208] sm:$0xff] %v1624_v30  ;;  %v1629_v37 = vmul.f32 0.33333334, %v2670_v32  ;;  %v2672_v47 = vround.rtne.f32 %v607_v38 }
  0x53   :  { %2137 = vst [vmem:[#allocation5 + $0x210] sm:$0xff] %v1625_v31  ;;  %v608_v39 = vmul.f32 3.0, %v96_v19  ;;  %v609_v40 = vmul.f32 3.0, %v97_v20  ;;  %v102_v41 = vld [vmem:[#allocation2 + $0x278] sm:$0xff]  ;;  %2138 = vst [vmem:[#allocation5 + $0x218] sm:$0xff] %v1626_v33  ;;  %v610_v43 = vmul.f32 3.0, %v98_v21 }
  0x54   :  { %2139 = vst [vmem:[#allocation5 + $0x220] sm:$0xff] %v1627_v34  ;;  %2140 = vst [vmem:[#allocation5 + $0x228] sm:$0xff] %v1628_v35  ;;  %v1630_v42 = vmul.f32 0.33333334, %v2671_v36  ;;  %v611_v44 = vmul.f32 3.0, %v99_v26  ;;  %v612_v45 = vmul.f32 3.0, %v100_v27 }
  0x55   :  { %v103_v46 = vld [vmem:[#allocation2 + $0x280] sm:$0xff]  ;;  %2141 = vst [vmem:[#allocation5 + $0x230] sm:$0xff] %v1629_v37  ;;  %v2673_v48 = vround.rtne.f32 %v608_v39  ;;  %v2674_v49 = vround.rtne.f32 %v609_v40  ;;  %v613_v50 = vmul.f32 3.0, %v101_v28  ;;  %v104_v51 = vld [vmem:[#allocation2 + $0x288] sm:$0xff]  ;;  %v105_v52 = vld [vmem:[#allocation2 + $0x290] sm:$0xff]  ;;  %v2675_v54 = vround.rtne.f32 %v610_v43 }
  0x56   :  { %v106_v53 = vld [vmem:[#allocation2 + $0x298] sm:$0xff]  ;;  %2142 = vst [vmem:[#allocation5 + $0x238] sm:$0xff] %v1630_v42  ;;  %v2676_v55 = vround.rtne.f32 %v611_v44  ;;  %v2677_v56 = vround.rtne.f32 %v612_v45  ;;  %v614_v57 = vmul.f32 3.0, %v102_v41  ;;  %v107_v58 = vld [vmem:[#allocation2 + $0x2a0] sm:$0xff]  ;;  %v108_v59 = vld [vmem:[#allocation2 + $0x2a8] sm:$0xff]  ;;  %v615_v6 = vmul.f32 3.0, %v103_v46 }
  0x57   :  { %v109_v60 = vld [vmem:[#allocation2 + $0x2b0] sm:$0xff]  ;;  %v1631_v61 = vmul.f32 0.33333334, %v2672_v47  ;;  %v1632_v62 = vmul.f32 0.33333334, %v2673_v48  ;;  %v2678_v0 = vround.rtne.f32 %v613_v50  ;;  %v616_v7 = vmul.f32 3.0, %v104_v51 }
  0x58   :  { %v1633_v63 = vmul.f32 0.33333334, %v2674_v49  ;;  %v1634_v1 = vmul.f32 0.33333334, %v2675_v54  ;;  %v1635_v2 = vmul.f32 0.33333334, %v2676_v55  ;;  %v2679_v4 = vround.rtne.f32 %v614_v57 }
  0x59   :  { %v1636_v3 = vmul.f32 0.33333334, %v2677_v56  ;;  %2143 = vst [vmem:[#allocation5 + $0x240] sm:$0xff] %v1631_v61  ;;  %2144 = vst [vmem:[#allocation5 + $0x248] sm:$0xff] %v1632_v62  ;;  %v1637_v5 = vmul.f32 0.33333334, %v2678_v0  ;;  %v2680_v15 = vround.rtne.f32 %v615_v6  ;;  %v2681_v16 = vround.rtne.f32 %v616_v7 }
  0x5a   :  { %2145 = vst [vmem:[#allocation5 + $0x250] sm:$0xff] %v1633_v63  ;;  %v617_v8 = vmul.f32 3.0, %v105_v52  ;;  %v110_v9 = vld [vmem:[#allocation2 + $0x2b8] sm:$0xff]  ;;  %2146 = vst [vmem:[#allocation5 + $0x258] sm:$0xff] %v1634_v1  ;;  %v1638_v10 = vmul.f32 0.33333334, %v2679_v4 }
  0x5b   :  { %2147 = vst [vmem:[#allocation5 + $0x260] sm:$0xff] %v1635_v2  ;;  %2148 = vst [vmem:[#allocation5 + $0x268] sm:$0xff] %v1636_v3  ;;  %v618_v11 = vmul.f32 3.0, %v106_v53  ;;  %v619_v12 = vmul.f32 3.0, %v107_v58  ;;  %v620_v13 = vmul.f32 3.0, %v108_v59  ;;  %v111_v14 = vld [vmem:[#allocation2 + $0x2c0] sm:$0xff] }
  0x5c   :  { %2149 = vst [vmem:[#allocation5 + $0x270] sm:$0xff] %v1637_v5  ;;  %v2682_v17 = vround.rtne.f32 %v617_v8  ;;  %v621_v18 = vmul.f32 3.0, %v109_v60  ;;  %v112_v19 = vld [vmem:[#allocation2 + $0x2c8] sm:$0xff]  ;;  %v113_v20 = vld [vmem:[#allocation2 + $0x2d0] sm:$0xff]  ;;  %v114_v21 = vld [vmem:[#allocation2 + $0x2d8] sm:$0xff]  ;;  %v622_v25 = vmul.f32 3.0, %v110_v9 }
  0x5d   :  { %2150 = vst [vmem:[#allocation5 + $0x278] sm:$0xff] %v1638_v10  ;;  %v2683_v22 = vround.rtne.f32 %v618_v11  ;;  %v2684_v23 = vround.rtne.f32 %v619_v12  ;;  %v2685_v24 = vround.rtne.f32 %v620_v13  ;;  %v115_v26 = vld [vmem:[#allocation2 + $0x2e0] sm:$0xff]  ;;  %v116_v27 = vld [vmem:[#allocation2 + $0x2e8] sm:$0xff]  ;;  %v117_v28 = vld [vmem:[#allocation2 + $0x2f0] sm:$0xff]  ;;  %v1639_v29 = vmul.f32 0.33333334, %v2680_v15 }
  0x5e   :  { %v1640_v30 = vmul.f32 0.33333334, %v2681_v16  ;;  %v1641_v31 = vmul.f32 0.33333334, %v2682_v17  ;;  %v2686_v32 = vround.rtne.f32 %v621_v18  ;;  %v2687_v36 = vround.rtne.f32 %v622_v25  ;;  %v118_v41 = vld [vmem:[#allocation2 + $0x2f8] sm:$0xff]  ;;  %v119_v46 = vld [vmem:[#allocation2 + $0x300] sm:$0xff] }
  0x5f   :  { %v1642_v33 = vmul.f32 0.33333334, %v2683_v22  ;;  %v1643_v34 = vmul.f32 0.33333334, %v2684_v23  ;;  %v1644_v35 = vmul.f32 0.33333334, %v2685_v24 }
  0x60   :  { %2151 = vst [vmem:[#allocation5 + $0x280] sm:$0xff] %v1639_v29  ;;  %2152 = vst [vmem:[#allocation5 + $0x288] sm:$0xff] %v1640_v30  ;;  %v1645_v37 = vmul.f32 0.33333334, %v2686_v32  ;;  %v623_v38 = vmul.f32 3.0, %v111_v14  ;;  %v624_v39 = vmul.f32 3.0, %v112_v19 }
  0x61   :  { %2153 = vst [vmem:[#allocation5 + $0x290] sm:$0xff] %v1641_v31  ;;  %v625_v40 = vmul.f32 3.0, %v113_v20  ;;  %2154 = vst [vmem:[#allocation5 + $0x298] sm:$0xff] %v1642_v33  ;;  %v1646_v42 = vmul.f32 0.33333334, %v2687_v36  ;;  %v626_v43 = vmul.f32 3.0, %v114_v21 }
  0x62   :  { %2155 = vst [vmem:[#allocation5 + $0x2a0] sm:$0xff] %v1643_v34  ;;  %2156 = vst [vmem:[#allocation5 + $0x2a8] sm:$0xff] %v1644_v35  ;;  %v627_v44 = vmul.f32 3.0, %v115_v26  ;;  %v628_v45 = vmul.f32 3.0, %v116_v27  ;;  %v2688_v47 = vround.rtne.f32 %v623_v38  ;;  %v2689_v48 = vround.rtne.f32 %v624_v39  ;;  %v120_v51 = vld [vmem:[#allocation2 + $0x308] sm:$0xff]  ;;  %v121_v52 = vld [vmem:[#allocation2 + $0x310] sm:$0xff] }
  0x63   :  { %2157 = vst [vmem:[#allocation5 + $0x2b0] sm:$0xff] %v1645_v37  ;;  %v2690_v49 = vround.rtne.f32 %v625_v40  ;;  %v629_v50 = vmul.f32 3.0, %v117_v28  ;;  %v122_v53 = vld [vmem:[#allocation2 + $0x318] sm:$0xff]  ;;  %2158 = vst [vmem:[#allocation5 + $0x2b8] sm:$0xff] %v1646_v42  ;;  %v2691_v54 = vround.rtne.f32 %v626_v43  ;;  %v630_v57 = vmul.f32 3.0, %v118_v41  ;;  %v123_v58 = vld [vmem:[#allocation2 + $0x320] sm:$0xff] }
  0x64   :  { %v2692_v55 = vround.rtne.f32 %v627_v44  ;;  %v2693_v56 = vround.rtne.f32 %v628_v45  ;;  %v124_v59 = vld [vmem:[#allocation2 + $0x328] sm:$0xff]  ;;  %v125_v60 = vld [vmem:[#allocation2 + $0x330] sm:$0xff]  ;;  %v1647_v61 = vmul.f32 0.33333334, %v2688_v47  ;;  %v1648_v62 = vmul.f32 0.33333334, %v2689_v48 }
  0x65   :  { %v1649_v63 = vmul.f32 0.33333334, %v2690_v49  ;;  %v2694_v0 = vround.rtne.f32 %v629_v50  ;;  %v1650_v1 = vmul.f32 0.33333334, %v2691_v54  ;;  %v2695_v4 = vround.rtne.f32 %v630_v57  ;;  %v126_v9 = vld [vmem:[#allocation2 + $0x338] sm:$0xff]  ;;  %v127_v14 = vld [vmem:[#allocation2 + $0x340] sm:$0xff] }
  0x66   :  { %v1651_v2 = vmul.f32 0.33333334, %v2692_v55  ;;  %v1652_v3 = vmul.f32 0.33333334, %v2693_v56  ;;  %2159 = vst [vmem:[#allocation5 + $0x2c0] sm:$0xff] %v1647_v61  ;;  %2160 = vst [vmem:[#allocation5 + $0x2c8] sm:$0xff] %v1648_v62 }
  0x67   :  { %2161 = vst [vmem:[#allocation5 + $0x2d0] sm:$0xff] %v1649_v63  ;;  %v1653_v5 = vmul.f32 0.33333334, %v2694_v0  ;;  %v631_v6 = vmul.f32 3.0, %v119_v46  ;;  %v632_v7 = vmul.f32 3.0, %v120_v51  ;;  %v633_v8 = vmul.f32 3.0, %v121_v52 }
  0x68   :  { %2162 = vst [vmem:[#allocation5 + $0x2d8] sm:$0xff] %v1650_v1  ;;  %2163 = vst [vmem:[#allocation5 + $0x2e0] sm:$0xff] %v1651_v2  ;;  %v1654_v10 = vmul.f32 0.33333334, %v2695_v4  ;;  %v634_v11 = vmul.f32 3.0, %v122_v53  ;;  %v635_v12 = vmul.f32 3.0, %v123_v58 }
  0x69   :  { %2164 = vst [vmem:[#allocation5 + $0x2e8] sm:$0xff] %v1652_v3  ;;  %v636_v13 = vmul.f32 3.0, %v124_v59  ;;  %2165 = vst [vmem:[#allocation5 + $0x2f0] sm:$0xff] %v1653_v5  ;;  %v2696_v15 = vround.rtne.f32 %v631_v6  ;;  %v2697_v16 = vround.rtne.f32 %v632_v7  ;;  %v2698_v17 = vround.rtne.f32 %v633_v8  ;;  %v128_v19 = vld [vmem:[#allocation2 + $0x348] sm:$0xff]  ;;  %v129_v20 = vld [vmem:[#allocation2 + $0x350] sm:$0xff] }
  0x6a   :  { %v637_v18 = vmul.f32 3.0, %v125_v60  ;;  %v130_v21 = vld [vmem:[#allocation2 + $0x358] sm:$0xff]  ;;  %2166 = vst [vmem:[#allocation5 + $0x2f8] sm:$0xff] %v1654_v10  ;;  %v2699_v22 = vround.rtne.f32 %v634_v11  ;;  %v2700_v23 = vround.rtne.f32 %v635_v12  ;;  %v638_v25 = vmul.f32 3.0, %v126_v9  ;;  %v131_v26 = vld [vmem:[#allocation2 + $0x360] sm:$0xff]  ;;  %v132_v27 = vld [vmem:[#allocation2 + $0x368] sm:$0xff] }
  0x6b   :  { %v2701_v24 = vround.rtne.f32 %v636_v13  ;;  %v133_v28 = vld [vmem:[#allocation2 + $0x370] sm:$0xff]  ;;  %v1655_v29 = vmul.f32 0.33333334, %v2696_v15  ;;  %v1656_v30 = vmul.f32 0.33333334, %v2697_v16  ;;  %v639_v38 = vmul.f32 3.0, %v127_v14 }
  0x6c   :  { %v1657_v31 = vmul.f32 0.33333334, %v2698_v17  ;;  %v2702_v32 = vround.rtne.f32 %v637_v18  ;;  %v1658_v33 = vmul.f32 0.33333334, %v2699_v22  ;;  %v1659_v34 = vmul.f32 0.33333334, %v2700_v23 }
  0x6d   :  { %v1660_v35 = vmul.f32 0.33333334, %v2701_v24  ;;  %v2703_v36 = vround.rtne.f32 %v638_v25  ;;  %2167 = vst [vmem:[#allocation5 + $0x300] sm:$0xff] %v1655_v29  ;;  %2168 = vst [vmem:[#allocation5 + $0x308] sm:$0xff] %v1656_v30  ;;  %v640_v39 = vmul.f32 3.0, %v128_v19  ;;  %v641_v40 = vmul.f32 3.0, %v129_v20 }
  0x6e   :  { %2169 = vst [vmem:[#allocation5 + $0x310] sm:$0xff] %v1657_v31  ;;  %v1661_v37 = vmul.f32 0.33333334, %v2702_v32  ;;  %v134_v41 = vld [vmem:[#allocation2 + $0x378] sm:$0xff]  ;;  %2170 = vst [vmem:[#allocation5 + $0x318] sm:$0xff] %v1658_v33  ;;  %v642_v43 = vmul.f32 3.0, %v130_v21  ;;  %v2704_v47 = vround.rtne.f32 %v639_v38 }
  0x6f   :  { %2171 = vst [vmem:[#allocation5 + $0x320] sm:$0xff] %v1659_v34  ;;  %2172 = vst [vmem:[#allocation5 + $0x328] sm:$0xff] %v1660_v35  ;;  %v1662_v42 = vmul.f32 0.33333334, %v2703_v36  ;;  %v643_v44 = vmul.f32 3.0, %v131_v26  ;;  %v644_v45 = vmul.f32 3.0, %v132_v27  ;;  %v2705_v48 = vround.rtne.f32 %v640_v39 }
  0x70   :  { %v135_v46 = vld [vmem:[#allocation2 + $0x380] sm:$0xff]  ;;  %2173 = vst [vmem:[#allocation5 + $0x330] sm:$0xff] %v1661_v37  ;;  %v2706_v49 = vround.rtne.f32 %v641_v40  ;;  %v645_v50 = vmul.f32 3.0, %v133_v28  ;;  %v136_v51 = vld [vmem:[#allocation2 + $0x388] sm:$0xff]  ;;  %v137_v52 = vld [vmem:[#allocation2 + $0x390] sm:$0xff]  ;;  %v2707_v54 = vround.rtne.f32 %v642_v43  ;;  %v646_v57 = vmul.f32 3.0, %v134_v41 }
  0x71   :  { %v138_v53 = vld [vmem:[#allocation2 + $0x398] sm:$0xff]  ;;  %2174 = vst [vmem:[#allocation5 + $0x338] sm:$0xff] %v1662_v42  ;;  %v2708_v55 = vround.rtne.f32 %v643_v44  ;;  %v2709_v56 = vround.rtne.f32 %v644_v45  ;;  %v139_v58 = vld [vmem:[#allocation2 + $0x3a0] sm:$0xff]  ;;  %v140_v59 = vld [vmem:[#allocation2 + $0x3a8] sm:$0xff]  ;;  %v1663_v61 = vmul.f32 0.33333334, %v2704_v47 }
  0x72   :  { %v141_v60 = vld [vmem:[#allocation2 + $0x3b0] sm:$0xff]  ;;  %v1664_v62 = vmul.f32 0.33333334, %v2705_v48  ;;  %v1665_v63 = vmul.f32 0.33333334, %v2706_v49  ;;  %v2710_v0 = vround.rtne.f32 %v645_v50  ;;  %v2711_v4 = vround.rtne.f32 %v646_v57  ;;  %v142_v9 = vld [vmem:[#allocation2 + $0x3b8] sm:$0xff] }
  0x73   :  { %v1666_v1 = vmul.f32 0.33333334, %v2707_v54  ;;  %v1667_v2 = vmul.f32 0.33333334, %v2708_v55  ;;  %v1668_v3 = vmul.f32 0.33333334, %v2709_v56 }
  0x74   :  { %2175 = vst [vmem:[#allocation5 + $0x340] sm:$0xff] %v1663_v61  ;;  %2176 = vst [vmem:[#allocation5 + $0x348] sm:$0xff] %v1664_v62  ;;  %v1669_v5 = vmul.f32 0.33333334, %v2710_v0  ;;  %v647_v6 = vmul.f32 3.0, %v135_v46  ;;  %v648_v7 = vmul.f32 3.0, %v136_v51 }
  0x75   :  { %2177 = vst [vmem:[#allocation5 + $0x350] sm:$0xff] %v1665_v63  ;;  %v649_v8 = vmul.f32 3.0, %v137_v52  ;;  %2178 = vst [vmem:[#allocation5 + $0x358] sm:$0xff] %v1666_v1  ;;  %v1670_v10 = vmul.f32 0.33333334, %v2711_v4  ;;  %v650_v11 = vmul.f32 3.0, %v138_v53 }
  0x76   :  { %2179 = vst [vmem:[#allocation5 + $0x360] sm:$0xff] %v1667_v2  ;;  %2180 = vst [vmem:[#allocation5 + $0x368] sm:$0xff] %v1668_v3  ;;  %v651_v12 = vmul.f32 3.0, %v139_v58  ;;  %v652_v13 = vmul.f32 3.0, %v140_v59  ;;  %v143_v14 = vld [vmem:[#allocation2 + $0x3c0] sm:$0xff]  ;;  %v2712_v15 = vround.rtne.f32 %v647_v6  ;;  %v2713_v16 = vround.rtne.f32 %v648_v7  ;;  %v144_v19 = vld [vmem:[#allocation2 + $0x3c8] sm:$0xff] }
  0x77   :  { %2181 = vst [vmem:[#allocation5 + $0x370] sm:$0xff] %v1669_v5  ;;  %v2714_v17 = vround.rtne.f32 %v649_v8  ;;  %v653_v18 = vmul.f32 3.0, %v141_v60  ;;  %v145_v20 = vld [vmem:[#allocation2 + $0x3d0] sm:$0xff]  ;;  %v146_v21 = vld [vmem:[#allocation2 + $0x3d8] sm:$0xff]  ;;  %2182 = vst [vmem:[#allocation5 + $0x378] sm:$0xff] %v1670_v10  ;;  %v2715_v22 = vround.rtne.f32 %v650_v11  ;;  %v654_v25 = vmul.f32 3.0, %v142_v9 }
  0x78   :  { %v2716_v23 = vround.rtne.f32 %v651_v12  ;;  %v2717_v24 = vround.rtne.f32 %v652_v13  ;;  %v147_v26 = vld [vmem:[#allocation2 + $0x3e0] sm:$0xff]  ;;  %v148_v27 = vld [vmem:[#allocation2 + $0x3e8] sm:$0xff]  ;;  %v149_v28 = vld [vmem:[#allocation2 + $0x3f0] sm:$0xff]  ;;  %v1671_v29 = vmul.f32 0.33333334, %v2712_v15  ;;  %v655_v38 = vmul.f32 3.0, %v143_v14 }
  0x79   :  { %v1672_v30 = vmul.f32 0.33333334, %v2713_v16  ;;  %v1673_v31 = vmul.f32 0.33333334, %v2714_v17  ;;  %v2718_v32 = vround.rtne.f32 %v653_v18  ;;  %v1674_v33 = vmul.f32 0.33333334, %v2715_v22 }
  0x7a   :  { %v1675_v34 = vmul.f32 0.33333334, %v2716_v23  ;;  %v1676_v35 = vmul.f32 0.33333334, %v2717_v24  ;;  %v2719_v36 = vround.rtne.f32 %v654_v25  ;;  %2183 = vst [vmem:[#allocation5 + $0x380] sm:$0xff] %v1671_v29  ;;  %v656_v39 = vmul.f32 3.0, %v144_v19 }
  0x7b   :  { %2184 = vst [vmem:[#allocation5 + $0x388] sm:$0xff] %v1672_v30  ;;  %2185 = vst [vmem:[#allocation5 + $0x390] sm:$0xff] %v1673_v31  ;;  %v1677_v37 = vmul.f32 0.33333334, %v2718_v32  ;;  %v657_v40 = vmul.f32 3.0, %v145_v20  ;;  %v150_v41 = vld [vmem:[#allocation2 + $0x3f8] sm:$0xff]  ;;  %v2720_v47 = vround.rtne.f32 %v655_v38 }
  0x7c   :  { %2186 = vst [vmem:[#allocation5 + $0x398] sm:$0xff] %v1674_v33  ;;  %2187 = vst [vmem:[#allocation5 + $0x3a0] sm:$0xff] %v1675_v34  ;;  %v1678_v42 = vmul.f32 0.33333334, %v2719_v36  ;;  %v658_v43 = vmul.f32 3.0, %v146_v21  ;;  %v659_v44 = vmul.f32 3.0, %v147_v26  ;;  %v2721_v48 = vround.rtne.f32 %v656_v39 }
  0x7d   :  { %2188 = vst [vmem:[#allocation5 + $0x3a8] sm:$0xff] %v1676_v35  ;;  %v660_v45 = vmul.f32 3.0, %v148_v27  ;;  %v151_v46 = vld [vmem:[#allocation2 + $0x400] sm:$0xff]  ;;  %2189 = vst [vmem:[#allocation5 + $0x3b0] sm:$0xff] %v1677_v37  ;;  %v2722_v49 = vround.rtne.f32 %v657_v40  ;;  %v661_v50 = vmul.f32 3.0, %v149_v28  ;;  %v152_v51 = vld [vmem:[#allocation2 + $0x408] sm:$0xff] }
  0x7e   :  { %v153_v52 = vld [vmem:[#allocation2 + $0x410] sm:$0xff]  ;;  %v154_v53 = vld [vmem:[#allocation2 + $0x418] sm:$0xff]  ;;  %2190 = vst [vmem:[#allocation5 + $0x3b8] sm:$0xff] %v1678_v42  ;;  %v2723_v54 = vround.rtne.f32 %v658_v43  ;;  %v2724_v55 = vround.rtne.f32 %v659_v44  ;;  %v662_v57 = vmul.f32 3.0, %v150_v41  ;;  %v155_v58 = vld [vmem:[#allocation2 + $0x420] sm:$0xff]  ;;  %v663_v6 = vmul.f32 3.0, %v151_v46 }
  0x7f   :  { %v2725_v56 = vround.rtne.f32 %v660_v45  ;;  %v156_v59 = vld [vmem:[#allocation2 + $0x428] sm:$0xff]  ;;  %v157_v60 = vld [vmem:[#allocation2 + $0x430] sm:$0xff]  ;;  %v1679_v61 = vmul.f32 0.33333334, %v2720_v47  ;;  %v1680_v62 = vmul.f32 0.33333334, %v2721_v48  ;;  %v2726_v0 = vround.rtne.f32 %v661_v50 }
  0x80   :  { %v1681_v63 = vmul.f32 0.33333334, %v2722_v49  ;;  %v1682_v1 = vmul.f32 0.33333334, %v2723_v54  ;;  %v1683_v2 = vmul.f32 0.33333334, %v2724_v55  ;;  %v2727_v4 = vround.rtne.f32 %v662_v57 }
  0x81   :  { %v1684_v3 = vmul.f32 0.33333334, %v2725_v56  ;;  %2191 = vst [vmem:[#allocation5 + $0x3c0] sm:$0xff] %v1679_v61  ;;  %2192 = vst [vmem:[#allocation5 + $0x3c8] sm:$0xff] %v1680_v62  ;;  %v1685_v5 = vmul.f32 0.33333334, %v2726_v0  ;;  %v2728_v15 = vround.rtne.f32 %v663_v6 }
  0x82   :  { %2193 = vst [vmem:[#allocation5 + $0x3d0] sm:$0xff] %v1681_v63  ;;  %v664_v7 = vmul.f32 3.0, %v152_v51  ;;  %v665_v8 = vmul.f32 3.0, %v153_v52  ;;  %v158_v9 = vld [vmem:[#allocation2 + $0x438] sm:$0xff]  ;;  %2194 = vst [vmem:[#allocation5 + $0x3d8] sm:$0xff] %v1682_v1  ;;  %v666_v11 = vmul.f32 3.0, %v154_v53 }
  0x83   :  { %2195 = vst [vmem:[#allocation5 + $0x3e0] sm:$0xff] %v1683_v2  ;;  %2196 = vst [vmem:[#allocation5 + $0x3e8] sm:$0xff] %v1684_v3  ;;  %v1686_v10 = vmul.f32 0.33333334, %v2727_v4  ;;  %v667_v12 = vmul.f32 3.0, %v155_v58  ;;  %v668_v13 = vmul.f32 3.0, %v156_v59 }
  0x84   :  { %v159_v14 = vld [vmem:[#allocation2 + $0x440] sm:$0xff]  ;;  %2197 = vst [vmem:[#allocation5 + $0x3f0] sm:$0xff] %v1685_v5  ;;  %v2729_v16 = vround.rtne.f32 %v664_v7  ;;  %v2730_v17 = vround.rtne.f32 %v665_v8  ;;  %v669_v18 = vmul.f32 3.0, %v157_v60  ;;  %v160_v19 = vld [vmem:[#allocation2 + $0x448] sm:$0xff]  ;;  %v161_v20 = vld [vmem:[#allocation2 + $0x450] sm:$0xff]  ;;  %v2731_v22 = vround.rtne.f32 %v666_v11 }
  0x85   :  { %v162_v21 = vld [vmem:[#allocation2 + $0x458] sm:$0xff]  ;;  %2198 = vst [vmem:[#allocation5 + $0x3f8] sm:$0xff] %v1686_v10  ;;  %v2732_v23 = vround.rtne.f32 %v667_v12  ;;  %v2733_v24 = vround.rtne.f32 %v668_v13  ;;  %v670_v25 = vmul.f32 3.0, %v158_v9  ;;  %v163_v26 = vld [vmem:[#allocation2 + $0x460] sm:$0xff]  ;;  %v164_v27 = vld [vmem:[#allocation2 + $0x468] sm:$0xff]  ;;  %v671_v38 = vmul.f32 3.0, %v159_v14 }
  0x86   :  { %v165_v28 = vld [vmem:[#allocation2 + $0x470] sm:$0xff]  ;;  %v1687_v29 = vmul.f32 0.33333334, %v2728_v15  ;;  %v1688_v30 = vmul.f32 0.33333334, %v2729_v16  ;;  %v2734_v32 = vround.rtne.f32 %v669_v18  ;;  %v672_v39 = vmul.f32 3.0, %v160_v19 }
  0x87   :  { %v1689_v31 = vmul.f32 0.33333334, %v2730_v17  ;;  %v1690_v33 = vmul.f32 0.33333334, %v2731_v22  ;;  %v1691_v34 = vmul.f32 0.33333334, %v2732_v23  ;;  %v2735_v36 = vround.rtne.f32 %v670_v25 }
  0x88   :  { %v1692_v35 = vmul.f32 0.33333334, %v2733_v24  ;;  %2199 = vst [vmem:[#allocation5 + $0x400] sm:$0xff] %v1687_v29  ;;  %2200 = vst [vmem:[#allocation5 + $0x408] sm:$0xff] %v1688_v30  ;;  %v1693_v37 = vmul.f32 0.33333334, %v2734_v32  ;;  %v2736_v47 = vround.rtne.f32 %v671_v38  ;;  %v2737_v48 = vround.rtne.f32 %v672_v39 }
  0x89   :  { %2201 = vst [vmem:[#allocation5 + $0x410] sm:$0xff] %v1689_v31  ;;  %v673_v40 = vmul.f32 3.0, %v161_v20  ;;  %v166_v41 = vld [vmem:[#allocation2 + $0x478] sm:$0xff]  ;;  %2202 = vst [vmem:[#allocation5 + $0x418] sm:$0xff] %v1690_v33  ;;  %v1694_v42 = vmul.f32 0.33333334, %v2735_v36 }
  0x8a   :  { %2203 = vst [vmem:[#allocation5 + $0x420] sm:$0xff] %v1691_v34  ;;  %2204 = vst [vmem:[#allocation5 + $0x428] sm:$0xff] %v1692_v35  ;;  %v674_v43 = vmul.f32 3.0, %v162_v21  ;;  %v675_v44 = vmul.f32 3.0, %v163_v26  ;;  %v676_v45 = vmul.f32 3.0, %v164_v27  ;;  %v167_v46 = vld [vmem:[#allocation2 + $0x480] sm:$0xff] }
  0x8b   :  { %2205 = vst [vmem:[#allocation5 + $0x430] sm:$0xff] %v1693_v37  ;;  %v2738_v49 = vround.rtne.f32 %v673_v40  ;;  %v677_v50 = vmul.f32 3.0, %v165_v28  ;;  %v168_v51 = vld [vmem:[#allocation2 + $0x488] sm:$0xff]  ;;  %v169_v52 = vld [vmem:[#allocation2 + $0x490] sm:$0xff]  ;;  %v170_v53 = vld [vmem:[#allocation2 + $0x498] sm:$0xff]  ;;  %v678_v57 = vmul.f32 3.0, %v166_v41 }
  0x8c   :  { %2206 = vst [vmem:[#allocation5 + $0x438] sm:$0xff] %v1694_v42  ;;  %v2739_v54 = vround.rtne.f32 %v674_v43  ;;  %v2740_v55 = vround.rtne.f32 %v675_v44  ;;  %v2741_v56 = vround.rtne.f32 %v676_v45  ;;  %v171_v58 = vld [vmem:[#allocation2 + $0x4a0] sm:$0xff]  ;;  %v172_v59 = vld [vmem:[#allocation2 + $0x4a8] sm:$0xff]  ;;  %v173_v60 = vld [vmem:[#allocation2 + $0x4b0] sm:$0xff]  ;;  %v1695_v61 = vmul.f32 0.33333334, %v2736_v47 }
  0x8d   :  { %v1696_v62 = vmul.f32 0.33333334, %v2737_v48  ;;  %v1697_v63 = vmul.f32 0.33333334, %v2738_v49  ;;  %v2742_v0 = vround.rtne.f32 %v677_v50  ;;  %v2743_v4 = vround.rtne.f32 %v678_v57  ;;  %v174_v9 = vld [vmem:[#allocation2 + $0x4b8] sm:$0xff]  ;;  %v175_v14 = vld [vmem:[#allocation2 + $0x4c0] sm:$0xff] }
  0x8e   :  { %v1698_v1 = vmul.f32 0.33333334, %v2739_v54  ;;  %v1699_v2 = vmul.f32 0.33333334, %v2740_v55  ;;  %v1700_v3 = vmul.f32 0.33333334, %v2741_v56 }
  0x8f   :  { %2207 = vst [vmem:[#allocation5 + $0x440] sm:$0xff] %v1695_v61  ;;  %2208 = vst [vmem:[#allocation5 + $0x448] sm:$0xff] %v1696_v62  ;;  %v1701_v5 = vmul.f32 0.33333334, %v2742_v0  ;;  %v679_v6 = vmul.f32 3.0, %v167_v46  ;;  %v680_v7 = vmul.f32 3.0, %v168_v51 }
  0x90   :  { %2209 = vst [vmem:[#allocation5 + $0x450] sm:$0xff] %v1697_v63  ;;  %v681_v8 = vmul.f32 3.0, %v169_v52  ;;  %2210 = vst [vmem:[#allocation5 + $0x458] sm:$0xff] %v1698_v1  ;;  %v1702_v10 = vmul.f32 0.33333334, %v2743_v4  ;;  %v682_v11 = vmul.f32 3.0, %v170_v53 }
  0x91   :  { %2211 = vst [vmem:[#allocation5 + $0x460] sm:$0xff] %v1699_v2  ;;  %2212 = vst [vmem:[#allocation5 + $0x468] sm:$0xff] %v1700_v3  ;;  %v683_v12 = vmul.f32 3.0, %v171_v58  ;;  %v684_v13 = vmul.f32 3.0, %v172_v59  ;;  %v2744_v15 = vround.rtne.f32 %v679_v6  ;;  %v2745_v16 = vround.rtne.f32 %v680_v7  ;;  %v176_v19 = vld [vmem:[#allocation2 + $0x4c8] sm:$0xff]  ;;  %v177_v20 = vld [vmem:[#allocation2 + $0x4d0] sm:$0xff] }
  0x92   :  { %2213 = vst [vmem:[#allocation5 + $0x470] sm:$0xff] %v1701_v5  ;;  %v2746_v17 = vround.rtne.f32 %v681_v8  ;;  %v685_v18 = vmul.f32 3.0, %v173_v60  ;;  %v178_v21 = vld [vmem:[#allocation2 + $0x4d8] sm:$0xff]  ;;  %2214 = vst [vmem:[#allocation5 + $0x478] sm:$0xff] %v1702_v10  ;;  %v2747_v22 = vround.rtne.f32 %v682_v11  ;;  %v686_v25 = vmul.f32 3.0, %v174_v9  ;;  %v179_v26 = vld [vmem:[#allocation2 + $0x4e0] sm:$0xff] }
  0x93   :  { %v2748_v23 = vround.rtne.f32 %v683_v12  ;;  %v2749_v24 = vround.rtne.f32 %v684_v13  ;;  %v180_v27 = vld [vmem:[#allocation2 + $0x4e8] sm:$0xff]  ;;  %v181_v28 = vld [vmem:[#allocation2 + $0x4f0] sm:$0xff]  ;;  %v1703_v29 = vmul.f32 0.33333334, %v2744_v15  ;;  %v1704_v30 = vmul.f32 0.33333334, %v2745_v16 }
  0x94   :  { %v1705_v31 = vmul.f32 0.33333334, %v2746_v17  ;;  %v2750_v32 = vround.rtne.f32 %v685_v18  ;;  %v1706_v33 = vmul.f32 0.33333334, %v2747_v22  ;;  %v2751_v36 = vround.rtne.f32 %v686_v25  ;;  %v182_v41 = vld [vmem:[#allocation2 + $0x4f8] sm:$0xff]  ;;  %v183_v46 = vld [vmem:[#allocation2 + $0x500] sm:$0xff] }
  0x95   :  { %v1707_v34 = vmul.f32 0.33333334, %v2748_v23  ;;  %v1708_v35 = vmul.f32 0.33333334, %v2749_v24  ;;  %2215 = vst [vmem:[#allocation5 + $0x480] sm:$0xff] %v1703_v29  ;;  %2216 = vst [vmem:[#allocation5 + $0x488] sm:$0xff] %v1704_v30 }
  0x96   :  { %2217 = vst [vmem:[#allocation5 + $0x490] sm:$0xff] %v1705_v31  ;;  %v1709_v37 = vmul.f32 0.33333334, %v2750_v32  ;;  %v687_v38 = vmul.f32 3.0, %v175_v14  ;;  %v688_v39 = vmul.f32 3.0, %v176_v19  ;;  %v689_v40 = vmul.f32 3.0, %v177_v20 }
  0x97   :  { %2218 = vst [vmem:[#allocation5 + $0x498] sm:$0xff] %v1706_v33  ;;  %2219 = vst [vmem:[#allocation5 + $0x4a0] sm:$0xff] %v1707_v34  ;;  %v1710_v42 = vmul.f32 0.33333334, %v2751_v36  ;;  %v690_v43 = vmul.f32 3.0, %v178_v21  ;;  %v691_v44 = vmul.f32 3.0, %v179_v26 }
  0x98   :  { %2220 = vst [vmem:[#allocation5 + $0x4a8] sm:$0xff] %v1708_v35  ;;  %v692_v45 = vmul.f32 3.0, %v180_v27  ;;  %2221 = vst [vmem:[#allocation5 + $0x4b0] sm:$0xff] %v1709_v37  ;;  %v2752_v47 = vround.rtne.f32 %v687_v38  ;;  %v2753_v48 = vround.rtne.f32 %v688_v39  ;;  %v2754_v49 = vround.rtne.f32 %v689_v40  ;;  %v184_v51 = vld [vmem:[#allocation2 + $0x508] sm:$0xff]  ;;  %v185_v52 = vld [vmem:[#allocation2 + $0x510] sm:$0xff] }
  0x99   :  { %v693_v50 = vmul.f32 3.0, %v181_v28  ;;  %v186_v53 = vld [vmem:[#allocation2 + $0x518] sm:$0xff]  ;;  %2222 = vst [vmem:[#allocation5 + $0x4b8] sm:$0xff] %v1710_v42  ;;  %v2755_v54 = vround.rtne.f32 %v690_v43  ;;  %v2756_v55 = vround.rtne.f32 %v691_v44  ;;  %v694_v57 = vmul.f32 3.0, %v182_v41  ;;  %v187_v58 = vld [vmem:[#allocation2 + $0x520] sm:$0xff]  ;;  %v188_v59 = vld [vmem:[#allocation2 + $0x528] sm:$0xff] }
  0x9a   :  { %v2757_v56 = vround.rtne.f32 %v692_v45  ;;  %v189_v60 = vld [vmem:[#allocation2 + $0x530] sm:$0xff]  ;;  %v1711_v61 = vmul.f32 0.33333334, %v2752_v47  ;;  %v1712_v62 = vmul.f32 0.33333334, %v2753_v48  ;;  %v695_v6 = vmul.f32 3.0, %v183_v46 }
  0x9b   :  { %v1713_v63 = vmul.f32 0.33333334, %v2754_v49  ;;  %v2758_v0 = vround.rtne.f32 %v693_v50  ;;  %v1714_v1 = vmul.f32 0.33333334, %v2755_v54  ;;  %v1715_v2 = vmul.f32 0.33333334, %v2756_v55 }
  0x9c   :  { %v1716_v3 = vmul.f32 0.33333334, %v2757_v56  ;;  %v2759_v4 = vround.rtne.f32 %v694_v57  ;;  %2223 = vst [vmem:[#allocation5 + $0x4c0] sm:$0xff] %v1711_v61  ;;  %2224 = vst [vmem:[#allocation5 + $0x4c8] sm:$0xff] %v1712_v62  ;;  %v696_v7 = vmul.f32 3.0, %v184_v51  ;;  %v697_v8 = vmul.f32 3.0, %v185_v52 }
  0x9d   :  { %2225 = vst [vmem:[#allocation5 + $0x4d0] sm:$0xff] %v1713_v63  ;;  %v1717_v5 = vmul.f32 0.33333334, %v2758_v0  ;;  %v190_v9 = vld [vmem:[#allocation2 + $0x538] sm:$0xff]  ;;  %2226 = vst [vmem:[#allocation5 + $0x4d8] sm:$0xff] %v1714_v1  ;;  %v698_v11 = vmul.f32 3.0, %v186_v53  ;;  %v2760_v15 = vround.rtne.f32 %v695_v6 }
  0x9e   :  { %2227 = vst [vmem:[#allocation5 + $0x4e0] sm:$0xff] %v1715_v2  ;;  %2228 = vst [vmem:[#allocation5 + $0x4e8] sm:$0xff] %v1716_v3  ;;  %v1718_v10 = vmul.f32 0.33333334, %v2759_v4  ;;  %v699_v12 = vmul.f32 3.0, %v187_v58  ;;  %v700_v13 = vmul.f32 3.0, %v188_v59  ;;  %v2761_v16 = vround.rtne.f32 %v696_v7 }
  0x9f   :  { %v191_v14 = vld [vmem:[#allocation2 + $0x540] sm:$0xff]  ;;  %2229 = vst [vmem:[#allocation5 + $0x4f0] sm:$0xff] %v1717_v5  ;;  %v2762_v17 = vround.rtne.f32 %v697_v8  ;;  %v701_v18 = vmul.f32 3.0, %v189_v60  ;;  %v192_v19 = vld [vmem:[#allocation2 + $0x548] sm:$0xff]  ;;  %v193_v20 = vld [vmem:[#allocation2 + $0x550] sm:$0xff]  ;;  %v2763_v22 = vround.rtne.f32 %v698_v11  ;;  %v702_v25 = vmul.f32 3.0, %v190_v9 }
  0xa0   :  { %v194_v21 = vld [vmem:[#allocation2 + $0x558] sm:$0xff]  ;;  %2230 = vst [vmem:[#allocation5 + $0x4f8] sm:$0xff] %v1718_v10  ;;  %v2764_v23 = vround.rtne.f32 %v699_v12  ;;  %v2765_v24 = vround.rtne.f32 %v700_v13  ;;  %v195_v26 = vld [vmem:[#allocation2 + $0x560] sm:$0xff]  ;;  %v196_v27 = vld [vmem:[#allocation2 + $0x568] sm:$0xff]  ;;  %v1719_v29 = vmul.f32 0.33333334, %v2760_v15 }
  0xa1   :  { %v197_v28 = vld [vmem:[#allocation2 + $0x570] sm:$0xff]  ;;  %v1720_v30 = vmul.f32 0.33333334, %v2761_v16  ;;  %v1721_v31 = vmul.f32 0.33333334, %v2762_v17  ;;  %v2766_v32 = vround.rtne.f32 %v701_v18  ;;  %v2767_v36 = vround.rtne.f32 %v702_v25  ;;  %v198_v41 = vld [vmem:[#allocation2 + $0x578] sm:$0xff] }
  0xa2   :  { %v1722_v33 = vmul.f32 0.33333334, %v2763_v22  ;;  %v1723_v34 = vmul.f32 0.33333334, %v2764_v23  ;;  %v1724_v35 = vmul.f32 0.33333334, %v2765_v24 }
  0xa3   :  { %2231 = vst [vmem:[#allocation5 + $0x500] sm:$0xff] %v1719_v29  ;;  %2232 = vst [vmem:[#allocation5 + $0x508] sm:$0xff] %v1720_v30  ;;  %v1725_v37 = vmul.f32 0.33333334, %v2766_v32  ;;  %v703_v38 = vmul.f32 3.0, %v191_v14  ;;  %v704_v39 = vmul.f32 3.0, %v192_v19 }
  0xa4   :  { %2233 = vst [vmem:[#allocation5 + $0x510] sm:$0xff] %v1721_v31  ;;  %v705_v40 = vmul.f32 3.0, %v193_v20  ;;  %2234 = vst [vmem:[#allocation5 + $0x518] sm:$0xff] %v1722_v33  ;;  %v1726_v42 = vmul.f32 0.33333334, %v2767_v36  ;;  %v706_v43 = vmul.f32 3.0, %v194_v21 }
  0xa5   :  { %2235 = vst [vmem:[#allocation5 + $0x520] sm:$0xff] %v1723_v34  ;;  %2236 = vst [vmem:[#allocation5 + $0x528] sm:$0xff] %v1724_v35  ;;  %v707_v44 = vmul.f32 3.0, %v195_v26  ;;  %v708_v45 = vmul.f32 3.0, %v196_v27  ;;  %v199_v46 = vld [vmem:[#allocation2 + $0x580] sm:$0xff]  ;;  %v2768_v47 = vround.rtne.f32 %v703_v38  ;;  %v2769_v48 = vround.rtne.f32 %v704_v39  ;;  %v200_v51 = vld [vmem:[#allocation2 + $0x588] sm:$0xff] }
  0xa6   :  { %2237 = vst [vmem:[#allocation5 + $0x530] sm:$0xff] %v1725_v37  ;;  %v2770_v49 = vround.rtne.f32 %v705_v40  ;;  %v709_v50 = vmul.f32 3.0, %v197_v28  ;;  %v201_v52 = vld [vmem:[#allocation2 + $0x590] sm:$0xff]  ;;  %v202_v53 = vld [vmem:[#allocation2 + $0x598] sm:$0xff]  ;;  %2238 = vst [vmem:[#allocation5 + $0x538] sm:$0xff] %v1726_v42  ;;  %v2771_v54 = vround.rtne.f32 %v706_v43  ;;  %v710_v57 = vmul.f32 3.0, %v198_v41 }
  0xa7   :  { %v2772_v55 = vround.rtne.f32 %v707_v44  ;;  %v2773_v56 = vround.rtne.f32 %v708_v45  ;;  %v203_v58 = vld [vmem:[#allocation2 + $0x5a0] sm:$0xff]  ;;  %v204_v59 = vld [vmem:[#allocation2 + $0x5a8] sm:$0xff]  ;;  %v205_v60 = vld [vmem:[#allocation2 + $0x5b0] sm:$0xff]  ;;  %v1727_v61 = vmul.f32 0.33333334, %v2768_v47  ;;  %v711_v6 = vmul.f32 3.0, %v199_v46 }
  0xa8   :  { %v1728_v62 = vmul.f32 0.33333334, %v2769_v48  ;;  %v1729_v63 = vmul.f32 0.33333334, %v2770_v49  ;;  %v2774_v0 = vround.rtne.f32 %v709_v50  ;;  %v1730_v1 = vmul.f32 0.33333334, %v2771_v54 }
  0xa9   :  { %v1731_v2 = vmul.f32 0.33333334, %v2772_v55  ;;  %v1732_v3 = vmul.f32 0.33333334, %v2773_v56  ;;  %v2775_v4 = vround.rtne.f32 %v710_v57  ;;  %2239 = vst [vmem:[#allocation5 + $0x540] sm:$0xff] %v1727_v61  ;;  %v712_v7 = vmul.f32 3.0, %v200_v51 }
  0xaa   :  { %2240 = vst [vmem:[#allocation5 + $0x548] sm:$0xff] %v1728_v62  ;;  %2241 = vst [vmem:[#allocation5 + $0x550] sm:$0xff] %v1729_v63  ;;  %v1733_v5 = vmul.f32 0.33333334, %v2774_v0  ;;  %v713_v8 = vmul.f32 3.0, %v201_v52  ;;  %v206_v9 = vld [vmem:[#allocation2 + $0x5b8] sm:$0xff]  ;;  %v2776_v15 = vround.rtne.f32 %v711_v6 }
  0xab   :  { %2242 = vst [vmem:[#allocation5 + $0x558] sm:$0xff] %v1730_v1  ;;  %2243 = vst [vmem:[#allocation5 + $0x560] sm:$0xff] %v1731_v2  ;;  %v1734_v10 = vmul.f32 0.33333334, %v2775_v4  ;;  %v714_v11 = vmul.f32 3.0, %v202_v53  ;;  %v715_v12 = vmul.f32 3.0, %v203_v58  ;;  %v2777_v16 = vround.rtne.f32 %v712_v7 }
  0xac   :  { %2244 = vst [vmem:[#allocation5 + $0x568] sm:$0xff] %v1732_v3  ;;  %v716_v13 = vmul.f32 3.0, %v204_v59  ;;  %v207_v14 = vld [vmem:[#allocation2 + $0x5c0] sm:$0xff]  ;;  %2245 = vst [vmem:[#allocation5 + $0x570] sm:$0xff] %v1733_v5  ;;  %v2778_v17 = vround.rtne.f32 %v713_v8  ;;  %v717_v18 = vmul.f32 3.0, %v205_v60  ;;  %v208_v19 = vld [vmem:[#allocation2 + $0x5c8] sm:$0xff] }
  0xad   :  { %v209_v20 = vld [vmem:[#allocation2 + $0x5d0] sm:$0xff]  ;;  %v210_v21 = vld [vmem:[#allocation2 + $0x5d8] sm:$0xff]  ;;  %2246 = vst [vmem:[#allocation5 + $0x578] sm:$0xff] %v1734_v10  ;;  %v2779_v22 = vround.rtne.f32 %v714_v11  ;;  %v2780_v23 = vround.rtne.f32 %v715_v12  ;;  %v718_v25 = vmul.f32 3.0, %v206_v9  ;;  %v211_v26 = vld [vmem:[#allocation2 + $0x5e0] sm:$0xff]  ;;  %v719_v38 = vmul.f32 3.0, %v207_v14 }
  0xae   :  { %v2781_v24 = vround.rtne.f32 %v716_v13  ;;  %v212_v27 = vld [vmem:[#allocation2 + $0x5e8] sm:$0xff]  ;;  %v213_v28 = vld [vmem:[#allocation2 + $0x5f0] sm:$0xff]  ;;  %v1735_v29 = vmul.f32 0.33333334, %v2776_v15  ;;  %v1736_v30 = vmul.f32 0.33333334, %v2777_v16  ;;  %v2782_v32 = vround.rtne.f32 %v717_v18 }
  0xaf   :  { %v1737_v31 = vmul.f32 0.33333334, %v2778_v17  ;;  %v1738_v33 = vmul.f32 0.33333334, %v2779_v22  ;;  %v1739_v34 = vmul.f32 0.33333334, %v2780_v23  ;;  %v2783_v36 = vround.rtne.f32 %v718_v25 }
  0xb0   :  { %v1740_v35 = vmul.f32 0.33333334, %v2781_v24  ;;  %2247 = vst [vmem:[#allocation5 + $0x580] sm:$0xff] %v1735_v29  ;;  %2248 = vst [vmem:[#allocation5 + $0x588] sm:$0xff] %v1736_v30  ;;  %v1741_v37 = vmul.f32 0.33333334, %v2782_v32  ;;  %v2784_v47 = vround.rtne.f32 %v719_v38 }
  0xb1   :  { %2249 = vst [vmem:[#allocation5 + $0x590] sm:$0xff] %v1737_v31  ;;  %v720_v39 = vmul.f32 3.0, %v208_v19  ;;  %v721_v40 = vmul.f32 3.0, %v209_v20  ;;  %v214_v41 = vld [vmem:[#allocation2 + $0x5f8] sm:$0xff]  ;;  %2250 = vst [vmem:[#allocation5 + $0x598] sm:$0xff] %v1738_v33  ;;  %v722_v43 = vmul.f32 3.0, %v210_v21 }
  0xb2   :  { %2251 = vst [vmem:[#allocation5 + $0x5a0] sm:$0xff] %v1739_v34  ;;  %2252 = vst [vmem:[#allocation5 + $0x5a8] sm:$0xff] %v1740_v35  ;;  %v1742_v42 = vmul.f32 0.33333334, %v2783_v36  ;;  %v723_v44 = vmul.f32 3.0, %v211_v26  ;;  %v724_v45 = vmul.f32 3.0, %v212_v27 }
  0xb3   :  { %v215_v46 = vld [vmem:[#allocation2 + $0x600] sm:$0xff]  ;;  %2253 = vst [vmem:[#allocation5 + $0x5b0] sm:$0xff] %v1741_v37  ;;  %v2785_v48 = vround.rtne.f32 %v720_v39  ;;  %v2786_v49 = vround.rtne.f32 %v721_v40  ;;  %v725_v50 = vmul.f32 3.0, %v213_v28  ;;  %v216_v51 = vld [vmem:[#allocation2 + $0x608] sm:$0xff]  ;;  %v217_v52 = vld [vmem:[#allocation2 + $0x610] sm:$0xff]  ;;  %v2787_v54 = vround.rtne.f32 %v722_v43 }
  0xb4   :  { %v218_v53 = vld [vmem:[#allocation2 + $0x618] sm:$0xff]  ;;  %2254 = vst [vmem:[#allocation5 + $0x5b8] sm:$0xff] %v1742_v42  ;;  %v2788_v55 = vround.rtne.f32 %v723_v44  ;;  %v2789_v56 = vround.rtne.f32 %v724_v45  ;;  %v726_v57 = vmul.f32 3.0, %v214_v41  ;;  %v219_v58 = vld [vmem:[#allocation2 + $0x620] sm:$0xff]  ;;  %v220_v59 = vld [vmem:[#allocation2 + $0x628] sm:$0xff]  ;;  %v727_v6 = vmul.f32 3.0, %v215_v46 }
  0xb5   :  { %v221_v60 = vld [vmem:[#allocation2 + $0x630] sm:$0xff]  ;;  %v1743_v61 = vmul.f32 0.33333334, %v2784_v47  ;;  %v1744_v62 = vmul.f32 0.33333334, %v2785_v48  ;;  %v2790_v0 = vround.rtne.f32 %v725_v50  ;;  %v728_v7 = vmul.f32 3.0, %v216_v51 }
  0xb6   :  { %v1745_v63 = vmul.f32 0.33333334, %v2786_v49  ;;  %v1746_v1 = vmul.f32 0.33333334, %v2787_v54  ;;  %v1747_v2 = vmul.f32 0.33333334, %v2788_v55  ;;  %v2791_v4 = vround.rtne.f32 %v726_v57 }
  0xb7   :  { %v1748_v3 = vmul.f32 0.33333334, %v2789_v56  ;;  %2255 = vst [vmem:[#allocation5 + $0x5c0] sm:$0xff] %v1743_v61  ;;  %2256 = vst [vmem:[#allocation5 + $0x5c8] sm:$0xff] %v1744_v62  ;;  %v1749_v5 = vmul.f32 0.33333334, %v2790_v0  ;;  %v2792_v15 = vround.rtne.f32 %v727_v6  ;;  %v2793_v16 = vround.rtne.f32 %v728_v7 }
  0xb8   :  { %2257 = vst [vmem:[#allocation5 + $0x5d0] sm:$0xff] %v1745_v63  ;;  %v729_v8 = vmul.f32 3.0, %v217_v52  ;;  %v222_v9 = vld [vmem:[#allocation2 + $0x638] sm:$0xff]  ;;  %2258 = vst [vmem:[#allocation5 + $0x5d8] sm:$0xff] %v1746_v1  ;;  %v1750_v10 = vmul.f32 0.33333334, %v2791_v4 }
  0xb9   :  { %2259 = vst [vmem:[#allocation5 + $0x5e0] sm:$0xff] %v1747_v2  ;;  %2260 = vst [vmem:[#allocation5 + $0x5e8] sm:$0xff] %v1748_v3  ;;  %v730_v11 = vmul.f32 3.0, %v218_v53  ;;  %v731_v12 = vmul.f32 3.0, %v219_v58  ;;  %v732_v13 = vmul.f32 3.0, %v220_v59  ;;  %v223_v14 = vld [vmem:[#allocation2 + $0x640] sm:$0xff] }
  0xba   :  { %2261 = vst [vmem:[#allocation5 + $0x5f0] sm:$0xff] %v1749_v5  ;;  %v2794_v17 = vround.rtne.f32 %v729_v8  ;;  %v733_v18 = vmul.f32 3.0, %v221_v60  ;;  %v224_v19 = vld [vmem:[#allocation2 + $0x648] sm:$0xff]  ;;  %v225_v20 = vld [vmem:[#allocation2 + $0x650] sm:$0xff]  ;;  %v226_v21 = vld [vmem:[#allocation2 + $0x658] sm:$0xff]  ;;  %v734_v25 = vmul.f32 3.0, %v222_v9 }
  0xbb   :  { %2262 = vst [vmem:[#allocation5 + $0x5f8] sm:$0xff] %v1750_v10  ;;  %v2795_v22 = vround.rtne.f32 %v730_v11  ;;  %v2796_v23 = vround.rtne.f32 %v731_v12  ;;  %v2797_v24 = vround.rtne.f32 %v732_v13  ;;  %v227_v26 = vld [vmem:[#allocation2 + $0x660] sm:$0xff]  ;;  %v228_v27 = vld [vmem:[#allocation2 + $0x668] sm:$0xff]  ;;  %v229_v28 = vld [vmem:[#allocation2 + $0x670] sm:$0xff]  ;;  %v1751_v29 = vmul.f32 0.33333334, %v2792_v15 }
  0xbc   :  { %v1752_v30 = vmul.f32 0.33333334, %v2793_v16  ;;  %v1753_v31 = vmul.f32 0.33333334, %v2794_v17  ;;  %v2798_v32 = vround.rtne.f32 %v733_v18  ;;  %v2799_v36 = vround.rtne.f32 %v734_v25  ;;  %v230_v41 = vld [vmem:[#allocation2 + $0x678] sm:$0xff]  ;;  %v231_v46 = vld [vmem:[#allocation2 + $0x680] sm:$0xff] }
  0xbd   :  { %v1754_v33 = vmul.f32 0.33333334, %v2795_v22  ;;  %v1755_v34 = vmul.f32 0.33333334, %v2796_v23  ;;  %v1756_v35 = vmul.f32 0.33333334, %v2797_v24 }
  0xbe   :  { %2263 = vst [vmem:[#allocation5 + $0x600] sm:$0xff] %v1751_v29  ;;  %2264 = vst [vmem:[#allocation5 + $0x608] sm:$0xff] %v1752_v30  ;;  %v1757_v37 = vmul.f32 0.33333334, %v2798_v32  ;;  %v735_v38 = vmul.f32 3.0, %v223_v14  ;;  %v736_v39 = vmul.f32 3.0, %v224_v19 }
  0xbf   :  { %2265 = vst [vmem:[#allocation5 + $0x610] sm:$0xff] %v1753_v31  ;;  %v737_v40 = vmul.f32 3.0, %v225_v20  ;;  %2266 = vst [vmem:[#allocation5 + $0x618] sm:$0xff] %v1754_v33  ;;  %v1758_v42 = vmul.f32 0.33333334, %v2799_v36  ;;  %v738_v43 = vmul.f32 3.0, %v226_v21 }
  0xc0   :  { %2267 = vst [vmem:[#allocation5 + $0x620] sm:$0xff] %v1755_v34  ;;  %2268 = vst [vmem:[#allocation5 + $0x628] sm:$0xff] %v1756_v35  ;;  %v739_v44 = vmul.f32 3.0, %v227_v26  ;;  %v740_v45 = vmul.f32 3.0, %v228_v27  ;;  %v2800_v47 = vround.rtne.f32 %v735_v38  ;;  %v2801_v48 = vround.rtne.f32 %v736_v39  ;;  %v232_v51 = vld [vmem:[#allocation2 + $0x688] sm:$0xff]  ;;  %v233_v52 = vld [vmem:[#allocation2 + $0x690] sm:$0xff] }
  0xc1   :  { %2269 = vst [vmem:[#allocation5 + $0x630] sm:$0xff] %v1757_v37  ;;  %v2802_v49 = vround.rtne.f32 %v737_v40  ;;  %v741_v50 = vmul.f32 3.0, %v229_v28  ;;  %v234_v53 = vld [vmem:[#allocation2 + $0x698] sm:$0xff]  ;;  %2270 = vst [vmem:[#allocation5 + $0x638] sm:$0xff] %v1758_v42  ;;  %v2803_v54 = vround.rtne.f32 %v738_v43  ;;  %v742_v57 = vmul.f32 3.0, %v230_v41  ;;  %v235_v58 = vld [vmem:[#allocation2 + $0x6a0] sm:$0xff] }
  0xc2   :  { %v2804_v55 = vround.rtne.f32 %v739_v44  ;;  %v2805_v56 = vround.rtne.f32 %v740_v45  ;;  %v236_v59 = vld [vmem:[#allocation2 + $0x6a8] sm:$0xff]  ;;  %v237_v60 = vld [vmem:[#allocation2 + $0x6b0] sm:$0xff]  ;;  %v1759_v61 = vmul.f32 0.33333334, %v2800_v47  ;;  %v1760_v62 = vmul.f32 0.33333334, %v2801_v48 }
  0xc3   :  { %v1761_v63 = vmul.f32 0.33333334, %v2802_v49  ;;  %v2806_v0 = vround.rtne.f32 %v741_v50  ;;  %v1762_v1 = vmul.f32 0.33333334, %v2803_v54  ;;  %v2807_v4 = vround.rtne.f32 %v742_v57  ;;  %v238_v9 = vld [vmem:[#allocation2 + $0x6b8] sm:$0xff]  ;;  %v239_v14 = vld [vmem:[#allocation2 + $0x6c0] sm:$0xff] }
  0xc4   :  { %v1763_v2 = vmul.f32 0.33333334, %v2804_v55  ;;  %v1764_v3 = vmul.f32 0.33333334, %v2805_v56  ;;  %2271 = vst [vmem:[#allocation5 + $0x640] sm:$0xff] %v1759_v61  ;;  %2272 = vst [vmem:[#allocation5 + $0x648] sm:$0xff] %v1760_v62 }
  0xc5   :  { %2273 = vst [vmem:[#allocation5 + $0x650] sm:$0xff] %v1761_v63  ;;  %v1765_v5 = vmul.f32 0.33333334, %v2806_v0  ;;  %v743_v6 = vmul.f32 3.0, %v231_v46  ;;  %v744_v7 = vmul.f32 3.0, %v232_v51  ;;  %v745_v8 = vmul.f32 3.0, %v233_v52 }
  0xc6   :  { %2274 = vst [vmem:[#allocation5 + $0x658] sm:$0xff] %v1762_v1  ;;  %2275 = vst [vmem:[#allocation5 + $0x660] sm:$0xff] %v1763_v2  ;;  %v1766_v10 = vmul.f32 0.33333334, %v2807_v4  ;;  %v746_v11 = vmul.f32 3.0, %v234_v53  ;;  %v747_v12 = vmul.f32 3.0, %v235_v58 }
  0xc7   :  { %2276 = vst [vmem:[#allocation5 + $0x668] sm:$0xff] %v1764_v3  ;;  %v748_v13 = vmul.f32 3.0, %v236_v59  ;;  %2277 = vst [vmem:[#allocation5 + $0x670] sm:$0xff] %v1765_v5  ;;  %v2808_v15 = vround.rtne.f32 %v743_v6  ;;  %v2809_v16 = vround.rtne.f32 %v744_v7  ;;  %v2810_v17 = vround.rtne.f32 %v745_v8  ;;  %v240_v19 = vld [vmem:[#allocation2 + $0x6c8] sm:$0xff]  ;;  %v241_v20 = vld [vmem:[#allocation2 + $0x6d0] sm:$0xff] }
  0xc8   :  { %v749_v18 = vmul.f32 3.0, %v237_v60  ;;  %v242_v21 = vld [vmem:[#allocation2 + $0x6d8] sm:$0xff]  ;;  %2278 = vst [vmem:[#allocation5 + $0x678] sm:$0xff] %v1766_v10  ;;  %v2811_v22 = vround.rtne.f32 %v746_v11  ;;  %v2812_v23 = vround.rtne.f32 %v747_v12  ;;  %v750_v25 = vmul.f32 3.0, %v238_v9  ;;  %v243_v26 = vld [vmem:[#allocation2 + $0x6e0] sm:$0xff]  ;;  %v244_v27 = vld [vmem:[#allocation2 + $0x6e8] sm:$0xff] }
  0xc9   :  { %v2813_v24 = vround.rtne.f32 %v748_v13  ;;  %v245_v28 = vld [vmem:[#allocation2 + $0x6f0] sm:$0xff]  ;;  %v1767_v29 = vmul.f32 0.33333334, %v2808_v15  ;;  %v1768_v30 = vmul.f32 0.33333334, %v2809_v16  ;;  %v751_v38 = vmul.f32 3.0, %v239_v14 }
  0xca   :  { %v1769_v31 = vmul.f32 0.33333334, %v2810_v17  ;;  %v2814_v32 = vround.rtne.f32 %v749_v18  ;;  %v1770_v33 = vmul.f32 0.33333334, %v2811_v22  ;;  %v1771_v34 = vmul.f32 0.33333334, %v2812_v23 }
  0xcb   :  { %v1772_v35 = vmul.f32 0.33333334, %v2813_v24  ;;  %v2815_v36 = vround.rtne.f32 %v750_v25  ;;  %2279 = vst [vmem:[#allocation5 + $0x680] sm:$0xff] %v1767_v29  ;;  %2280 = vst [vmem:[#allocation5 + $0x688] sm:$0xff] %v1768_v30  ;;  %v752_v39 = vmul.f32 3.0, %v240_v19  ;;  %v753_v40 = vmul.f32 3.0, %v241_v20 }
  0xcc   :  { %2281 = vst [vmem:[#allocation5 + $0x690] sm:$0xff] %v1769_v31  ;;  %v1773_v37 = vmul.f32 0.33333334, %v2814_v32  ;;  %v246_v41 = vld [vmem:[#allocation2 + $0x6f8] sm:$0xff]  ;;  %2282 = vst [vmem:[#allocation5 + $0x698] sm:$0xff] %v1770_v33  ;;  %v754_v43 = vmul.f32 3.0, %v242_v21  ;;  %v2816_v47 = vround.rtne.f32 %v751_v38 }
  0xcd   :  { %2283 = vst [vmem:[#allocation5 + $0x6a0] sm:$0xff] %v1771_v34  ;;  %2284 = vst [vmem:[#allocation5 + $0x6a8] sm:$0xff] %v1772_v35  ;;  %v1774_v42 = vmul.f32 0.33333334, %v2815_v36  ;;  %v755_v44 = vmul.f32 3.0, %v243_v26  ;;  %v756_v45 = vmul.f32 3.0, %v244_v27  ;;  %v2817_v48 = vround.rtne.f32 %v752_v39 }
  0xce   :  { %v247_v46 = vld [vmem:[#allocation2 + $0x700] sm:$0xff]  ;;  %2285 = vst [vmem:[#allocation5 + $0x6b0] sm:$0xff] %v1773_v37  ;;  %v2818_v49 = vround.rtne.f32 %v753_v40  ;;  %v757_v50 = vmul.f32 3.0, %v245_v28  ;;  %v248_v51 = vld [vmem:[#allocation2 + $0x708] sm:$0xff]  ;;  %v249_v52 = vld [vmem:[#allocation2 + $0x710] sm:$0xff]  ;;  %v2819_v54 = vround.rtne.f32 %v754_v43  ;;  %v758_v57 = vmul.f32 3.0, %v246_v41 }
  0xcf   :  { %v250_v53 = vld [vmem:[#allocation2 + $0x718] sm:$0xff]  ;;  %2286 = vst [vmem:[#allocation5 + $0x6b8] sm:$0xff] %v1774_v42  ;;  %v2820_v55 = vround.rtne.f32 %v755_v44  ;;  %v2821_v56 = vround.rtne.f32 %v756_v45  ;;  %v251_v58 = vld [vmem:[#allocation2 + $0x720] sm:$0xff]  ;;  %v252_v59 = vld [vmem:[#allocation2 + $0x728] sm:$0xff]  ;;  %v1775_v61 = vmul.f32 0.33333334, %v2816_v47 }
  0xd0   :  { %v253_v60 = vld [vmem:[#allocation2 + $0x730] sm:$0xff]  ;;  %v1776_v62 = vmul.f32 0.33333334, %v2817_v48  ;;  %v1777_v63 = vmul.f32 0.33333334, %v2818_v49  ;;  %v2822_v0 = vround.rtne.f32 %v757_v50  ;;  %v2823_v4 = vround.rtne.f32 %v758_v57  ;;  %v254_v9 = vld [vmem:[#allocation2 + $0x738] sm:$0xff] }
  0xd1   :  { %v1778_v1 = vmul.f32 0.33333334, %v2819_v54  ;;  %v1779_v2 = vmul.f32 0.33333334, %v2820_v55  ;;  %v1780_v3 = vmul.f32 0.33333334, %v2821_v56 }
  0xd2   :  { %2287 = vst [vmem:[#allocation5 + $0x6c0] sm:$0xff] %v1775_v61  ;;  %2288 = vst [vmem:[#allocation5 + $0x6c8] sm:$0xff] %v1776_v62  ;;  %v1781_v5 = vmul.f32 0.33333334, %v2822_v0  ;;  %v759_v6 = vmul.f32 3.0, %v247_v46  ;;  %v760_v7 = vmul.f32 3.0, %v248_v51 }
  0xd3   :  { %2289 = vst [vmem:[#allocation5 + $0x6d0] sm:$0xff] %v1777_v63  ;;  %v761_v8 = vmul.f32 3.0, %v249_v52  ;;  %2290 = vst [vmem:[#allocation5 + $0x6d8] sm:$0xff] %v1778_v1  ;;  %v1782_v10 = vmul.f32 0.33333334, %v2823_v4  ;;  %v762_v11 = vmul.f32 3.0, %v250_v53 }
  0xd4   :  { %2291 = vst [vmem:[#allocation5 + $0x6e0] sm:$0xff] %v1779_v2  ;;  %2292 = vst [vmem:[#allocation5 + $0x6e8] sm:$0xff] %v1780_v3  ;;  %v763_v12 = vmul.f32 3.0, %v251_v58  ;;  %v764_v13 = vmul.f32 3.0, %v252_v59  ;;  %v255_v14 = vld [vmem:[#allocation2 + $0x740] sm:$0xff]  ;;  %v2824_v15 = vround.rtne.f32 %v759_v6  ;;  %v2825_v16 = vround.rtne.f32 %v760_v7  ;;  %v256_v19 = vld [vmem:[#allocation2 + $0x748] sm:$0xff] }
  0xd5   :  { %2293 = vst [vmem:[#allocation5 + $0x6f0] sm:$0xff] %v1781_v5  ;;  %v2826_v17 = vround.rtne.f32 %v761_v8  ;;  %v765_v18 = vmul.f32 3.0, %v253_v60  ;;  %v257_v20 = vld [vmem:[#allocation2 + $0x750] sm:$0xff]  ;;  %v258_v21 = vld [vmem:[#allocation2 + $0x758] sm:$0xff]  ;;  %2294 = vst [vmem:[#allocation5 + $0x6f8] sm:$0xff] %v1782_v10  ;;  %v2827_v22 = vround.rtne.f32 %v762_v11  ;;  %v766_v25 = vmul.f32 3.0, %v254_v9 }
  0xd6   :  { %v2828_v23 = vround.rtne.f32 %v763_v12  ;;  %v2829_v24 = vround.rtne.f32 %v764_v13  ;;  %v259_v26 = vld [vmem:[#allocation2 + $0x760] sm:$0xff]  ;;  %v260_v27 = vld [vmem:[#allocation2 + $0x768] sm:$0xff]  ;;  %v261_v28 = vld [vmem:[#allocation2 + $0x770] sm:$0xff]  ;;  %v1783_v29 = vmul.f32 0.33333334, %v2824_v15  ;;  %v767_v38 = vmul.f32 3.0, %v255_v14 }
  0xd7   :  { %v1784_v30 = vmul.f32 0.33333334, %v2825_v16  ;;  %v1785_v31 = vmul.f32 0.33333334, %v2826_v17  ;;  %v2830_v32 = vround.rtne.f32 %v765_v18  ;;  %v1786_v33 = vmul.f32 0.33333334, %v2827_v22 }
  0xd8   :  { %v1787_v34 = vmul.f32 0.33333334, %v2828_v23  ;;  %v1788_v35 = vmul.f32 0.33333334, %v2829_v24  ;;  %v2831_v36 = vround.rtne.f32 %v766_v25  ;;  %2295 = vst [vmem:[#allocation5 + $0x700] sm:$0xff] %v1783_v29  ;;  %v768_v39 = vmul.f32 3.0, %v256_v19 }
  0xd9   :  { %2296 = vst [vmem:[#allocation5 + $0x708] sm:$0xff] %v1784_v30  ;;  %2297 = vst [vmem:[#allocation5 + $0x710] sm:$0xff] %v1785_v31  ;;  %v1789_v37 = vmul.f32 0.33333334, %v2830_v32  ;;  %v769_v40 = vmul.f32 3.0, %v257_v20  ;;  %v262_v41 = vld [vmem:[#allocation2 + $0x778] sm:$0xff]  ;;  %v2832_v47 = vround.rtne.f32 %v767_v38 }
  0xda   :  { %2298 = vst [vmem:[#allocation5 + $0x718] sm:$0xff] %v1786_v33  ;;  %2299 = vst [vmem:[#allocation5 + $0x720] sm:$0xff] %v1787_v34  ;;  %v1790_v42 = vmul.f32 0.33333334, %v2831_v36  ;;  %v770_v43 = vmul.f32 3.0, %v258_v21  ;;  %v771_v44 = vmul.f32 3.0, %v259_v26  ;;  %v2833_v48 = vround.rtne.f32 %v768_v39 }
  0xdb   :  { %2300 = vst [vmem:[#allocation5 + $0x728] sm:$0xff] %v1788_v35  ;;  %v772_v45 = vmul.f32 3.0, %v260_v27  ;;  %v263_v46 = vld [vmem:[#allocation2 + $0x780] sm:$0xff]  ;;  %2301 = vst [vmem:[#allocation5 + $0x730] sm:$0xff] %v1789_v37  ;;  %v2834_v49 = vround.rtne.f32 %v769_v40  ;;  %v773_v50 = vmul.f32 3.0, %v261_v28  ;;  %v264_v51 = vld [vmem:[#allocation2 + $0x788] sm:$0xff] }
  0xdc   :  { %v265_v52 = vld [vmem:[#allocation2 + $0x790] sm:$0xff]  ;;  %v266_v53 = vld [vmem:[#allocation2 + $0x798] sm:$0xff]  ;;  %2302 = vst [vmem:[#allocation5 + $0x738] sm:$0xff] %v1790_v42  ;;  %v2835_v54 = vround.rtne.f32 %v770_v43  ;;  %v2836_v55 = vround.rtne.f32 %v771_v44  ;;  %v774_v57 = vmul.f32 3.0, %v262_v41  ;;  %v267_v58 = vld [vmem:[#allocation2 + $0x7a0] sm:$0xff]  ;;  %v775_v6 = vmul.f32 3.0, %v263_v46 }
  0xdd   :  { %v2837_v56 = vround.rtne.f32 %v772_v45  ;;  %v268_v59 = vld [vmem:[#allocation2 + $0x7a8] sm:$0xff]  ;;  %v269_v60 = vld [vmem:[#allocation2 + $0x7b0] sm:$0xff]  ;;  %v1791_v61 = vmul.f32 0.33333334, %v2832_v47  ;;  %v1792_v62 = vmul.f32 0.33333334, %v2833_v48  ;;  %v2838_v0 = vround.rtne.f32 %v773_v50 }
  0xde   :  { %v1793_v63 = vmul.f32 0.33333334, %v2834_v49  ;;  %v1794_v1 = vmul.f32 0.33333334, %v2835_v54  ;;  %v1795_v2 = vmul.f32 0.33333334, %v2836_v55  ;;  %v2839_v4 = vround.rtne.f32 %v774_v57 }
  0xdf   :  { %v1796_v3 = vmul.f32 0.33333334, %v2837_v56  ;;  %2303 = vst [vmem:[#allocation5 + $0x740] sm:$0xff] %v1791_v61  ;;  %2304 = vst [vmem:[#allocation5 + $0x748] sm:$0xff] %v1792_v62  ;;  %v1797_v5 = vmul.f32 0.33333334, %v2838_v0  ;;  %v2840_v15 = vround.rtne.f32 %v775_v6 }
  0xe0   :  { %2305 = vst [vmem:[#allocation5 + $0x750] sm:$0xff] %v1793_v63  ;;  %v776_v7 = vmul.f32 3.0, %v264_v51  ;;  %v777_v8 = vmul.f32 3.0, %v265_v52  ;;  %v270_v9 = vld [vmem:[#allocation2 + $0x7b8] sm:$0xff]  ;;  %2306 = vst [vmem:[#allocation5 + $0x758] sm:$0xff] %v1794_v1  ;;  %v778_v11 = vmul.f32 3.0, %v266_v53 }
  0xe1   :  { %2307 = vst [vmem:[#allocation5 + $0x760] sm:$0xff] %v1795_v2  ;;  %2308 = vst [vmem:[#allocation5 + $0x768] sm:$0xff] %v1796_v3  ;;  %v1798_v10 = vmul.f32 0.33333334, %v2839_v4  ;;  %v779_v12 = vmul.f32 3.0, %v267_v58  ;;  %v780_v13 = vmul.f32 3.0, %v268_v59 }
  0xe2   :  { %v271_v14 = vld [vmem:[#allocation2 + $0x7c0] sm:$0xff]  ;;  %2309 = vst [vmem:[#allocation5 + $0x770] sm:$0xff] %v1797_v5  ;;  %v2841_v16 = vround.rtne.f32 %v776_v7  ;;  %v2842_v17 = vround.rtne.f32 %v777_v8  ;;  %v781_v18 = vmul.f32 3.0, %v269_v60  ;;  %v272_v19 = vld [vmem:[#allocation2 + $0x7c8] sm:$0xff]  ;;  %v273_v20 = vld [vmem:[#allocation2 + $0x7d0] sm:$0xff]  ;;  %v2843_v22 = vround.rtne.f32 %v778_v11 }
  0xe3   :  { %v274_v21 = vld [vmem:[#allocation2 + $0x7d8] sm:$0xff]  ;;  %2310 = vst [vmem:[#allocation5 + $0x778] sm:$0xff] %v1798_v10  ;;  %v2844_v23 = vround.rtne.f32 %v779_v12  ;;  %v2845_v24 = vround.rtne.f32 %v780_v13  ;;  %v782_v25 = vmul.f32 3.0, %v270_v9  ;;  %v275_v26 = vld [vmem:[#allocation2 + $0x7e0] sm:$0xff]  ;;  %v276_v27 = vld [vmem:[#allocation2 + $0x7e8] sm:$0xff]  ;;  %v783_v38 = vmul.f32 3.0, %v271_v14 }
  0xe4   :  { %v277_v28 = vld [vmem:[#allocation2 + $0x7f0] sm:$0xff]  ;;  %v1799_v29 = vmul.f32 0.33333334, %v2840_v15  ;;  %v1800_v30 = vmul.f32 0.33333334, %v2841_v16  ;;  %v2846_v32 = vround.rtne.f32 %v781_v18  ;;  %v784_v39 = vmul.f32 3.0, %v272_v19 }
  0xe5   :  { %v1801_v31 = vmul.f32 0.33333334, %v2842_v17  ;;  %v1802_v33 = vmul.f32 0.33333334, %v2843_v22  ;;  %v1803_v34 = vmul.f32 0.33333334, %v2844_v23  ;;  %v2847_v36 = vround.rtne.f32 %v782_v25 }
  0xe6   :  { %v1804_v35 = vmul.f32 0.33333334, %v2845_v24  ;;  %2311 = vst [vmem:[#allocation5 + $0x780] sm:$0xff] %v1799_v29  ;;  %2312 = vst [vmem:[#allocation5 + $0x788] sm:$0xff] %v1800_v30  ;;  %v1805_v37 = vmul.f32 0.33333334, %v2846_v32  ;;  %v2848_v47 = vround.rtne.f32 %v783_v38  ;;  %v2849_v48 = vround.rtne.f32 %v784_v39 }
  0xe7   :  { %2313 = vst [vmem:[#allocation5 + $0x790] sm:$0xff] %v1801_v31  ;;  %v785_v40 = vmul.f32 3.0, %v273_v20  ;;  %v278_v41 = vld [vmem:[#allocation2 + $0x7f8] sm:$0xff]  ;;  %2314 = vst [vmem:[#allocation5 + $0x798] sm:$0xff] %v1802_v33  ;;  %v1806_v42 = vmul.f32 0.33333334, %v2847_v36 }
  0xe8   :  { %2315 = vst [vmem:[#allocation5 + $0x7a0] sm:$0xff] %v1803_v34  ;;  %2316 = vst [vmem:[#allocation5 + $0x7a8] sm:$0xff] %v1804_v35  ;;  %v786_v43 = vmul.f32 3.0, %v274_v21  ;;  %v787_v44 = vmul.f32 3.0, %v275_v26  ;;  %v788_v45 = vmul.f32 3.0, %v276_v27  ;;  %v279_v46 = vld [vmem:[#allocation2 + $0x800] sm:$0xff] }
  0xe9   :  { %2317 = vst [vmem:[#allocation5 + $0x7b0] sm:$0xff] %v1805_v37  ;;  %v2850_v49 = vround.rtne.f32 %v785_v40  ;;  %v789_v50 = vmul.f32 3.0, %v277_v28  ;;  %v280_v51 = vld [vmem:[#allocation2 + $0x808] sm:$0xff]  ;;  %v281_v52 = vld [vmem:[#allocation2 + $0x810] sm:$0xff]  ;;  %v282_v53 = vld [vmem:[#allocation2 + $0x818] sm:$0xff]  ;;  %v790_v57 = vmul.f32 3.0, %v278_v41 }
  0xea   :  { %2318 = vst [vmem:[#allocation5 + $0x7b8] sm:$0xff] %v1806_v42  ;;  %v2851_v54 = vround.rtne.f32 %v786_v43  ;;  %v2852_v55 = vround.rtne.f32 %v787_v44  ;;  %v2853_v56 = vround.rtne.f32 %v788_v45  ;;  %v283_v58 = vld [vmem:[#allocation2 + $0x820] sm:$0xff]  ;;  %v284_v59 = vld [vmem:[#allocation2 + $0x828] sm:$0xff]  ;;  %v285_v60 = vld [vmem:[#allocation2 + $0x830] sm:$0xff]  ;;  %v1807_v61 = vmul.f32 0.33333334, %v2848_v47 }
  0xeb   :  { %v1808_v62 = vmul.f32 0.33333334, %v2849_v48  ;;  %v1809_v63 = vmul.f32 0.33333334, %v2850_v49  ;;  %v2854_v0 = vround.rtne.f32 %v789_v50  ;;  %v2855_v4 = vround.rtne.f32 %v790_v57  ;;  %v286_v9 = vld [vmem:[#allocation2 + $0x838] sm:$0xff]  ;;  %v287_v14 = vld [vmem:[#allocation2 + $0x840] sm:$0xff] }
  0xec   :  { %v1810_v1 = vmul.f32 0.33333334, %v2851_v54  ;;  %v1811_v2 = vmul.f32 0.33333334, %v2852_v55  ;;  %v1812_v3 = vmul.f32 0.33333334, %v2853_v56 }
  0xed   :  { %2319 = vst [vmem:[#allocation5 + $0x7c0] sm:$0xff] %v1807_v61  ;;  %2320 = vst [vmem:[#allocation5 + $0x7c8] sm:$0xff] %v1808_v62  ;;  %v1813_v5 = vmul.f32 0.33333334, %v2854_v0  ;;  %v791_v6 = vmul.f32 3.0, %v279_v46  ;;  %v792_v7 = vmul.f32 3.0, %v280_v51 }
  0xee   :  { %2321 = vst [vmem:[#allocation5 + $0x7d0] sm:$0xff] %v1809_v63  ;;  %v793_v8 = vmul.f32 3.0, %v281_v52  ;;  %2322 = vst [vmem:[#allocation5 + $0x7d8] sm:$0xff] %v1810_v1  ;;  %v1814_v10 = vmul.f32 0.33333334, %v2855_v4  ;;  %v794_v11 = vmul.f32 3.0, %v282_v53 }
  0xef   :  { %2323 = vst [vmem:[#allocation5 + $0x7e0] sm:$0xff] %v1811_v2  ;;  %2324 = vst [vmem:[#allocation5 + $0x7e8] sm:$0xff] %v1812_v3  ;;  %v795_v12 = vmul.f32 3.0, %v283_v58  ;;  %v796_v13 = vmul.f32 3.0, %v284_v59  ;;  %v2856_v15 = vround.rtne.f32 %v791_v6  ;;  %v2857_v16 = vround.rtne.f32 %v792_v7  ;;  %v288_v19 = vld [vmem:[#allocation2 + $0x848] sm:$0xff]  ;;  %v289_v20 = vld [vmem:[#allocation2 + $0x850] sm:$0xff] }
  0xf0   :  { %2325 = vst [vmem:[#allocation5 + $0x7f0] sm:$0xff] %v1813_v5  ;;  %v2858_v17 = vround.rtne.f32 %v793_v8  ;;  %v797_v18 = vmul.f32 3.0, %v285_v60  ;;  %v290_v21 = vld [vmem:[#allocation2 + $0x858] sm:$0xff]  ;;  %2326 = vst [vmem:[#allocation5 + $0x7f8] sm:$0xff] %v1814_v10  ;;  %v2859_v22 = vround.rtne.f32 %v794_v11  ;;  %v798_v25 = vmul.f32 3.0, %v286_v9  ;;  %v291_v26 = vld [vmem:[#allocation2 + $0x860] sm:$0xff] }
  0xf1   :  { %v2860_v23 = vround.rtne.f32 %v795_v12  ;;  %v2861_v24 = vround.rtne.f32 %v796_v13  ;;  %v292_v27 = vld [vmem:[#allocation2 + $0x868] sm:$0xff]  ;;  %v293_v28 = vld [vmem:[#allocation2 + $0x870] sm:$0xff]  ;;  %v1815_v29 = vmul.f32 0.33333334, %v2856_v15  ;;  %v1816_v30 = vmul.f32 0.33333334, %v2857_v16 }
  0xf2   :  { %v1817_v31 = vmul.f32 0.33333334, %v2858_v17  ;;  %v2862_v32 = vround.rtne.f32 %v797_v18  ;;  %v1818_v33 = vmul.f32 0.33333334, %v2859_v22  ;;  %v2863_v36 = vround.rtne.f32 %v798_v25  ;;  %v294_v41 = vld [vmem:[#allocation2 + $0x878] sm:$0xff]  ;;  %v295_v46 = vld [vmem:[#allocation2 + $0x880] sm:$0xff] }
  0xf3   :  { %v1819_v34 = vmul.f32 0.33333334, %v2860_v23  ;;  %v1820_v35 = vmul.f32 0.33333334, %v2861_v24  ;;  %2327 = vst [vmem:[#allocation5 + $0x800] sm:$0xff] %v1815_v29  ;;  %2328 = vst [vmem:[#allocation5 + $0x808] sm:$0xff] %v1816_v30 }
  0xf4   :  { %2329 = vst [vmem:[#allocation5 + $0x810] sm:$0xff] %v1817_v31  ;;  %v1821_v37 = vmul.f32 0.33333334, %v2862_v32  ;;  %v799_v38 = vmul.f32 3.0, %v287_v14  ;;  %v800_v39 = vmul.f32 3.0, %v288_v19  ;;  %v801_v40 = vmul.f32 3.0, %v289_v20 }
  0xf5   :  { %2330 = vst [vmem:[#allocation5 + $0x818] sm:$0xff] %v1818_v33  ;;  %2331 = vst [vmem:[#allocation5 + $0x820] sm:$0xff] %v1819_v34  ;;  %v1822_v42 = vmul.f32 0.33333334, %v2863_v36  ;;  %v802_v43 = vmul.f32 3.0, %v290_v21  ;;  %v803_v44 = vmul.f32 3.0, %v291_v26 }
  0xf6   :  { %2332 = vst [vmem:[#allocation5 + $0x828] sm:$0xff] %v1820_v35  ;;  %v804_v45 = vmul.f32 3.0, %v292_v27  ;;  %2333 = vst [vmem:[#allocation5 + $0x830] sm:$0xff] %v1821_v37  ;;  %v2864_v47 = vround.rtne.f32 %v799_v38  ;;  %v2865_v48 = vround.rtne.f32 %v800_v39  ;;  %v2866_v49 = vround.rtne.f32 %v801_v40  ;;  %v296_v51 = vld [vmem:[#allocation2 + $0x888] sm:$0xff]  ;;  %v297_v52 = vld [vmem:[#allocation2 + $0x890] sm:$0xff] }
  0xf7   :  { %v805_v50 = vmul.f32 3.0, %v293_v28  ;;  %v298_v53 = vld [vmem:[#allocation2 + $0x898] sm:$0xff]  ;;  %2334 = vst [vmem:[#allocation5 + $0x838] sm:$0xff] %v1822_v42  ;;  %v2867_v54 = vround.rtne.f32 %v802_v43  ;;  %v2868_v55 = vround.rtne.f32 %v803_v44  ;;  %v806_v57 = vmul.f32 3.0, %v294_v41  ;;  %v299_v58 = vld [vmem:[#allocation2 + $0x8a0] sm:$0xff]  ;;  %v300_v59 = vld [vmem:[#allocation2 + $0x8a8] sm:$0xff] }
  0xf8   :  { %v2869_v56 = vround.rtne.f32 %v804_v45  ;;  %v301_v60 = vld [vmem:[#allocation2 + $0x8b0] sm:$0xff]  ;;  %v1823_v61 = vmul.f32 0.33333334, %v2864_v47  ;;  %v1824_v62 = vmul.f32 0.33333334, %v2865_v48  ;;  %v807_v6 = vmul.f32 3.0, %v295_v46 }
  0xf9   :  { %v1825_v63 = vmul.f32 0.33333334, %v2866_v49  ;;  %v2870_v0 = vround.rtne.f32 %v805_v50  ;;  %v1826_v1 = vmul.f32 0.33333334, %v2867_v54  ;;  %v1827_v2 = vmul.f32 0.33333334, %v2868_v55 }
  0xfa   :  { %v1828_v3 = vmul.f32 0.33333334, %v2869_v56  ;;  %v2871_v4 = vround.rtne.f32 %v806_v57  ;;  %2335 = vst [vmem:[#allocation5 + $0x840] sm:$0xff] %v1823_v61  ;;  %2336 = vst [vmem:[#allocation5 + $0x848] sm:$0xff] %v1824_v62  ;;  %v808_v7 = vmul.f32 3.0, %v296_v51  ;;  %v809_v8 = vmul.f32 3.0, %v297_v52 }
  0xfb   :  { %2337 = vst [vmem:[#allocation5 + $0x850] sm:$0xff] %v1825_v63  ;;  %v1829_v5 = vmul.f32 0.33333334, %v2870_v0  ;;  %v302_v9 = vld [vmem:[#allocation2 + $0x8b8] sm:$0xff]  ;;  %2338 = vst [vmem:[#allocation5 + $0x858] sm:$0xff] %v1826_v1  ;;  %v810_v11 = vmul.f32 3.0, %v298_v53  ;;  %v2872_v15 = vround.rtne.f32 %v807_v6 }
  0xfc   :  { %2339 = vst [vmem:[#allocation5 + $0x860] sm:$0xff] %v1827_v2  ;;  %2340 = vst [vmem:[#allocation5 + $0x868] sm:$0xff] %v1828_v3  ;;  %v1830_v10 = vmul.f32 0.33333334, %v2871_v4  ;;  %v811_v12 = vmul.f32 3.0, %v299_v58  ;;  %v812_v13 = vmul.f32 3.0, %v300_v59  ;;  %v2873_v16 = vround.rtne.f32 %v808_v7 }
  0xfd   :  { %v303_v14 = vld [vmem:[#allocation2 + $0x8c0] sm:$0xff]  ;;  %2341 = vst [vmem:[#allocation5 + $0x870] sm:$0xff] %v1829_v5  ;;  %v2874_v17 = vround.rtne.f32 %v809_v8  ;;  %v813_v18 = vmul.f32 3.0, %v301_v60  ;;  %v304_v19 = vld [vmem:[#allocation2 + $0x8c8] sm:$0xff]  ;;  %v305_v20 = vld [vmem:[#allocation2 + $0x8d0] sm:$0xff]  ;;  %v2875_v22 = vround.rtne.f32 %v810_v11  ;;  %v814_v25 = vmul.f32 3.0, %v302_v9 }
  0xfe   :  { %v306_v21 = vld [vmem:[#allocation2 + $0x8d8] sm:$0xff]  ;;  %2342 = vst [vmem:[#allocation5 + $0x878] sm:$0xff] %v1830_v10  ;;  %v2876_v23 = vround.rtne.f32 %v811_v12  ;;  %v2877_v24 = vround.rtne.f32 %v812_v13  ;;  %v307_v26 = vld [vmem:[#allocation2 + $0x8e0] sm:$0xff]  ;;  %v308_v27 = vld [vmem:[#allocation2 + $0x8e8] sm:$0xff]  ;;  %v1831_v29 = vmul.f32 0.33333334, %v2872_v15 }
  0xff   :  { %v309_v28 = vld [vmem:[#allocation2 + $0x8f0] sm:$0xff]  ;;  %v1832_v30 = vmul.f32 0.33333334, %v2873_v16  ;;  %v1833_v31 = vmul.f32 0.33333334, %v2874_v17  ;;  %v2878_v32 = vround.rtne.f32 %v813_v18  ;;  %v2879_v36 = vround.rtne.f32 %v814_v25  ;;  %v310_v41 = vld [vmem:[#allocation2 + $0x8f8] sm:$0xff] }
 0x100   :  { %v1834_v33 = vmul.f32 0.33333334, %v2875_v22  ;;  %v1835_v34 = vmul.f32 0.33333334, %v2876_v23  ;;  %v1836_v35 = vmul.f32 0.33333334, %v2877_v24 }
 0x101   :  { %2343 = vst [vmem:[#allocation5 + $0x880] sm:$0xff] %v1831_v29  ;;  %2344 = vst [vmem:[#allocation5 + $0x888] sm:$0xff] %v1832_v30  ;;  %v1837_v37 = vmul.f32 0.33333334, %v2878_v32  ;;  %v815_v38 = vmul.f32 3.0, %v303_v14  ;;  %v816_v39 = vmul.f32 3.0, %v304_v19 }
 0x102   :  { %2345 = vst [vmem:[#allocation5 + $0x890] sm:$0xff] %v1833_v31  ;;  %v817_v40 = vmul.f32 3.0, %v305_v20  ;;  %2346 = vst [vmem:[#allocation5 + $0x898] sm:$0xff] %v1834_v33  ;;  %v1838_v42 = vmul.f32 0.33333334, %v2879_v36  ;;  %v818_v43 = vmul.f32 3.0, %v306_v21 }
 0x103   :  { %2347 = vst [vmem:[#allocation5 + $0x8a0] sm:$0xff] %v1835_v34  ;;  %2348 = vst [vmem:[#allocation5 + $0x8a8] sm:$0xff] %v1836_v35  ;;  %v819_v44 = vmul.f32 3.0, %v307_v26  ;;  %v820_v45 = vmul.f32 3.0, %v308_v27  ;;  %v311_v46 = vld [vmem:[#allocation2 + $0x900] sm:$0xff]  ;;  %v2880_v47 = vround.rtne.f32 %v815_v38  ;;  %v2881_v48 = vround.rtne.f32 %v816_v39  ;;  %v312_v51 = vld [vmem:[#allocation2 + $0x908] sm:$0xff] }
 0x104   :  { %2349 = vst [vmem:[#allocation5 + $0x8b0] sm:$0xff] %v1837_v37  ;;  %v2882_v49 = vround.rtne.f32 %v817_v40  ;;  %v821_v50 = vmul.f32 3.0, %v309_v28  ;;  %v313_v52 = vld [vmem:[#allocation2 + $0x910] sm:$0xff]  ;;  %v314_v53 = vld [vmem:[#allocation2 + $0x918] sm:$0xff]  ;;  %2350 = vst [vmem:[#allocation5 + $0x8b8] sm:$0xff] %v1838_v42  ;;  %v2883_v54 = vround.rtne.f32 %v818_v43  ;;  %v822_v57 = vmul.f32 3.0, %v310_v41 }
 0x105   :  { %v2884_v55 = vround.rtne.f32 %v819_v44  ;;  %v2885_v56 = vround.rtne.f32 %v820_v45  ;;  %v315_v58 = vld [vmem:[#allocation2 + $0x920] sm:$0xff]  ;;  %v316_v59 = vld [vmem:[#allocation2 + $0x928] sm:$0xff]  ;;  %v317_v60 = vld [vmem:[#allocation2 + $0x930] sm:$0xff]  ;;  %v1839_v61 = vmul.f32 0.33333334, %v2880_v47  ;;  %v823_v6 = vmul.f32 3.0, %v311_v46 }
 0x106   :  { %v1840_v62 = vmul.f32 0.33333334, %v2881_v48  ;;  %v1841_v63 = vmul.f32 0.33333334, %v2882_v49  ;;  %v2886_v0 = vround.rtne.f32 %v821_v50  ;;  %v1842_v1 = vmul.f32 0.33333334, %v2883_v54 }
 0x107   :  { %v1843_v2 = vmul.f32 0.33333334, %v2884_v55  ;;  %v1844_v3 = vmul.f32 0.33333334, %v2885_v56  ;;  %v2887_v4 = vround.rtne.f32 %v822_v57  ;;  %2351 = vst [vmem:[#allocation5 + $0x8c0] sm:$0xff] %v1839_v61  ;;  %v824_v7 = vmul.f32 3.0, %v312_v51 }
 0x108   :  { %2352 = vst [vmem:[#allocation5 + $0x8c8] sm:$0xff] %v1840_v62  ;;  %2353 = vst [vmem:[#allocation5 + $0x8d0] sm:$0xff] %v1841_v63  ;;  %v1845_v5 = vmul.f32 0.33333334, %v2886_v0  ;;  %v825_v8 = vmul.f32 3.0, %v313_v52  ;;  %v318_v9 = vld [vmem:[#allocation2 + $0x938] sm:$0xff]  ;;  %v2888_v15 = vround.rtne.f32 %v823_v6 }
 0x109   :  { %2354 = vst [vmem:[#allocation5 + $0x8d8] sm:$0xff] %v1842_v1  ;;  %2355 = vst [vmem:[#allocation5 + $0x8e0] sm:$0xff] %v1843_v2  ;;  %v1846_v10 = vmul.f32 0.33333334, %v2887_v4  ;;  %v826_v11 = vmul.f32 3.0, %v314_v53  ;;  %v827_v12 = vmul.f32 3.0, %v315_v58  ;;  %v2889_v16 = vround.rtne.f32 %v824_v7 }
 0x10a   :  { %2356 = vst [vmem:[#allocation5 + $0x8e8] sm:$0xff] %v1844_v3  ;;  %v828_v13 = vmul.f32 3.0, %v316_v59  ;;  %v319_v14 = vld [vmem:[#allocation2 + $0x940] sm:$0xff]  ;;  %2357 = vst [vmem:[#allocation5 + $0x8f0] sm:$0xff] %v1845_v5  ;;  %v2890_v17 = vround.rtne.f32 %v825_v8  ;;  %v829_v18 = vmul.f32 3.0, %v317_v60  ;;  %v320_v19 = vld [vmem:[#allocation2 + $0x948] sm:$0xff] }
 0x10b   :  { %v321_v20 = vld [vmem:[#allocation2 + $0x950] sm:$0xff]  ;;  %v322_v21 = vld [vmem:[#allocation2 + $0x958] sm:$0xff]  ;;  %2358 = vst [vmem:[#allocation5 + $0x8f8] sm:$0xff] %v1846_v10  ;;  %v2891_v22 = vround.rtne.f32 %v826_v11  ;;  %v2892_v23 = vround.rtne.f32 %v827_v12  ;;  %v830_v25 = vmul.f32 3.0, %v318_v9  ;;  %v323_v26 = vld [vmem:[#allocation2 + $0x960] sm:$0xff]  ;;  %v831_v38 = vmul.f32 3.0, %v319_v14 }
 0x10c   :  { %v2893_v24 = vround.rtne.f32 %v828_v13  ;;  %v324_v27 = vld [vmem:[#allocation2 + $0x968] sm:$0xff]  ;;  %v325_v28 = vld [vmem:[#allocation2 + $0x970] sm:$0xff]  ;;  %v1847_v29 = vmul.f32 0.33333334, %v2888_v15  ;;  %v1848_v30 = vmul.f32 0.33333334, %v2889_v16  ;;  %v2894_v32 = vround.rtne.f32 %v829_v18 }
 0x10d   :  { %v1849_v31 = vmul.f32 0.33333334, %v2890_v17  ;;  %v1850_v33 = vmul.f32 0.33333334, %v2891_v22  ;;  %v1851_v34 = vmul.f32 0.33333334, %v2892_v23  ;;  %v2895_v36 = vround.rtne.f32 %v830_v25 }
 0x10e   :  { %v1852_v35 = vmul.f32 0.33333334, %v2893_v24  ;;  %2359 = vst [vmem:[#allocation5 + $0x900] sm:$0xff] %v1847_v29  ;;  %2360 = vst [vmem:[#allocation5 + $0x908] sm:$0xff] %v1848_v30  ;;  %v1853_v37 = vmul.f32 0.33333334, %v2894_v32  ;;  %v2896_v47 = vround.rtne.f32 %v831_v38 }
 0x10f   :  { %2361 = vst [vmem:[#allocation5 + $0x910] sm:$0xff] %v1849_v31  ;;  %v832_v39 = vmul.f32 3.0, %v320_v19  ;;  %v833_v40 = vmul.f32 3.0, %v321_v20  ;;  %v326_v41 = vld [vmem:[#allocation2 + $0x978] sm:$0xff]  ;;  %2362 = vst [vmem:[#allocation5 + $0x918] sm:$0xff] %v1850_v33  ;;  %v834_v43 = vmul.f32 3.0, %v322_v21 }
 0x110   :  { %2363 = vst [vmem:[#allocation5 + $0x920] sm:$0xff] %v1851_v34  ;;  %2364 = vst [vmem:[#allocation5 + $0x928] sm:$0xff] %v1852_v35  ;;  %v1854_v42 = vmul.f32 0.33333334, %v2895_v36  ;;  %v835_v44 = vmul.f32 3.0, %v323_v26  ;;  %v836_v45 = vmul.f32 3.0, %v324_v27 }
 0x111   :  { %v327_v46 = vld [vmem:[#allocation2 + $0x980] sm:$0xff]  ;;  %2365 = vst [vmem:[#allocation5 + $0x930] sm:$0xff] %v1853_v37  ;;  %v2897_v48 = vround.rtne.f32 %v832_v39  ;;  %v2898_v49 = vround.rtne.f32 %v833_v40  ;;  %v837_v50 = vmul.f32 3.0, %v325_v28  ;;  %v328_v51 = vld [vmem:[#allocation2 + $0x988] sm:$0xff]  ;;  %v329_v52 = vld [vmem:[#allocation2 + $0x990] sm:$0xff]  ;;  %v2899_v54 = vround.rtne.f32 %v834_v43 }
 0x112   :  { %v330_v53 = vld [vmem:[#allocation2 + $0x998] sm:$0xff]  ;;  %2366 = vst [vmem:[#allocation5 + $0x938] sm:$0xff] %v1854_v42  ;;  %v2900_v55 = vround.rtne.f32 %v835_v44  ;;  %v2901_v56 = vround.rtne.f32 %v836_v45  ;;  %v838_v57 = vmul.f32 3.0, %v326_v41  ;;  %v331_v58 = vld [vmem:[#allocation2 + $0x9a0] sm:$0xff]  ;;  %v332_v59 = vld [vmem:[#allocation2 + $0x9a8] sm:$0xff]  ;;  %v839_v6 = vmul.f32 3.0, %v327_v46 }
 0x113   :  { %v333_v60 = vld [vmem:[#allocation2 + $0x9b0] sm:$0xff]  ;;  %v1855_v61 = vmul.f32 0.33333334, %v2896_v47  ;;  %v1856_v62 = vmul.f32 0.33333334, %v2897_v48  ;;  %v2902_v0 = vround.rtne.f32 %v837_v50  ;;  %v840_v7 = vmul.f32 3.0, %v328_v51 }
 0x114   :  { %v1857_v63 = vmul.f32 0.33333334, %v2898_v49  ;;  %v1858_v1 = vmul.f32 0.33333334, %v2899_v54  ;;  %v1859_v2 = vmul.f32 0.33333334, %v2900_v55  ;;  %v2903_v4 = vround.rtne.f32 %v838_v57 }
 0x115   :  { %v1860_v3 = vmul.f32 0.33333334, %v2901_v56  ;;  %2367 = vst [vmem:[#allocation5 + $0x940] sm:$0xff] %v1855_v61  ;;  %2368 = vst [vmem:[#allocation5 + $0x948] sm:$0xff] %v1856_v62  ;;  %v1861_v5 = vmul.f32 0.33333334, %v2902_v0  ;;  %v2904_v15 = vround.rtne.f32 %v839_v6  ;;  %v2905_v16 = vround.rtne.f32 %v840_v7 }
 0x116   :  { %2369 = vst [vmem:[#allocation5 + $0x950] sm:$0xff] %v1857_v63  ;;  %v841_v8 = vmul.f32 3.0, %v329_v52  ;;  %v334_v9 = vld [vmem:[#allocation2 + $0x9b8] sm:$0xff]  ;;  %2370 = vst [vmem:[#allocation5 + $0x958] sm:$0xff] %v1858_v1  ;;  %v1862_v10 = vmul.f32 0.33333334, %v2903_v4 }
 0x117   :  { %2371 = vst [vmem:[#allocation5 + $0x960] sm:$0xff] %v1859_v2  ;;  %2372 = vst [vmem:[#allocation5 + $0x968] sm:$0xff] %v1860_v3  ;;  %v842_v11 = vmul.f32 3.0, %v330_v53  ;;  %v843_v12 = vmul.f32 3.0, %v331_v58  ;;  %v844_v13 = vmul.f32 3.0, %v332_v59  ;;  %v335_v14 = vld [vmem:[#allocation2 + $0x9c0] sm:$0xff] }
 0x118   :  { %2373 = vst [vmem:[#allocation5 + $0x970] sm:$0xff] %v1861_v5  ;;  %v2906_v17 = vround.rtne.f32 %v841_v8  ;;  %v845_v18 = vmul.f32 3.0, %v333_v60  ;;  %v336_v19 = vld [vmem:[#allocation2 + $0x9c8] sm:$0xff]  ;;  %v337_v20 = vld [vmem:[#allocation2 + $0x9d0] sm:$0xff]  ;;  %v338_v21 = vld [vmem:[#allocation2 + $0x9d8] sm:$0xff]  ;;  %v846_v25 = vmul.f32 3.0, %v334_v9 }
 0x119   :  { %2374 = vst [vmem:[#allocation5 + $0x978] sm:$0xff] %v1862_v10  ;;  %v2907_v22 = vround.rtne.f32 %v842_v11  ;;  %v2908_v23 = vround.rtne.f32 %v843_v12  ;;  %v2909_v24 = vround.rtne.f32 %v844_v13  ;;  %v339_v26 = vld [vmem:[#allocation2 + $0x9e0] sm:$0xff]  ;;  %v340_v27 = vld [vmem:[#allocation2 + $0x9e8] sm:$0xff]  ;;  %v341_v28 = vld [vmem:[#allocation2 + $0x9f0] sm:$0xff]  ;;  %v1863_v29 = vmul.f32 0.33333334, %v2904_v15 }
 0x11a   :  { %v1864_v30 = vmul.f32 0.33333334, %v2905_v16  ;;  %v1865_v31 = vmul.f32 0.33333334, %v2906_v17  ;;  %v2910_v32 = vround.rtne.f32 %v845_v18  ;;  %v2911_v36 = vround.rtne.f32 %v846_v25  ;;  %v342_v41 = vld [vmem:[#allocation2 + $0x9f8] sm:$0xff]  ;;  %v343_v46 = vld [vmem:[#allocation2 + $0xa00] sm:$0xff] }
 0x11b   :  { %v1866_v33 = vmul.f32 0.33333334, %v2907_v22  ;;  %v1867_v34 = vmul.f32 0.33333334, %v2908_v23  ;;  %v1868_v35 = vmul.f32 0.33333334, %v2909_v24 }
 0x11c   :  { %2375 = vst [vmem:[#allocation5 + $0x980] sm:$0xff] %v1863_v29  ;;  %2376 = vst [vmem:[#allocation5 + $0x988] sm:$0xff] %v1864_v30  ;;  %v1869_v37 = vmul.f32 0.33333334, %v2910_v32  ;;  %v847_v38 = vmul.f32 3.0, %v335_v14  ;;  %v848_v39 = vmul.f32 3.0, %v336_v19 }
 0x11d   :  { %2377 = vst [vmem:[#allocation5 + $0x990] sm:$0xff] %v1865_v31  ;;  %v849_v40 = vmul.f32 3.0, %v337_v20  ;;  %2378 = vst [vmem:[#allocation5 + $0x998] sm:$0xff] %v1866_v33  ;;  %v1870_v42 = vmul.f32 0.33333334, %v2911_v36  ;;  %v850_v43 = vmul.f32 3.0, %v338_v21 }
 0x11e   :  { %2379 = vst [vmem:[#allocation5 + $0x9a0] sm:$0xff] %v1867_v34  ;;  %2380 = vst [vmem:[#allocation5 + $0x9a8] sm:$0xff] %v1868_v35  ;;  %v851_v44 = vmul.f32 3.0, %v339_v26  ;;  %v852_v45 = vmul.f32 3.0, %v340_v27  ;;  %v2912_v47 = vround.rtne.f32 %v847_v38  ;;  %v2913_v48 = vround.rtne.f32 %v848_v39  ;;  %v344_v51 = vld [vmem:[#allocation2 + $0xa08] sm:$0xff]  ;;  %v345_v52 = vld [vmem:[#allocation2 + $0xa10] sm:$0xff] }
 0x11f   :  { %2381 = vst [vmem:[#allocation5 + $0x9b0] sm:$0xff] %v1869_v37  ;;  %v2914_v49 = vround.rtne.f32 %v849_v40  ;;  %v853_v50 = vmul.f32 3.0, %v341_v28  ;;  %v346_v53 = vld [vmem:[#allocation2 + $0xa18] sm:$0xff]  ;;  %2382 = vst [vmem:[#allocation5 + $0x9b8] sm:$0xff] %v1870_v42  ;;  %v2915_v54 = vround.rtne.f32 %v850_v43  ;;  %v854_v57 = vmul.f32 3.0, %v342_v41  ;;  %v347_v58 = vld [vmem:[#allocation2 + $0xa20] sm:$0xff] }
 0x120   :  { %v2916_v55 = vround.rtne.f32 %v851_v44  ;;  %v2917_v56 = vround.rtne.f32 %v852_v45  ;;  %v348_v59 = vld [vmem:[#allocation2 + $0xa28] sm:$0xff]  ;;  %v349_v60 = vld [vmem:[#allocation2 + $0xa30] sm:$0xff]  ;;  %v1871_v61 = vmul.f32 0.33333334, %v2912_v47  ;;  %v1872_v62 = vmul.f32 0.33333334, %v2913_v48 }
 0x121   :  { %v1873_v63 = vmul.f32 0.33333334, %v2914_v49  ;;  %v2918_v0 = vround.rtne.f32 %v853_v50  ;;  %v1874_v1 = vmul.f32 0.33333334, %v2915_v54  ;;  %v2919_v4 = vround.rtne.f32 %v854_v57  ;;  %v350_v9 = vld [vmem:[#allocation2 + $0xa38] sm:$0xff]  ;;  %v351_v14 = vld [vmem:[#allocation2 + $0xa40] sm:$0xff] }
 0x122   :  { %v1875_v2 = vmul.f32 0.33333334, %v2916_v55  ;;  %v1876_v3 = vmul.f32 0.33333334, %v2917_v56  ;;  %2383 = vst [vmem:[#allocation5 + $0x9c0] sm:$0xff] %v1871_v61  ;;  %2384 = vst [vmem:[#allocation5 + $0x9c8] sm:$0xff] %v1872_v62 }
 0x123   :  { %2385 = vst [vmem:[#allocation5 + $0x9d0] sm:$0xff] %v1873_v63  ;;  %v1877_v5 = vmul.f32 0.33333334, %v2918_v0  ;;  %v855_v6 = vmul.f32 3.0, %v343_v46  ;;  %v856_v7 = vmul.f32 3.0, %v344_v51  ;;  %v857_v8 = vmul.f32 3.0, %v345_v52 }
 0x124   :  { %2386 = vst [vmem:[#allocation5 + $0x9d8] sm:$0xff] %v1874_v1  ;;  %2387 = vst [vmem:[#allocation5 + $0x9e0] sm:$0xff] %v1875_v2  ;;  %v1878_v10 = vmul.f32 0.33333334, %v2919_v4  ;;  %v858_v11 = vmul.f32 3.0, %v346_v53  ;;  %v859_v12 = vmul.f32 3.0, %v347_v58 }
 0x125   :  { %2388 = vst [vmem:[#allocation5 + $0x9e8] sm:$0xff] %v1876_v3  ;;  %v860_v13 = vmul.f32 3.0, %v348_v59  ;;  %2389 = vst [vmem:[#allocation5 + $0x9f0] sm:$0xff] %v1877_v5  ;;  %v2920_v15 = vround.rtne.f32 %v855_v6  ;;  %v2921_v16 = vround.rtne.f32 %v856_v7  ;;  %v2922_v17 = vround.rtne.f32 %v857_v8  ;;  %v352_v19 = vld [vmem:[#allocation2 + $0xa48] sm:$0xff]  ;;  %v353_v20 = vld [vmem:[#allocation2 + $0xa50] sm:$0xff] }
 0x126   :  { %v861_v18 = vmul.f32 3.0, %v349_v60  ;;  %v354_v21 = vld [vmem:[#allocation2 + $0xa58] sm:$0xff]  ;;  %2390 = vst [vmem:[#allocation5 + $0x9f8] sm:$0xff] %v1878_v10  ;;  %v2923_v22 = vround.rtne.f32 %v858_v11  ;;  %v2924_v23 = vround.rtne.f32 %v859_v12  ;;  %v862_v25 = vmul.f32 3.0, %v350_v9  ;;  %v355_v26 = vld [vmem:[#allocation2 + $0xa60] sm:$0xff]  ;;  %v356_v27 = vld [vmem:[#allocation2 + $0xa68] sm:$0xff] }
 0x127   :  { %v2925_v24 = vround.rtne.f32 %v860_v13  ;;  %v357_v28 = vld [vmem:[#allocation2 + $0xa70] sm:$0xff]  ;;  %v1879_v29 = vmul.f32 0.33333334, %v2920_v15  ;;  %v1880_v30 = vmul.f32 0.33333334, %v2921_v16  ;;  %v863_v38 = vmul.f32 3.0, %v351_v14 }
 0x128   :  { %v1881_v31 = vmul.f32 0.33333334, %v2922_v17  ;;  %v2926_v32 = vround.rtne.f32 %v861_v18  ;;  %v1882_v33 = vmul.f32 0.33333334, %v2923_v22  ;;  %v1883_v34 = vmul.f32 0.33333334, %v2924_v23 }
 0x129   :  { %v1884_v35 = vmul.f32 0.33333334, %v2925_v24  ;;  %v2927_v36 = vround.rtne.f32 %v862_v25  ;;  %2391 = vst [vmem:[#allocation5 + $0xa00] sm:$0xff] %v1879_v29  ;;  %2392 = vst [vmem:[#allocation5 + $0xa08] sm:$0xff] %v1880_v30  ;;  %v864_v39 = vmul.f32 3.0, %v352_v19  ;;  %v865_v40 = vmul.f32 3.0, %v353_v20 }
 0x12a   :  { %2393 = vst [vmem:[#allocation5 + $0xa10] sm:$0xff] %v1881_v31  ;;  %v1885_v37 = vmul.f32 0.33333334, %v2926_v32  ;;  %v358_v41 = vld [vmem:[#allocation2 + $0xa78] sm:$0xff]  ;;  %2394 = vst [vmem:[#allocation5 + $0xa18] sm:$0xff] %v1882_v33  ;;  %v866_v43 = vmul.f32 3.0, %v354_v21  ;;  %v2928_v47 = vround.rtne.f32 %v863_v38 }
 0x12b   :  { %2395 = vst [vmem:[#allocation5 + $0xa20] sm:$0xff] %v1883_v34  ;;  %2396 = vst [vmem:[#allocation5 + $0xa28] sm:$0xff] %v1884_v35  ;;  %v1886_v42 = vmul.f32 0.33333334, %v2927_v36  ;;  %v867_v44 = vmul.f32 3.0, %v355_v26  ;;  %v868_v45 = vmul.f32 3.0, %v356_v27  ;;  %v2929_v48 = vround.rtne.f32 %v864_v39 }
 0x12c   :  { %v359_v46 = vld [vmem:[#allocation2 + $0xa80] sm:$0xff]  ;;  %2397 = vst [vmem:[#allocation5 + $0xa30] sm:$0xff] %v1885_v37  ;;  %v2930_v49 = vround.rtne.f32 %v865_v40  ;;  %v869_v50 = vmul.f32 3.0, %v357_v28  ;;  %v360_v51 = vld [vmem:[#allocation2 + $0xa88] sm:$0xff]  ;;  %v361_v52 = vld [vmem:[#allocation2 + $0xa90] sm:$0xff]  ;;  %v2931_v54 = vround.rtne.f32 %v866_v43  ;;  %v870_v57 = vmul.f32 3.0, %v358_v41 }
 0x12d   :  { %v362_v53 = vld [vmem:[#allocation2 + $0xa98] sm:$0xff]  ;;  %2398 = vst [vmem:[#allocation5 + $0xa38] sm:$0xff] %v1886_v42  ;;  %v2932_v55 = vround.rtne.f32 %v867_v44  ;;  %v2933_v56 = vround.rtne.f32 %v868_v45  ;;  %v363_v58 = vld [vmem:[#allocation2 + $0xaa0] sm:$0xff]  ;;  %v364_v59 = vld [vmem:[#allocation2 + $0xaa8] sm:$0xff]  ;;  %v1887_v61 = vmul.f32 0.33333334, %v2928_v47 }
 0x12e   :  { %v365_v60 = vld [vmem:[#allocation2 + $0xab0] sm:$0xff]  ;;  %v1888_v62 = vmul.f32 0.33333334, %v2929_v48  ;;  %v1889_v63 = vmul.f32 0.33333334, %v2930_v49  ;;  %v2934_v0 = vround.rtne.f32 %v869_v50  ;;  %v2935_v4 = vround.rtne.f32 %v870_v57  ;;  %v366_v9 = vld [vmem:[#allocation2 + $0xab8] sm:$0xff] }
 0x12f   :  { %v1890_v1 = vmul.f32 0.33333334, %v2931_v54  ;;  %v1891_v2 = vmul.f32 0.33333334, %v2932_v55  ;;  %v1892_v3 = vmul.f32 0.33333334, %v2933_v56 }
 0x130   :  { %2399 = vst [vmem:[#allocation5 + $0xa40] sm:$0xff] %v1887_v61  ;;  %2400 = vst [vmem:[#allocation5 + $0xa48] sm:$0xff] %v1888_v62  ;;  %v1893_v5 = vmul.f32 0.33333334, %v2934_v0  ;;  %v871_v6 = vmul.f32 3.0, %v359_v46  ;;  %v872_v7 = vmul.f32 3.0, %v360_v51 }
 0x131   :  { %2401 = vst [vmem:[#allocation5 + $0xa50] sm:$0xff] %v1889_v63  ;;  %v873_v8 = vmul.f32 3.0, %v361_v52  ;;  %2402 = vst [vmem:[#allocation5 + $0xa58] sm:$0xff] %v1890_v1  ;;  %v1894_v10 = vmul.f32 0.33333334, %v2935_v4  ;;  %v874_v11 = vmul.f32 3.0, %v362_v53 }
 0x132   :  { %2403 = vst [vmem:[#allocation5 + $0xa60] sm:$0xff] %v1891_v2  ;;  %2404 = vst [vmem:[#allocation5 + $0xa68] sm:$0xff] %v1892_v3  ;;  %v875_v12 = vmul.f32 3.0, %v363_v58  ;;  %v876_v13 = vmul.f32 3.0, %v364_v59  ;;  %v367_v14 = vld [vmem:[#allocation2 + $0xac0] sm:$0xff]  ;;  %v2936_v15 = vround.rtne.f32 %v871_v6  ;;  %v2937_v16 = vround.rtne.f32 %v872_v7  ;;  %v368_v19 = vld [vmem:[#allocation2 + $0xac8] sm:$0xff] }
 0x133   :  { %2405 = vst [vmem:[#allocation5 + $0xa70] sm:$0xff] %v1893_v5  ;;  %v2938_v17 = vround.rtne.f32 %v873_v8  ;;  %v877_v18 = vmul.f32 3.0, %v365_v60  ;;  %v369_v20 = vld [vmem:[#allocation2 + $0xad0] sm:$0xff]  ;;  %v370_v21 = vld [vmem:[#allocation2 + $0xad8] sm:$0xff]  ;;  %2406 = vst [vmem:[#allocation5 + $0xa78] sm:$0xff] %v1894_v10  ;;  %v2939_v22 = vround.rtne.f32 %v874_v11  ;;  %v878_v25 = vmul.f32 3.0, %v366_v9 }
 0x134   :  { %v2940_v23 = vround.rtne.f32 %v875_v12  ;;  %v2941_v24 = vround.rtne.f32 %v876_v13  ;;  %v371_v26 = vld [vmem:[#allocation2 + $0xae0] sm:$0xff]  ;;  %v372_v27 = vld [vmem:[#allocation2 + $0xae8] sm:$0xff]  ;;  %v373_v28 = vld [vmem:[#allocation2 + $0xaf0] sm:$0xff]  ;;  %v1895_v29 = vmul.f32 0.33333334, %v2936_v15  ;;  %v879_v38 = vmul.f32 3.0, %v367_v14 }
 0x135   :  { %v1896_v30 = vmul.f32 0.33333334, %v2937_v16  ;;  %v1897_v31 = vmul.f32 0.33333334, %v2938_v17  ;;  %v2942_v32 = vround.rtne.f32 %v877_v18  ;;  %v1898_v33 = vmul.f32 0.33333334, %v2939_v22 }
 0x136   :  { %v1899_v34 = vmul.f32 0.33333334, %v2940_v23  ;;  %v1900_v35 = vmul.f32 0.33333334, %v2941_v24  ;;  %v2943_v36 = vround.rtne.f32 %v878_v25  ;;  %2407 = vst [vmem:[#allocation5 + $0xa80] sm:$0xff] %v1895_v29  ;;  %v880_v39 = vmul.f32 3.0, %v368_v19 }
 0x137   :  { %2408 = vst [vmem:[#allocation5 + $0xa88] sm:$0xff] %v1896_v30  ;;  %2409 = vst [vmem:[#allocation5 + $0xa90] sm:$0xff] %v1897_v31  ;;  %v1901_v37 = vmul.f32 0.33333334, %v2942_v32  ;;  %v881_v40 = vmul.f32 3.0, %v369_v20  ;;  %v374_v41 = vld [vmem:[#allocation2 + $0xaf8] sm:$0xff]  ;;  %v2944_v47 = vround.rtne.f32 %v879_v38 }
 0x138   :  { %2410 = vst [vmem:[#allocation5 + $0xa98] sm:$0xff] %v1898_v33  ;;  %2411 = vst [vmem:[#allocation5 + $0xaa0] sm:$0xff] %v1899_v34  ;;  %v1902_v42 = vmul.f32 0.33333334, %v2943_v36  ;;  %v882_v43 = vmul.f32 3.0, %v370_v21  ;;  %v883_v44 = vmul.f32 3.0, %v371_v26  ;;  %v2945_v48 = vround.rtne.f32 %v880_v39 }
 0x139   :  { %2412 = vst [vmem:[#allocation5 + $0xaa8] sm:$0xff] %v1900_v35  ;;  %v884_v45 = vmul.f32 3.0, %v372_v27  ;;  %v375_v46 = vld [vmem:[#allocation2 + $0xb00] sm:$0xff]  ;;  %2413 = vst [vmem:[#allocation5 + $0xab0] sm:$0xff] %v1901_v37  ;;  %v2946_v49 = vround.rtne.f32 %v881_v40  ;;  %v885_v50 = vmul.f32 3.0, %v373_v28  ;;  %v376_v51 = vld [vmem:[#allocation2 + $0xb08] sm:$0xff] }
 0x13a   :  { %v377_v52 = vld [vmem:[#allocation2 + $0xb10] sm:$0xff]  ;;  %v378_v53 = vld [vmem:[#allocation2 + $0xb18] sm:$0xff]  ;;  %2414 = vst [vmem:[#allocation5 + $0xab8] sm:$0xff] %v1902_v42  ;;  %v2947_v54 = vround.rtne.f32 %v882_v43  ;;  %v2948_v55 = vround.rtne.f32 %v883_v44  ;;  %v886_v57 = vmul.f32 3.0, %v374_v41  ;;  %v379_v58 = vld [vmem:[#allocation2 + $0xb20] sm:$0xff]  ;;  %v887_v6 = vmul.f32 3.0, %v375_v46 }
 0x13b   :  { %v2949_v56 = vround.rtne.f32 %v884_v45  ;;  %v380_v59 = vld [vmem:[#allocation2 + $0xb28] sm:$0xff]  ;;  %v381_v60 = vld [vmem:[#allocation2 + $0xb30] sm:$0xff]  ;;  %v1903_v61 = vmul.f32 0.33333334, %v2944_v47  ;;  %v1904_v62 = vmul.f32 0.33333334, %v2945_v48  ;;  %v2950_v0 = vround.rtne.f32 %v885_v50 }
 0x13c   :  { %v1905_v63 = vmul.f32 0.33333334, %v2946_v49  ;;  %v1906_v1 = vmul.f32 0.33333334, %v2947_v54  ;;  %v1907_v2 = vmul.f32 0.33333334, %v2948_v55  ;;  %v2951_v4 = vround.rtne.f32 %v886_v57 }
 0x13d   :  { %v1908_v3 = vmul.f32 0.33333334, %v2949_v56  ;;  %2415 = vst [vmem:[#allocation5 + $0xac0] sm:$0xff] %v1903_v61  ;;  %2416 = vst [vmem:[#allocation5 + $0xac8] sm:$0xff] %v1904_v62  ;;  %v1909_v5 = vmul.f32 0.33333334, %v2950_v0  ;;  %v2952_v15 = vround.rtne.f32 %v887_v6 }
 0x13e   :  { %2417 = vst [vmem:[#allocation5 + $0xad0] sm:$0xff] %v1905_v63  ;;  %v888_v7 = vmul.f32 3.0, %v376_v51  ;;  %v889_v8 = vmul.f32 3.0, %v377_v52  ;;  %v382_v9 = vld [vmem:[#allocation2 + $0xb38] sm:$0xff]  ;;  %2418 = vst [vmem:[#allocation5 + $0xad8] sm:$0xff] %v1906_v1  ;;  %v890_v11 = vmul.f32 3.0, %v378_v53 }
 0x13f   :  { %2419 = vst [vmem:[#allocation5 + $0xae0] sm:$0xff] %v1907_v2  ;;  %2420 = vst [vmem:[#allocation5 + $0xae8] sm:$0xff] %v1908_v3  ;;  %v1910_v10 = vmul.f32 0.33333334, %v2951_v4  ;;  %v891_v12 = vmul.f32 3.0, %v379_v58  ;;  %v892_v13 = vmul.f32 3.0, %v380_v59 }
 0x140   :  { %v383_v14 = vld [vmem:[#allocation2 + $0xb40] sm:$0xff]  ;;  %2421 = vst [vmem:[#allocation5 + $0xaf0] sm:$0xff] %v1909_v5  ;;  %v2953_v16 = vround.rtne.f32 %v888_v7  ;;  %v2954_v17 = vround.rtne.f32 %v889_v8  ;;  %v893_v18 = vmul.f32 3.0, %v381_v60  ;;  %v384_v19 = vld [vmem:[#allocation2 + $0xb48] sm:$0xff]  ;;  %v385_v20 = vld [vmem:[#allocation2 + $0xb50] sm:$0xff]  ;;  %v2955_v22 = vround.rtne.f32 %v890_v11 }
 0x141   :  { %v386_v21 = vld [vmem:[#allocation2 + $0xb58] sm:$0xff]  ;;  %2422 = vst [vmem:[#allocation5 + $0xaf8] sm:$0xff] %v1910_v10  ;;  %v2956_v23 = vround.rtne.f32 %v891_v12  ;;  %v2957_v24 = vround.rtne.f32 %v892_v13  ;;  %v894_v25 = vmul.f32 3.0, %v382_v9  ;;  %v387_v26 = vld [vmem:[#allocation2 + $0xb60] sm:$0xff]  ;;  %v388_v27 = vld [vmem:[#allocation2 + $0xb68] sm:$0xff]  ;;  %v895_v38 = vmul.f32 3.0, %v383_v14 }
 0x142   :  { %v389_v28 = vld [vmem:[#allocation2 + $0xb70] sm:$0xff]  ;;  %v1911_v29 = vmul.f32 0.33333334, %v2952_v15  ;;  %v1912_v30 = vmul.f32 0.33333334, %v2953_v16  ;;  %v2958_v32 = vround.rtne.f32 %v893_v18  ;;  %v896_v39 = vmul.f32 3.0, %v384_v19 }
 0x143   :  { %v1913_v31 = vmul.f32 0.33333334, %v2954_v17  ;;  %v1914_v33 = vmul.f32 0.33333334, %v2955_v22  ;;  %v1915_v34 = vmul.f32 0.33333334, %v2956_v23  ;;  %v2959_v36 = vround.rtne.f32 %v894_v25 }
 0x144   :  { %v1916_v35 = vmul.f32 0.33333334, %v2957_v24  ;;  %2423 = vst [vmem:[#allocation5 + $0xb00] sm:$0xff] %v1911_v29  ;;  %2424 = vst [vmem:[#allocation5 + $0xb08] sm:$0xff] %v1912_v30  ;;  %v1917_v37 = vmul.f32 0.33333334, %v2958_v32  ;;  %v2960_v47 = vround.rtne.f32 %v895_v38  ;;  %v2961_v48 = vround.rtne.f32 %v896_v39 }
 0x145   :  { %2425 = vst [vmem:[#allocation5 + $0xb10] sm:$0xff] %v1913_v31  ;;  %v897_v40 = vmul.f32 3.0, %v385_v20  ;;  %v390_v41 = vld [vmem:[#allocation2 + $0xb78] sm:$0xff]  ;;  %2426 = vst [vmem:[#allocation5 + $0xb18] sm:$0xff] %v1914_v33  ;;  %v1918_v42 = vmul.f32 0.33333334, %v2959_v36 }
 0x146   :  { %2427 = vst [vmem:[#allocation5 + $0xb20] sm:$0xff] %v1915_v34  ;;  %2428 = vst [vmem:[#allocation5 + $0xb28] sm:$0xff] %v1916_v35  ;;  %v898_v43 = vmul.f32 3.0, %v386_v21  ;;  %v899_v44 = vmul.f32 3.0, %v387_v26  ;;  %v900_v45 = vmul.f32 3.0, %v388_v27  ;;  %v391_v46 = vld [vmem:[#allocation2 + $0xb80] sm:$0xff] }
 0x147   :  { %2429 = vst [vmem:[#allocation5 + $0xb30] sm:$0xff] %v1917_v37  ;;  %v2962_v49 = vround.rtne.f32 %v897_v40  ;;  %v901_v50 = vmul.f32 3.0, %v389_v28  ;;  %v392_v51 = vld [vmem:[#allocation2 + $0xb88] sm:$0xff]  ;;  %v393_v52 = vld [vmem:[#allocation2 + $0xb90] sm:$0xff]  ;;  %v394_v53 = vld [vmem:[#allocation2 + $0xb98] sm:$0xff]  ;;  %v902_v57 = vmul.f32 3.0, %v390_v41 }
 0x148   :  { %2430 = vst [vmem:[#allocation5 + $0xb38] sm:$0xff] %v1918_v42  ;;  %v2963_v54 = vround.rtne.f32 %v898_v43  ;;  %v2964_v55 = vround.rtne.f32 %v899_v44  ;;  %v2965_v56 = vround.rtne.f32 %v900_v45  ;;  %v395_v58 = vld [vmem:[#allocation2 + $0xba0] sm:$0xff]  ;;  %v396_v59 = vld [vmem:[#allocation2 + $0xba8] sm:$0xff]  ;;  %v397_v60 = vld [vmem:[#allocation2 + $0xbb0] sm:$0xff]  ;;  %v1919_v61 = vmul.f32 0.33333334, %v2960_v47 }
 0x149   :  { %v1920_v62 = vmul.f32 0.33333334, %v2961_v48  ;;  %v1921_v63 = vmul.f32 0.33333334, %v2962_v49  ;;  %v2966_v0 = vround.rtne.f32 %v901_v50  ;;  %v2967_v4 = vround.rtne.f32 %v902_v57  ;;  %v398_v9 = vld [vmem:[#allocation2 + $0xbb8] sm:$0xff]  ;;  %v399_v14 = vld [vmem:[#allocation2 + $0xbc0] sm:$0xff] }
 0x14a   :  { %v1922_v1 = vmul.f32 0.33333334, %v2963_v54  ;;  %v1923_v2 = vmul.f32 0.33333334, %v2964_v55  ;;  %v1924_v3 = vmul.f32 0.33333334, %v2965_v56 }
 0x14b   :  { %2431 = vst [vmem:[#allocation5 + $0xb40] sm:$0xff] %v1919_v61  ;;  %2432 = vst [vmem:[#allocation5 + $0xb48] sm:$0xff] %v1920_v62  ;;  %v1925_v5 = vmul.f32 0.33333334, %v2966_v0  ;;  %v903_v6 = vmul.f32 3.0, %v391_v46  ;;  %v904_v7 = vmul.f32 3.0, %v392_v51 }
 0x14c   :  { %2433 = vst [vmem:[#allocation5 + $0xb50] sm:$0xff] %v1921_v63  ;;  %v905_v8 = vmul.f32 3.0, %v393_v52  ;;  %2434 = vst [vmem:[#allocation5 + $0xb58] sm:$0xff] %v1922_v1  ;;  %v1926_v10 = vmul.f32 0.33333334, %v2967_v4  ;;  %v906_v11 = vmul.f32 3.0, %v394_v53 }
 0x14d   :  { %2435 = vst [vmem:[#allocation5 + $0xb60] sm:$0xff] %v1923_v2  ;;  %2436 = vst [vmem:[#allocation5 + $0xb68] sm:$0xff] %v1924_v3  ;;  %v907_v12 = vmul.f32 3.0, %v395_v58  ;;  %v908_v13 = vmul.f32 3.0, %v396_v59  ;;  %v2968_v15 = vround.rtne.f32 %v903_v6  ;;  %v2969_v16 = vround.rtne.f32 %v904_v7  ;;  %v400_v19 = vld [vmem:[#allocation2 + $0xbc8] sm:$0xff]  ;;  %v401_v20 = vld [vmem:[#allocation2 + $0xbd0] sm:$0xff] }
 0x14e   :  { %2437 = vst [vmem:[#allocation5 + $0xb70] sm:$0xff] %v1925_v5  ;;  %v2970_v17 = vround.rtne.f32 %v905_v8  ;;  %v909_v18 = vmul.f32 3.0, %v397_v60  ;;  %v402_v21 = vld [vmem:[#allocation2 + $0xbd8] sm:$0xff]  ;;  %2438 = vst [vmem:[#allocation5 + $0xb78] sm:$0xff] %v1926_v10  ;;  %v2971_v22 = vround.rtne.f32 %v906_v11  ;;  %v910_v25 = vmul.f32 3.0, %v398_v9  ;;  %v403_v26 = vld [vmem:[#allocation2 + $0xbe0] sm:$0xff] }
 0x14f   :  { %v2972_v23 = vround.rtne.f32 %v907_v12  ;;  %v2973_v24 = vround.rtne.f32 %v908_v13  ;;  %v404_v27 = vld [vmem:[#allocation2 + $0xbe8] sm:$0xff]  ;;  %v405_v28 = vld [vmem:[#allocation2 + $0xbf0] sm:$0xff]  ;;  %v1927_v29 = vmul.f32 0.33333334, %v2968_v15  ;;  %v1928_v30 = vmul.f32 0.33333334, %v2969_v16 }
 0x150   :  { %v1929_v31 = vmul.f32 0.33333334, %v2970_v17  ;;  %v2974_v32 = vround.rtne.f32 %v909_v18  ;;  %v1930_v33 = vmul.f32 0.33333334, %v2971_v22  ;;  %v2975_v36 = vround.rtne.f32 %v910_v25  ;;  %v406_v41 = vld [vmem:[#allocation2 + $0xbf8] sm:$0xff]  ;;  %v407_v46 = vld [vmem:[#allocation2 + $0xc00] sm:$0xff] }
 0x151   :  { %v1931_v34 = vmul.f32 0.33333334, %v2972_v23  ;;  %v1932_v35 = vmul.f32 0.33333334, %v2973_v24  ;;  %2439 = vst [vmem:[#allocation5 + $0xb80] sm:$0xff] %v1927_v29  ;;  %2440 = vst [vmem:[#allocation5 + $0xb88] sm:$0xff] %v1928_v30 }
 0x152   :  { %2441 = vst [vmem:[#allocation5 + $0xb90] sm:$0xff] %v1929_v31  ;;  %v1933_v37 = vmul.f32 0.33333334, %v2974_v32  ;;  %v911_v38 = vmul.f32 3.0, %v399_v14  ;;  %v912_v39 = vmul.f32 3.0, %v400_v19  ;;  %v913_v40 = vmul.f32 3.0, %v401_v20 }
 0x153   :  { %2442 = vst [vmem:[#allocation5 + $0xb98] sm:$0xff] %v1930_v33  ;;  %2443 = vst [vmem:[#allocation5 + $0xba0] sm:$0xff] %v1931_v34  ;;  %v1934_v42 = vmul.f32 0.33333334, %v2975_v36  ;;  %v914_v43 = vmul.f32 3.0, %v402_v21  ;;  %v915_v44 = vmul.f32 3.0, %v403_v26 }
 0x154   :  { %2444 = vst [vmem:[#allocation5 + $0xba8] sm:$0xff] %v1932_v35  ;;  %v916_v45 = vmul.f32 3.0, %v404_v27  ;;  %2445 = vst [vmem:[#allocation5 + $0xbb0] sm:$0xff] %v1933_v37  ;;  %v2976_v47 = vround.rtne.f32 %v911_v38  ;;  %v2977_v48 = vround.rtne.f32 %v912_v39  ;;  %v2978_v49 = vround.rtne.f32 %v913_v40  ;;  %v408_v51 = vld [vmem:[#allocation2 + $0xc08] sm:$0xff]  ;;  %v409_v52 = vld [vmem:[#allocation2 + $0xc10] sm:$0xff] }
 0x155   :  { %v917_v50 = vmul.f32 3.0, %v405_v28  ;;  %v410_v53 = vld [vmem:[#allocation2 + $0xc18] sm:$0xff]  ;;  %2446 = vst [vmem:[#allocation5 + $0xbb8] sm:$0xff] %v1934_v42  ;;  %v2979_v54 = vround.rtne.f32 %v914_v43  ;;  %v2980_v55 = vround.rtne.f32 %v915_v44  ;;  %v918_v57 = vmul.f32 3.0, %v406_v41  ;;  %v411_v58 = vld [vmem:[#allocation2 + $0xc20] sm:$0xff]  ;;  %v412_v59 = vld [vmem:[#allocation2 + $0xc28] sm:$0xff] }
 0x156   :  { %v2981_v56 = vround.rtne.f32 %v916_v45  ;;  %v413_v60 = vld [vmem:[#allocation2 + $0xc30] sm:$0xff]  ;;  %v1935_v61 = vmul.f32 0.33333334, %v2976_v47  ;;  %v1936_v62 = vmul.f32 0.33333334, %v2977_v48  ;;  %v919_v6 = vmul.f32 3.0, %v407_v46 }
 0x157   :  { %v1937_v63 = vmul.f32 0.33333334, %v2978_v49  ;;  %v2982_v0 = vround.rtne.f32 %v917_v50  ;;  %v1938_v1 = vmul.f32 0.33333334, %v2979_v54  ;;  %v1939_v2 = vmul.f32 0.33333334, %v2980_v55 }
 0x158   :  { %v1940_v3 = vmul.f32 0.33333334, %v2981_v56  ;;  %v2983_v4 = vround.rtne.f32 %v918_v57  ;;  %2447 = vst [vmem:[#allocation5 + $0xbc0] sm:$0xff] %v1935_v61  ;;  %2448 = vst [vmem:[#allocation5 + $0xbc8] sm:$0xff] %v1936_v62  ;;  %v920_v7 = vmul.f32 3.0, %v408_v51  ;;  %v921_v8 = vmul.f32 3.0, %v409_v52 }
 0x159   :  { %2449 = vst [vmem:[#allocation5 + $0xbd0] sm:$0xff] %v1937_v63  ;;  %v1941_v5 = vmul.f32 0.33333334, %v2982_v0  ;;  %v414_v9 = vld [vmem:[#allocation2 + $0xc38] sm:$0xff]  ;;  %2450 = vst [vmem:[#allocation5 + $0xbd8] sm:$0xff] %v1938_v1  ;;  %v922_v11 = vmul.f32 3.0, %v410_v53  ;;  %v2984_v15 = vround.rtne.f32 %v919_v6 }
 0x15a   :  { %2451 = vst [vmem:[#allocation5 + $0xbe0] sm:$0xff] %v1939_v2  ;;  %2452 = vst [vmem:[#allocation5 + $0xbe8] sm:$0xff] %v1940_v3  ;;  %v1942_v10 = vmul.f32 0.33333334, %v2983_v4  ;;  %v923_v12 = vmul.f32 3.0, %v411_v58  ;;  %v924_v13 = vmul.f32 3.0, %v412_v59  ;;  %v2985_v16 = vround.rtne.f32 %v920_v7 }
 0x15b   :  { %v415_v14 = vld [vmem:[#allocation2 + $0xc40] sm:$0xff]  ;;  %2453 = vst [vmem:[#allocation5 + $0xbf0] sm:$0xff] %v1941_v5  ;;  %v2986_v17 = vround.rtne.f32 %v921_v8  ;;  %v925_v18 = vmul.f32 3.0, %v413_v60  ;;  %v416_v19 = vld [vmem:[#allocation2 + $0xc48] sm:$0xff]  ;;  %v417_v20 = vld [vmem:[#allocation2 + $0xc50] sm:$0xff]  ;;  %v2987_v22 = vround.rtne.f32 %v922_v11  ;;  %v926_v25 = vmul.f32 3.0, %v414_v9 }
 0x15c   :  { %v418_v21 = vld [vmem:[#allocation2 + $0xc58] sm:$0xff]  ;;  %2454 = vst [vmem:[#allocation5 + $0xbf8] sm:$0xff] %v1942_v10  ;;  %v2988_v23 = vround.rtne.f32 %v923_v12  ;;  %v2989_v24 = vround.rtne.f32 %v924_v13  ;;  %v419_v26 = vld [vmem:[#allocation2 + $0xc60] sm:$0xff]  ;;  %v420_v27 = vld [vmem:[#allocation2 + $0xc68] sm:$0xff]  ;;  %v1943_v29 = vmul.f32 0.33333334, %v2984_v15 }
 0x15d   :  { %v421_v28 = vld [vmem:[#allocation2 + $0xc70] sm:$0xff]  ;;  %v1944_v30 = vmul.f32 0.33333334, %v2985_v16  ;;  %v1945_v31 = vmul.f32 0.33333334, %v2986_v17  ;;  %v2990_v32 = vround.rtne.f32 %v925_v18  ;;  %v2991_v36 = vround.rtne.f32 %v926_v25  ;;  %v422_v41 = vld [vmem:[#allocation2 + $0xc78] sm:$0xff] }
 0x15e   :  { %v1946_v33 = vmul.f32 0.33333334, %v2987_v22  ;;  %v1947_v34 = vmul.f32 0.33333334, %v2988_v23  ;;  %v1948_v35 = vmul.f32 0.33333334, %v2989_v24 }
 0x15f   :  { %2455 = vst [vmem:[#allocation5 + $0xc00] sm:$0xff] %v1943_v29  ;;  %2456 = vst [vmem:[#allocation5 + $0xc08] sm:$0xff] %v1944_v30  ;;  %v1949_v37 = vmul.f32 0.33333334, %v2990_v32  ;;  %v927_v38 = vmul.f32 3.0, %v415_v14  ;;  %v928_v39 = vmul.f32 3.0, %v416_v19 }
 0x160   :  { %2457 = vst [vmem:[#allocation5 + $0xc10] sm:$0xff] %v1945_v31  ;;  %v929_v40 = vmul.f32 3.0, %v417_v20  ;;  %2458 = vst [vmem:[#allocation5 + $0xc18] sm:$0xff] %v1946_v33  ;;  %v1950_v42 = vmul.f32 0.33333334, %v2991_v36  ;;  %v930_v43 = vmul.f32 3.0, %v418_v21 }
 0x161   :  { %2459 = vst [vmem:[#allocation5 + $0xc20] sm:$0xff] %v1947_v34  ;;  %2460 = vst [vmem:[#allocation5 + $0xc28] sm:$0xff] %v1948_v35  ;;  %v931_v44 = vmul.f32 3.0, %v419_v26  ;;  %v932_v45 = vmul.f32 3.0, %v420_v27  ;;  %v423_v46 = vld [vmem:[#allocation2 + $0xc80] sm:$0xff]  ;;  %v2992_v47 = vround.rtne.f32 %v927_v38  ;;  %v2993_v48 = vround.rtne.f32 %v928_v39  ;;  %v424_v51 = vld [vmem:[#allocation2 + $0xc88] sm:$0xff] }
 0x162   :  { %2461 = vst [vmem:[#allocation5 + $0xc30] sm:$0xff] %v1949_v37  ;;  %v2994_v49 = vround.rtne.f32 %v929_v40  ;;  %v933_v50 = vmul.f32 3.0, %v421_v28  ;;  %v425_v52 = vld [vmem:[#allocation2 + $0xc90] sm:$0xff]  ;;  %v426_v53 = vld [vmem:[#allocation2 + $0xc98] sm:$0xff]  ;;  %2462 = vst [vmem:[#allocation5 + $0xc38] sm:$0xff] %v1950_v42  ;;  %v2995_v54 = vround.rtne.f32 %v930_v43  ;;  %v934_v57 = vmul.f32 3.0, %v422_v41 }
 0x163   :  { %v2996_v55 = vround.rtne.f32 %v931_v44  ;;  %v2997_v56 = vround.rtne.f32 %v932_v45  ;;  %v427_v58 = vld [vmem:[#allocation2 + $0xca0] sm:$0xff]  ;;  %v428_v59 = vld [vmem:[#allocation2 + $0xca8] sm:$0xff]  ;;  %v429_v60 = vld [vmem:[#allocation2 + $0xcb0] sm:$0xff]  ;;  %v1951_v61 = vmul.f32 0.33333334, %v2992_v47  ;;  %v935_v6 = vmul.f32 3.0, %v423_v46 }
 0x164   :  { %v1952_v62 = vmul.f32 0.33333334, %v2993_v48  ;;  %v1953_v63 = vmul.f32 0.33333334, %v2994_v49  ;;  %v2998_v0 = vround.rtne.f32 %v933_v50  ;;  %v1954_v1 = vmul.f32 0.33333334, %v2995_v54 }
 0x165   :  { %v1955_v2 = vmul.f32 0.33333334, %v2996_v55  ;;  %v1956_v3 = vmul.f32 0.33333334, %v2997_v56  ;;  %v2999_v4 = vround.rtne.f32 %v934_v57  ;;  %2463 = vst [vmem:[#allocation5 + $0xc40] sm:$0xff] %v1951_v61  ;;  %v936_v7 = vmul.f32 3.0, %v424_v51 }
 0x166   :  { %2464 = vst [vmem:[#allocation5 + $0xc48] sm:$0xff] %v1952_v62  ;;  %2465 = vst [vmem:[#allocation5 + $0xc50] sm:$0xff] %v1953_v63  ;;  %v1957_v5 = vmul.f32 0.33333334, %v2998_v0  ;;  %v937_v8 = vmul.f32 3.0, %v425_v52  ;;  %v430_v9 = vld [vmem:[#allocation2 + $0xcb8] sm:$0xff]  ;;  %v3000_v15 = vround.rtne.f32 %v935_v6 }
 0x167   :  { %2466 = vst [vmem:[#allocation5 + $0xc58] sm:$0xff] %v1954_v1  ;;  %2467 = vst [vmem:[#allocation5 + $0xc60] sm:$0xff] %v1955_v2  ;;  %v1958_v10 = vmul.f32 0.33333334, %v2999_v4  ;;  %v938_v11 = vmul.f32 3.0, %v426_v53  ;;  %v939_v12 = vmul.f32 3.0, %v427_v58  ;;  %v3001_v16 = vround.rtne.f32 %v936_v7 }
 0x168   :  { %2468 = vst [vmem:[#allocation5 + $0xc68] sm:$0xff] %v1956_v3  ;;  %v940_v13 = vmul.f32 3.0, %v428_v59  ;;  %v431_v14 = vld [vmem:[#allocation2 + $0xcc0] sm:$0xff]  ;;  %2469 = vst [vmem:[#allocation5 + $0xc70] sm:$0xff] %v1957_v5  ;;  %v3002_v17 = vround.rtne.f32 %v937_v8  ;;  %v941_v18 = vmul.f32 3.0, %v429_v60  ;;  %v432_v19 = vld [vmem:[#allocation2 + $0xcc8] sm:$0xff] }
 0x169   :  { %v433_v20 = vld [vmem:[#allocation2 + $0xcd0] sm:$0xff]  ;;  %v434_v21 = vld [vmem:[#allocation2 + $0xcd8] sm:$0xff]  ;;  %2470 = vst [vmem:[#allocation5 + $0xc78] sm:$0xff] %v1958_v10  ;;  %v3003_v22 = vround.rtne.f32 %v938_v11  ;;  %v3004_v23 = vround.rtne.f32 %v939_v12  ;;  %v942_v25 = vmul.f32 3.0, %v430_v9  ;;  %v435_v26 = vld [vmem:[#allocation2 + $0xce0] sm:$0xff]  ;;  %v943_v38 = vmul.f32 3.0, %v431_v14 }
 0x16a   :  { %v3005_v24 = vround.rtne.f32 %v940_v13  ;;  %v436_v27 = vld [vmem:[#allocation2 + $0xce8] sm:$0xff]  ;;  %v437_v28 = vld [vmem:[#allocation2 + $0xcf0] sm:$0xff]  ;;  %v1959_v29 = vmul.f32 0.33333334, %v3000_v15  ;;  %v1960_v30 = vmul.f32 0.33333334, %v3001_v16  ;;  %v3006_v32 = vround.rtne.f32 %v941_v18 }
 0x16b   :  { %v1961_v31 = vmul.f32 0.33333334, %v3002_v17  ;;  %v1962_v33 = vmul.f32 0.33333334, %v3003_v22  ;;  %v1963_v34 = vmul.f32 0.33333334, %v3004_v23  ;;  %v3007_v36 = vround.rtne.f32 %v942_v25 }
 0x16c   :  { %v1964_v35 = vmul.f32 0.33333334, %v3005_v24  ;;  %2471 = vst [vmem:[#allocation5 + $0xc80] sm:$0xff] %v1959_v29  ;;  %2472 = vst [vmem:[#allocation5 + $0xc88] sm:$0xff] %v1960_v30  ;;  %v1965_v37 = vmul.f32 0.33333334, %v3006_v32  ;;  %v3008_v47 = vround.rtne.f32 %v943_v38 }
 0x16d   :  { %2473 = vst [vmem:[#allocation5 + $0xc90] sm:$0xff] %v1961_v31  ;;  %v944_v39 = vmul.f32 3.0, %v432_v19  ;;  %v945_v40 = vmul.f32 3.0, %v433_v20  ;;  %v438_v41 = vld [vmem:[#allocation2 + $0xcf8] sm:$0xff]  ;;  %2474 = vst [vmem:[#allocation5 + $0xc98] sm:$0xff] %v1962_v33  ;;  %v946_v43 = vmul.f32 3.0, %v434_v21 }
 0x16e   :  { %2475 = vst [vmem:[#allocation5 + $0xca0] sm:$0xff] %v1963_v34  ;;  %2476 = vst [vmem:[#allocation5 + $0xca8] sm:$0xff] %v1964_v35  ;;  %v1966_v42 = vmul.f32 0.33333334, %v3007_v36  ;;  %v947_v44 = vmul.f32 3.0, %v435_v26  ;;  %v948_v45 = vmul.f32 3.0, %v436_v27 }
 0x16f   :  { %v439_v46 = vld [vmem:[#allocation2 + $0xd00] sm:$0xff]  ;;  %2477 = vst [vmem:[#allocation5 + $0xcb0] sm:$0xff] %v1965_v37  ;;  %v3009_v48 = vround.rtne.f32 %v944_v39  ;;  %v3010_v49 = vround.rtne.f32 %v945_v40  ;;  %v949_v50 = vmul.f32 3.0, %v437_v28  ;;  %v440_v51 = vld [vmem:[#allocation2 + $0xd08] sm:$0xff]  ;;  %v441_v52 = vld [vmem:[#allocation2 + $0xd10] sm:$0xff]  ;;  %v3011_v54 = vround.rtne.f32 %v946_v43 }
 0x170   :  { %v442_v53 = vld [vmem:[#allocation2 + $0xd18] sm:$0xff]  ;;  %2478 = vst [vmem:[#allocation5 + $0xcb8] sm:$0xff] %v1966_v42  ;;  %v3012_v55 = vround.rtne.f32 %v947_v44  ;;  %v3013_v56 = vround.rtne.f32 %v948_v45  ;;  %v950_v57 = vmul.f32 3.0, %v438_v41  ;;  %v443_v58 = vld [vmem:[#allocation2 + $0xd20] sm:$0xff]  ;;  %v444_v59 = vld [vmem:[#allocation2 + $0xd28] sm:$0xff]  ;;  %v951_v6 = vmul.f32 3.0, %v439_v46 }
 0x171   :  { %v445_v60 = vld [vmem:[#allocation2 + $0xd30] sm:$0xff]  ;;  %v1967_v61 = vmul.f32 0.33333334, %v3008_v47  ;;  %v1968_v62 = vmul.f32 0.33333334, %v3009_v48  ;;  %v3014_v0 = vround.rtne.f32 %v949_v50  ;;  %v952_v7 = vmul.f32 3.0, %v440_v51 }
 0x172   :  { %v1969_v63 = vmul.f32 0.33333334, %v3010_v49  ;;  %v1970_v1 = vmul.f32 0.33333334, %v3011_v54  ;;  %v1971_v2 = vmul.f32 0.33333334, %v3012_v55  ;;  %v3015_v4 = vround.rtne.f32 %v950_v57 }
 0x173   :  { %v1972_v3 = vmul.f32 0.33333334, %v3013_v56  ;;  %2479 = vst [vmem:[#allocation5 + $0xcc0] sm:$0xff] %v1967_v61  ;;  %2480 = vst [vmem:[#allocation5 + $0xcc8] sm:$0xff] %v1968_v62  ;;  %v1973_v5 = vmul.f32 0.33333334, %v3014_v0  ;;  %v3016_v15 = vround.rtne.f32 %v951_v6  ;;  %v3017_v16 = vround.rtne.f32 %v952_v7 }
 0x174   :  { %2481 = vst [vmem:[#allocation5 + $0xcd0] sm:$0xff] %v1969_v63  ;;  %v953_v8 = vmul.f32 3.0, %v441_v52  ;;  %v446_v9 = vld [vmem:[#allocation2 + $0xd38] sm:$0xff]  ;;  %2482 = vst [vmem:[#allocation5 + $0xcd8] sm:$0xff] %v1970_v1  ;;  %v1974_v10 = vmul.f32 0.33333334, %v3015_v4 }
 0x175   :  { %2483 = vst [vmem:[#allocation5 + $0xce0] sm:$0xff] %v1971_v2  ;;  %2484 = vst [vmem:[#allocation5 + $0xce8] sm:$0xff] %v1972_v3  ;;  %v954_v11 = vmul.f32 3.0, %v442_v53  ;;  %v955_v12 = vmul.f32 3.0, %v443_v58  ;;  %v956_v13 = vmul.f32 3.0, %v444_v59  ;;  %v447_v14 = vld [vmem:[#allocation2 + $0xd40] sm:$0xff] }
 0x176   :  { %2485 = vst [vmem:[#allocation5 + $0xcf0] sm:$0xff] %v1973_v5  ;;  %v3018_v17 = vround.rtne.f32 %v953_v8  ;;  %v957_v18 = vmul.f32 3.0, %v445_v60  ;;  %v448_v19 = vld [vmem:[#allocation2 + $0xd48] sm:$0xff]  ;;  %v449_v20 = vld [vmem:[#allocation2 + $0xd50] sm:$0xff]  ;;  %v450_v21 = vld [vmem:[#allocation2 + $0xd58] sm:$0xff]  ;;  %v958_v25 = vmul.f32 3.0, %v446_v9 }
 0x177   :  { %2486 = vst [vmem:[#allocation5 + $0xcf8] sm:$0xff] %v1974_v10  ;;  %v3019_v22 = vround.rtne.f32 %v954_v11  ;;  %v3020_v23 = vround.rtne.f32 %v955_v12  ;;  %v3021_v24 = vround.rtne.f32 %v956_v13  ;;  %v451_v26 = vld [vmem:[#allocation2 + $0xd60] sm:$0xff]  ;;  %v452_v27 = vld [vmem:[#allocation2 + $0xd68] sm:$0xff]  ;;  %v453_v28 = vld [vmem:[#allocation2 + $0xd70] sm:$0xff]  ;;  %v1975_v29 = vmul.f32 0.33333334, %v3016_v15 }
 0x178   :  { %v1976_v30 = vmul.f32 0.33333334, %v3017_v16  ;;  %v1977_v31 = vmul.f32 0.33333334, %v3018_v17  ;;  %v3022_v32 = vround.rtne.f32 %v957_v18  ;;  %v3023_v36 = vround.rtne.f32 %v958_v25  ;;  %v454_v41 = vld [vmem:[#allocation2 + $0xd78] sm:$0xff]  ;;  %v455_v46 = vld [vmem:[#allocation2 + $0xd80] sm:$0xff] }
 0x179   :  { %v1978_v33 = vmul.f32 0.33333334, %v3019_v22  ;;  %v1979_v34 = vmul.f32 0.33333334, %v3020_v23  ;;  %v1980_v35 = vmul.f32 0.33333334, %v3021_v24 }
 0x17a   :  { %2487 = vst [vmem:[#allocation5 + $0xd00] sm:$0xff] %v1975_v29  ;;  %2488 = vst [vmem:[#allocation5 + $0xd08] sm:$0xff] %v1976_v30  ;;  %v1981_v37 = vmul.f32 0.33333334, %v3022_v32  ;;  %v959_v38 = vmul.f32 3.0, %v447_v14  ;;  %v960_v39 = vmul.f32 3.0, %v448_v19 }
 0x17b   :  { %2489 = vst [vmem:[#allocation5 + $0xd10] sm:$0xff] %v1977_v31  ;;  %v961_v40 = vmul.f32 3.0, %v449_v20  ;;  %2490 = vst [vmem:[#allocation5 + $0xd18] sm:$0xff] %v1978_v33  ;;  %v1982_v42 = vmul.f32 0.33333334, %v3023_v36  ;;  %v962_v43 = vmul.f32 3.0, %v450_v21 }
 0x17c   :  { %2491 = vst [vmem:[#allocation5 + $0xd20] sm:$0xff] %v1979_v34  ;;  %2492 = vst [vmem:[#allocation5 + $0xd28] sm:$0xff] %v1980_v35  ;;  %v963_v44 = vmul.f32 3.0, %v451_v26  ;;  %v964_v45 = vmul.f32 3.0, %v452_v27  ;;  %v3024_v47 = vround.rtne.f32 %v959_v38  ;;  %v3025_v48 = vround.rtne.f32 %v960_v39  ;;  %v456_v51 = vld [vmem:[#allocation2 + $0xd88] sm:$0xff]  ;;  %v457_v52 = vld [vmem:[#allocation2 + $0xd90] sm:$0xff] }
 0x17d   :  { %2493 = vst [vmem:[#allocation5 + $0xd30] sm:$0xff] %v1981_v37  ;;  %v3026_v49 = vround.rtne.f32 %v961_v40  ;;  %v965_v50 = vmul.f32 3.0, %v453_v28  ;;  %v458_v53 = vld [vmem:[#allocation2 + $0xd98] sm:$0xff]  ;;  %2494 = vst [vmem:[#allocation5 + $0xd38] sm:$0xff] %v1982_v42  ;;  %v3027_v54 = vround.rtne.f32 %v962_v43  ;;  %v966_v57 = vmul.f32 3.0, %v454_v41  ;;  %v459_v58 = vld [vmem:[#allocation2 + $0xda0] sm:$0xff] }
 0x17e   :  { %v3028_v55 = vround.rtne.f32 %v963_v44  ;;  %v3029_v56 = vround.rtne.f32 %v964_v45  ;;  %v460_v59 = vld [vmem:[#allocation2 + $0xda8] sm:$0xff]  ;;  %v461_v60 = vld [vmem:[#allocation2 + $0xdb0] sm:$0xff]  ;;  %v1983_v61 = vmul.f32 0.33333334, %v3024_v47  ;;  %v1984_v62 = vmul.f32 0.33333334, %v3025_v48 }
 0x17f   :  { %v1985_v63 = vmul.f32 0.33333334, %v3026_v49  ;;  %v3030_v0 = vround.rtne.f32 %v965_v50  ;;  %v1986_v1 = vmul.f32 0.33333334, %v3027_v54  ;;  %v3031_v4 = vround.rtne.f32 %v966_v57  ;;  %v462_v9 = vld [vmem:[#allocation2 + $0xdb8] sm:$0xff]  ;;  %v463_v14 = vld [vmem:[#allocation2 + $0xdc0] sm:$0xff] }
 0x180   :  { %v1987_v2 = vmul.f32 0.33333334, %v3028_v55  ;;  %v1988_v3 = vmul.f32 0.33333334, %v3029_v56  ;;  %2495 = vst [vmem:[#allocation5 + $0xd40] sm:$0xff] %v1983_v61  ;;  %2496 = vst [vmem:[#allocation5 + $0xd48] sm:$0xff] %v1984_v62 }
 0x181   :  { %2497 = vst [vmem:[#allocation5 + $0xd50] sm:$0xff] %v1985_v63  ;;  %v1989_v5 = vmul.f32 0.33333334, %v3030_v0  ;;  %v967_v6 = vmul.f32 3.0, %v455_v46  ;;  %v968_v7 = vmul.f32 3.0, %v456_v51  ;;  %v969_v8 = vmul.f32 3.0, %v457_v52 }
 0x182   :  { %2498 = vst [vmem:[#allocation5 + $0xd58] sm:$0xff] %v1986_v1  ;;  %2499 = vst [vmem:[#allocation5 + $0xd60] sm:$0xff] %v1987_v2  ;;  %v1990_v10 = vmul.f32 0.33333334, %v3031_v4  ;;  %v970_v11 = vmul.f32 3.0, %v458_v53  ;;  %v971_v12 = vmul.f32 3.0, %v459_v58 }
 0x183   :  { %2500 = vst [vmem:[#allocation5 + $0xd68] sm:$0xff] %v1988_v3  ;;  %v972_v13 = vmul.f32 3.0, %v460_v59  ;;  %2501 = vst [vmem:[#allocation5 + $0xd70] sm:$0xff] %v1989_v5  ;;  %v3032_v15 = vround.rtne.f32 %v967_v6  ;;  %v3033_v16 = vround.rtne.f32 %v968_v7  ;;  %v3034_v17 = vround.rtne.f32 %v969_v8  ;;  %v464_v19 = vld [vmem:[#allocation2 + $0xdc8] sm:$0xff]  ;;  %v465_v20 = vld [vmem:[#allocation2 + $0xdd0] sm:$0xff] }
 0x184   :  { %v973_v18 = vmul.f32 3.0, %v461_v60  ;;  %v466_v21 = vld [vmem:[#allocation2 + $0xdd8] sm:$0xff]  ;;  %2502 = vst [vmem:[#allocation5 + $0xd78] sm:$0xff] %v1990_v10  ;;  %v3035_v22 = vround.rtne.f32 %v970_v11  ;;  %v3036_v23 = vround.rtne.f32 %v971_v12  ;;  %v974_v25 = vmul.f32 3.0, %v462_v9  ;;  %v467_v26 = vld [vmem:[#allocation2 + $0xde0] sm:$0xff]  ;;  %v468_v27 = vld [vmem:[#allocation2 + $0xde8] sm:$0xff] }
 0x185   :  { %v3037_v24 = vround.rtne.f32 %v972_v13  ;;  %v469_v28 = vld [vmem:[#allocation2 + $0xdf0] sm:$0xff]  ;;  %v1991_v29 = vmul.f32 0.33333334, %v3032_v15  ;;  %v1992_v30 = vmul.f32 0.33333334, %v3033_v16  ;;  %v975_v38 = vmul.f32 3.0, %v463_v14 }
 0x186   :  { %v1993_v31 = vmul.f32 0.33333334, %v3034_v17  ;;  %v3038_v32 = vround.rtne.f32 %v973_v18  ;;  %v1994_v33 = vmul.f32 0.33333334, %v3035_v22  ;;  %v1995_v34 = vmul.f32 0.33333334, %v3036_v23 }
 0x187   :  { %v1996_v35 = vmul.f32 0.33333334, %v3037_v24  ;;  %v3039_v36 = vround.rtne.f32 %v974_v25  ;;  %2503 = vst [vmem:[#allocation5 + $0xd80] sm:$0xff] %v1991_v29  ;;  %2504 = vst [vmem:[#allocation5 + $0xd88] sm:$0xff] %v1992_v30  ;;  %v976_v39 = vmul.f32 3.0, %v464_v19  ;;  %v977_v40 = vmul.f32 3.0, %v465_v20 }
 0x188   :  { %2505 = vst [vmem:[#allocation5 + $0xd90] sm:$0xff] %v1993_v31  ;;  %v1997_v37 = vmul.f32 0.33333334, %v3038_v32  ;;  %v470_v41 = vld [vmem:[#allocation2 + $0xdf8] sm:$0xff]  ;;  %2506 = vst [vmem:[#allocation5 + $0xd98] sm:$0xff] %v1994_v33  ;;  %v978_v43 = vmul.f32 3.0, %v466_v21  ;;  %v3040_v47 = vround.rtne.f32 %v975_v38 }
 0x189   :  { %2507 = vst [vmem:[#allocation5 + $0xda0] sm:$0xff] %v1995_v34  ;;  %2508 = vst [vmem:[#allocation5 + $0xda8] sm:$0xff] %v1996_v35  ;;  %v1998_v42 = vmul.f32 0.33333334, %v3039_v36  ;;  %v979_v44 = vmul.f32 3.0, %v467_v26  ;;  %v980_v45 = vmul.f32 3.0, %v468_v27  ;;  %v3041_v48 = vround.rtne.f32 %v976_v39 }
 0x18a   :  { %v471_v46 = vld [vmem:[#allocation2 + $0xe00] sm:$0xff]  ;;  %2509 = vst [vmem:[#allocation5 + $0xdb0] sm:$0xff] %v1997_v37  ;;  %v3042_v49 = vround.rtne.f32 %v977_v40  ;;  %v981_v50 = vmul.f32 3.0, %v469_v28  ;;  %v472_v51 = vld [vmem:[#allocation2 + $0xe08] sm:$0xff]  ;;  %v473_v52 = vld [vmem:[#allocation2 + $0xe10] sm:$0xff]  ;;  %v3043_v54 = vround.rtne.f32 %v978_v43  ;;  %v982_v57 = vmul.f32 3.0, %v470_v41 }
 0x18b   :  { %v474_v53 = vld [vmem:[#allocation2 + $0xe18] sm:$0xff]  ;;  %2510 = vst [vmem:[#allocation5 + $0xdb8] sm:$0xff] %v1998_v42  ;;  %v3044_v55 = vround.rtne.f32 %v979_v44  ;;  %v3045_v56 = vround.rtne.f32 %v980_v45  ;;  %v475_v58 = vld [vmem:[#allocation2 + $0xe20] sm:$0xff]  ;;  %v476_v59 = vld [vmem:[#allocation2 + $0xe28] sm:$0xff]  ;;  %v1999_v61 = vmul.f32 0.33333334, %v3040_v47 }
 0x18c   :  { %v477_v60 = vld [vmem:[#allocation2 + $0xe30] sm:$0xff]  ;;  %v2000_v62 = vmul.f32 0.33333334, %v3041_v48  ;;  %v2001_v63 = vmul.f32 0.33333334, %v3042_v49  ;;  %v3046_v0 = vround.rtne.f32 %v981_v50  ;;  %v3047_v4 = vround.rtne.f32 %v982_v57  ;;  %v478_v9 = vld [vmem:[#allocation2 + $0xe38] sm:$0xff] }
 0x18d   :  { %v2002_v1 = vmul.f32 0.33333334, %v3043_v54  ;;  %v2003_v2 = vmul.f32 0.33333334, %v3044_v55  ;;  %v2004_v3 = vmul.f32 0.33333334, %v3045_v56 }
 0x18e   :  { %2511 = vst [vmem:[#allocation5 + $0xdc0] sm:$0xff] %v1999_v61  ;;  %2512 = vst [vmem:[#allocation5 + $0xdc8] sm:$0xff] %v2000_v62  ;;  %v2005_v5 = vmul.f32 0.33333334, %v3046_v0  ;;  %v983_v6 = vmul.f32 3.0, %v471_v46  ;;  %v984_v7 = vmul.f32 3.0, %v472_v51 }
 0x18f   :  { %2513 = vst [vmem:[#allocation5 + $0xdd0] sm:$0xff] %v2001_v63  ;;  %v985_v8 = vmul.f32 3.0, %v473_v52  ;;  %2514 = vst [vmem:[#allocation5 + $0xdd8] sm:$0xff] %v2002_v1  ;;  %v2006_v10 = vmul.f32 0.33333334, %v3047_v4  ;;  %v986_v11 = vmul.f32 3.0, %v474_v53 }
 0x190   :  { %2515 = vst [vmem:[#allocation5 + $0xde0] sm:$0xff] %v2003_v2  ;;  %2516 = vst [vmem:[#allocation5 + $0xde8] sm:$0xff] %v2004_v3  ;;  %v987_v12 = vmul.f32 3.0, %v475_v58  ;;  %v988_v13 = vmul.f32 3.0, %v476_v59  ;;  %v479_v14 = vld [vmem:[#allocation2 + $0xe40] sm:$0xff]  ;;  %v3048_v15 = vround.rtne.f32 %v983_v6  ;;  %v3049_v16 = vround.rtne.f32 %v984_v7  ;;  %v480_v19 = vld [vmem:[#allocation2 + $0xe48] sm:$0xff] }
 0x191   :  { %2517 = vst [vmem:[#allocation5 + $0xdf0] sm:$0xff] %v2005_v5  ;;  %v3050_v17 = vround.rtne.f32 %v985_v8  ;;  %v989_v18 = vmul.f32 3.0, %v477_v60  ;;  %v481_v20 = vld [vmem:[#allocation2 + $0xe50] sm:$0xff]  ;;  %v482_v21 = vld [vmem:[#allocation2 + $0xe58] sm:$0xff]  ;;  %2518 = vst [vmem:[#allocation5 + $0xdf8] sm:$0xff] %v2006_v10  ;;  %v3051_v22 = vround.rtne.f32 %v986_v11  ;;  %v990_v25 = vmul.f32 3.0, %v478_v9 }
 0x192   :  { %v3052_v23 = vround.rtne.f32 %v987_v12  ;;  %v3053_v24 = vround.rtne.f32 %v988_v13  ;;  %v483_v26 = vld [vmem:[#allocation2 + $0xe60] sm:$0xff]  ;;  %v484_v27 = vld [vmem:[#allocation2 + $0xe68] sm:$0xff]  ;;  %v485_v28 = vld [vmem:[#allocation2 + $0xe70] sm:$0xff]  ;;  %v2007_v29 = vmul.f32 0.33333334, %v3048_v15  ;;  %v991_v38 = vmul.f32 3.0, %v479_v14 }
 0x193   :  { %v2008_v30 = vmul.f32 0.33333334, %v3049_v16  ;;  %v2009_v31 = vmul.f32 0.33333334, %v3050_v17  ;;  %v3054_v32 = vround.rtne.f32 %v989_v18  ;;  %v2010_v33 = vmul.f32 0.33333334, %v3051_v22 }
 0x194   :  { %v2011_v34 = vmul.f32 0.33333334, %v3052_v23  ;;  %v2012_v35 = vmul.f32 0.33333334, %v3053_v24  ;;  %v3055_v36 = vround.rtne.f32 %v990_v25  ;;  %2519 = vst [vmem:[#allocation5 + $0xe00] sm:$0xff] %v2007_v29  ;;  %v992_v39 = vmul.f32 3.0, %v480_v19 }
 0x195   :  { %2520 = vst [vmem:[#allocation5 + $0xe08] sm:$0xff] %v2008_v30  ;;  %2521 = vst [vmem:[#allocation5 + $0xe10] sm:$0xff] %v2009_v31  ;;  %v2013_v37 = vmul.f32 0.33333334, %v3054_v32  ;;  %v993_v40 = vmul.f32 3.0, %v481_v20  ;;  %v486_v41 = vld [vmem:[#allocation2 + $0xe78] sm:$0xff]  ;;  %v3056_v47 = vround.rtne.f32 %v991_v38 }
 0x196   :  { %2522 = vst [vmem:[#allocation5 + $0xe18] sm:$0xff] %v2010_v33  ;;  %2523 = vst [vmem:[#allocation5 + $0xe20] sm:$0xff] %v2011_v34  ;;  %v2014_v42 = vmul.f32 0.33333334, %v3055_v36  ;;  %v994_v43 = vmul.f32 3.0, %v482_v21  ;;  %v995_v44 = vmul.f32 3.0, %v483_v26  ;;  %v3057_v48 = vround.rtne.f32 %v992_v39 }
 0x197   :  { %2524 = vst [vmem:[#allocation5 + $0xe28] sm:$0xff] %v2012_v35  ;;  %v996_v45 = vmul.f32 3.0, %v484_v27  ;;  %v487_v46 = vld [vmem:[#allocation2 + $0xe80] sm:$0xff]  ;;  %2525 = vst [vmem:[#allocation5 + $0xe30] sm:$0xff] %v2013_v37  ;;  %v3058_v49 = vround.rtne.f32 %v993_v40  ;;  %v997_v50 = vmul.f32 3.0, %v485_v28  ;;  %v488_v51 = vld [vmem:[#allocation2 + $0xe88] sm:$0xff] }
 0x198   :  { %v489_v52 = vld [vmem:[#allocation2 + $0xe90] sm:$0xff]  ;;  %v490_v53 = vld [vmem:[#allocation2 + $0xe98] sm:$0xff]  ;;  %2526 = vst [vmem:[#allocation5 + $0xe38] sm:$0xff] %v2014_v42  ;;  %v3059_v54 = vround.rtne.f32 %v994_v43  ;;  %v3060_v55 = vround.rtne.f32 %v995_v44  ;;  %v998_v57 = vmul.f32 3.0, %v486_v41  ;;  %v491_v58 = vld [vmem:[#allocation2 + $0xea0] sm:$0xff]  ;;  %v999_v6 = vmul.f32 3.0, %v487_v46 }
 0x199   :  { %v3061_v56 = vround.rtne.f32 %v996_v45  ;;  %v492_v59 = vld [vmem:[#allocation2 + $0xea8] sm:$0xff]  ;;  %v493_v60 = vld [vmem:[#allocation2 + $0xeb0] sm:$0xff]  ;;  %v2015_v61 = vmul.f32 0.33333334, %v3056_v47  ;;  %v2016_v62 = vmul.f32 0.33333334, %v3057_v48  ;;  %v3062_v0 = vround.rtne.f32 %v997_v50 }
 0x19a   :  { %v2017_v63 = vmul.f32 0.33333334, %v3058_v49  ;;  %v2018_v1 = vmul.f32 0.33333334, %v3059_v54  ;;  %v2019_v2 = vmul.f32 0.33333334, %v3060_v55  ;;  %v3063_v4 = vround.rtne.f32 %v998_v57 }
 0x19b   :  { %v2020_v3 = vmul.f32 0.33333334, %v3061_v56  ;;  %2527 = vst [vmem:[#allocation5 + $0xe40] sm:$0xff] %v2015_v61  ;;  %2528 = vst [vmem:[#allocation5 + $0xe48] sm:$0xff] %v2016_v62  ;;  %v2021_v5 = vmul.f32 0.33333334, %v3062_v0  ;;  %v3064_v15 = vround.rtne.f32 %v999_v6 }
 0x19c   :  { %2529 = vst [vmem:[#allocation5 + $0xe50] sm:$0xff] %v2017_v63  ;;  %v1000_v7 = vmul.f32 3.0, %v488_v51  ;;  %v1001_v8 = vmul.f32 3.0, %v489_v52  ;;  %v494_v9 = vld [vmem:[#allocation2 + $0xeb8] sm:$0xff]  ;;  %2530 = vst [vmem:[#allocation5 + $0xe58] sm:$0xff] %v2018_v1  ;;  %v1002_v11 = vmul.f32 3.0, %v490_v53 }
 0x19d   :  { %2531 = vst [vmem:[#allocation5 + $0xe60] sm:$0xff] %v2019_v2  ;;  %2532 = vst [vmem:[#allocation5 + $0xe68] sm:$0xff] %v2020_v3  ;;  %v2022_v10 = vmul.f32 0.33333334, %v3063_v4  ;;  %v1003_v12 = vmul.f32 3.0, %v491_v58  ;;  %v1004_v13 = vmul.f32 3.0, %v492_v59 }
 0x19e   :  { %v495_v14 = vld [vmem:[#allocation2 + $0xec0] sm:$0xff]  ;;  %2533 = vst [vmem:[#allocation5 + $0xe70] sm:$0xff] %v2021_v5  ;;  %v3065_v16 = vround.rtne.f32 %v1000_v7  ;;  %v3066_v17 = vround.rtne.f32 %v1001_v8  ;;  %v1005_v18 = vmul.f32 3.0, %v493_v60  ;;  %v496_v19 = vld [vmem:[#allocation2 + $0xec8] sm:$0xff]  ;;  %v497_v20 = vld [vmem:[#allocation2 + $0xed0] sm:$0xff]  ;;  %v3067_v22 = vround.rtne.f32 %v1002_v11 }
 0x19f   :  { %v498_v21 = vld [vmem:[#allocation2 + $0xed8] sm:$0xff]  ;;  %2534 = vst [vmem:[#allocation5 + $0xe78] sm:$0xff] %v2022_v10  ;;  %v3068_v23 = vround.rtne.f32 %v1003_v12  ;;  %v3069_v24 = vround.rtne.f32 %v1004_v13  ;;  %v1006_v25 = vmul.f32 3.0, %v494_v9  ;;  %v499_v26 = vld [vmem:[#allocation2 + $0xee0] sm:$0xff]  ;;  %v500_v27 = vld [vmem:[#allocation2 + $0xee8] sm:$0xff]  ;;  %v1007_v38 = vmul.f32 3.0, %v495_v14 }
 0x1a0   :  { %v501_v28 = vld [vmem:[#allocation2 + $0xef0] sm:$0xff]  ;;  %v2023_v29 = vmul.f32 0.33333334, %v3064_v15  ;;  %v2024_v30 = vmul.f32 0.33333334, %v3065_v16  ;;  %v3070_v32 = vround.rtne.f32 %v1005_v18  ;;  %v1008_v39 = vmul.f32 3.0, %v496_v19 }
 0x1a1   :  { %v2025_v31 = vmul.f32 0.33333334, %v3066_v17  ;;  %v2026_v33 = vmul.f32 0.33333334, %v3067_v22  ;;  %v2027_v34 = vmul.f32 0.33333334, %v3068_v23  ;;  %v3071_v36 = vround.rtne.f32 %v1006_v25 }
 0x1a2   :  { %v2028_v35 = vmul.f32 0.33333334, %v3069_v24  ;;  %2535 = vst [vmem:[#allocation5 + $0xe80] sm:$0xff] %v2023_v29  ;;  %2536 = vst [vmem:[#allocation5 + $0xe88] sm:$0xff] %v2024_v30  ;;  %v2029_v37 = vmul.f32 0.33333334, %v3070_v32  ;;  %v3072_v47 = vround.rtne.f32 %v1007_v38  ;;  %v3073_v48 = vround.rtne.f32 %v1008_v39 }
 0x1a3   :  { %2537 = vst [vmem:[#allocation5 + $0xe90] sm:$0xff] %v2025_v31  ;;  %v1009_v40 = vmul.f32 3.0, %v497_v20  ;;  %v502_v41 = vld [vmem:[#allocation2 + $0xef8] sm:$0xff]  ;;  %2538 = vst [vmem:[#allocation5 + $0xe98] sm:$0xff] %v2026_v33  ;;  %v2030_v42 = vmul.f32 0.33333334, %v3071_v36 }
 0x1a4   :  { %2539 = vst [vmem:[#allocation5 + $0xea0] sm:$0xff] %v2027_v34  ;;  %2540 = vst [vmem:[#allocation5 + $0xea8] sm:$0xff] %v2028_v35  ;;  %v1010_v43 = vmul.f32 3.0, %v498_v21  ;;  %v1011_v44 = vmul.f32 3.0, %v499_v26  ;;  %v1012_v45 = vmul.f32 3.0, %v500_v27  ;;  %v503_v46 = vld [vmem:[#allocation2 + $0xf00] sm:$0xff] }
 0x1a5   :  { %2541 = vst [vmem:[#allocation5 + $0xeb0] sm:$0xff] %v2029_v37  ;;  %v3074_v49 = vround.rtne.f32 %v1009_v40  ;;  %v1013_v50 = vmul.f32 3.0, %v501_v28  ;;  %v504_v51 = vld [vmem:[#allocation2 + $0xf08] sm:$0xff]  ;;  %v505_v52 = vld [vmem:[#allocation2 + $0xf10] sm:$0xff]  ;;  %v506_v53 = vld [vmem:[#allocation2 + $0xf18] sm:$0xff]  ;;  %v1014_v57 = vmul.f32 3.0, %v502_v41 }
 0x1a6   :  { %2542 = vst [vmem:[#allocation5 + $0xeb8] sm:$0xff] %v2030_v42  ;;  %v3075_v54 = vround.rtne.f32 %v1010_v43  ;;  %v3076_v55 = vround.rtne.f32 %v1011_v44  ;;  %v3077_v56 = vround.rtne.f32 %v1012_v45  ;;  %v507_v58 = vld [vmem:[#allocation2 + $0xf20] sm:$0xff]  ;;  %v508_v59 = vld [vmem:[#allocation2 + $0xf28] sm:$0xff]  ;;  %v509_v60 = vld [vmem:[#allocation2 + $0xf30] sm:$0xff]  ;;  %v2031_v61 = vmul.f32 0.33333334, %v3072_v47 }
 0x1a7   :  { %v2032_v62 = vmul.f32 0.33333334, %v3073_v48  ;;  %v2033_v63 = vmul.f32 0.33333334, %v3074_v49  ;;  %v3078_v0 = vround.rtne.f32 %v1013_v50  ;;  %v3079_v4 = vround.rtne.f32 %v1014_v57  ;;  %v510_v9 = vld [vmem:[#allocation2 + $0xf38] sm:$0xff]  ;;  %v511_v14 = vld [vmem:[#allocation2 + $0xf40] sm:$0xff] }
 0x1a8   :  { %v2034_v1 = vmul.f32 0.33333334, %v3075_v54  ;;  %v2035_v2 = vmul.f32 0.33333334, %v3076_v55  ;;  %v2036_v3 = vmul.f32 0.33333334, %v3077_v56 }
 0x1a9   :  { %2543 = vst [vmem:[#allocation5 + $0xec0] sm:$0xff] %v2031_v61  ;;  %2544 = vst [vmem:[#allocation5 + $0xec8] sm:$0xff] %v2032_v62  ;;  %v2037_v5 = vmul.f32 0.33333334, %v3078_v0  ;;  %v1015_v6 = vmul.f32 3.0, %v503_v46  ;;  %v1016_v7 = vmul.f32 3.0, %v504_v51 }
 0x1aa   :  { %2545 = vst [vmem:[#allocation5 + $0xed0] sm:$0xff] %v2033_v63  ;;  %v1017_v8 = vmul.f32 3.0, %v505_v52  ;;  %2546 = vst [vmem:[#allocation5 + $0xed8] sm:$0xff] %v2034_v1  ;;  %v2038_v10 = vmul.f32 0.33333334, %v3079_v4  ;;  %v1018_v11 = vmul.f32 3.0, %v506_v53 }
 0x1ab   :  { %2547 = vst [vmem:[#allocation5 + $0xee0] sm:$0xff] %v2035_v2  ;;  %2548 = vst [vmem:[#allocation5 + $0xee8] sm:$0xff] %v2036_v3  ;;  %v1019_v12 = vmul.f32 3.0, %v507_v58  ;;  %v1020_v13 = vmul.f32 3.0, %v508_v59  ;;  %v3080_v15 = vround.rtne.f32 %v1015_v6  ;;  %v3081_v16 = vround.rtne.f32 %v1016_v7  ;;  %v512_v19 = vld [vmem:[#allocation2 + $0xf48] sm:$0xff]  ;;  %v513_v20 = vld [vmem:[#allocation2 + $0xf50] sm:$0xff] }
 0x1ac   :  { %2549 = vst [vmem:[#allocation5 + $0xef0] sm:$0xff] %v2037_v5  ;;  %v3082_v17 = vround.rtne.f32 %v1017_v8  ;;  %v1021_v18 = vmul.f32 3.0, %v509_v60  ;;  %v514_v21 = vld [vmem:[#allocation2 + $0xf58] sm:$0xff]  ;;  %2550 = vst [vmem:[#allocation5 + $0xef8] sm:$0xff] %v2038_v10  ;;  %v3083_v22 = vround.rtne.f32 %v1018_v11  ;;  %v1022_v25 = vmul.f32 3.0, %v510_v9  ;;  %v515_v26 = vld [vmem:[#allocation2 + $0xf60] sm:$0xff] }
 0x1ad   :  { %v3084_v23 = vround.rtne.f32 %v1019_v12  ;;  %v3085_v24 = vround.rtne.f32 %v1020_v13  ;;  %v516_v27 = vld [vmem:[#allocation2 + $0xf68] sm:$0xff]  ;;  %v517_v28 = vld [vmem:[#allocation2 + $0xf70] sm:$0xff]  ;;  %v2039_v29 = vmul.f32 0.33333334, %v3080_v15  ;;  %v2040_v30 = vmul.f32 0.33333334, %v3081_v16 }
 0x1ae   :  { %v2041_v31 = vmul.f32 0.33333334, %v3082_v17  ;;  %v3086_v32 = vround.rtne.f32 %v1021_v18  ;;  %v2042_v33 = vmul.f32 0.33333334, %v3083_v22  ;;  %v3087_v36 = vround.rtne.f32 %v1022_v25  ;;  %v518_v41 = vld [vmem:[#allocation2 + $0xf78] sm:$0xff]  ;;  %v519_v46 = vld [vmem:[#allocation2 + $0xf80] sm:$0xff] }
 0x1af   :  { %v2043_v34 = vmul.f32 0.33333334, %v3084_v23  ;;  %v2044_v35 = vmul.f32 0.33333334, %v3085_v24  ;;  %2551 = vst [vmem:[#allocation5 + $0xf00] sm:$0xff] %v2039_v29  ;;  %2552 = vst [vmem:[#allocation5 + $0xf08] sm:$0xff] %v2040_v30 }
 0x1b0   :  { %2553 = vst [vmem:[#allocation5 + $0xf10] sm:$0xff] %v2041_v31  ;;  %v2045_v37 = vmul.f32 0.33333334, %v3086_v32  ;;  %v1023_v38 = vmul.f32 3.0, %v511_v14  ;;  %v1024_v39 = vmul.f32 3.0, %v512_v19  ;;  %v1025_v40 = vmul.f32 3.0, %v513_v20 }
 0x1b1   :  { %2554 = vst [vmem:[#allocation5 + $0xf18] sm:$0xff] %v2042_v33  ;;  %2555 = vst [vmem:[#allocation5 + $0xf20] sm:$0xff] %v2043_v34  ;;  %v2046_v42 = vmul.f32 0.33333334, %v3087_v36  ;;  %v1026_v43 = vmul.f32 3.0, %v514_v21  ;;  %v1027_v44 = vmul.f32 3.0, %v515_v26 }
 0x1b2   :  { %2556 = vst [vmem:[#allocation5 + $0xf28] sm:$0xff] %v2044_v35  ;;  %v1028_v45 = vmul.f32 3.0, %v516_v27  ;;  %2557 = vst [vmem:[#allocation5 + $0xf30] sm:$0xff] %v2045_v37  ;;  %v3088_v47 = vround.rtne.f32 %v1023_v38  ;;  %v3089_v48 = vround.rtne.f32 %v1024_v39  ;;  %v3090_v49 = vround.rtne.f32 %v1025_v40  ;;  %v520_v51 = vld [vmem:[#allocation2 + $0xf88] sm:$0xff]  ;;  %v521_v52 = vld [vmem:[#allocation2 + $0xf90] sm:$0xff] }
 0x1b3   :  { %v1029_v50 = vmul.f32 3.0, %v517_v28  ;;  %v522_v53 = vld [vmem:[#allocation2 + $0xf98] sm:$0xff]  ;;  %2558 = vst [vmem:[#allocation5 + $0xf38] sm:$0xff] %v2046_v42  ;;  %v3091_v54 = vround.rtne.f32 %v1026_v43  ;;  %v3092_v55 = vround.rtne.f32 %v1027_v44  ;;  %v1030_v57 = vmul.f32 3.0, %v518_v41  ;;  %v523_v58 = vld [vmem:[#allocation2 + $0xfa0] sm:$0xff]  ;;  %v524_v59 = vld [vmem:[#allocation2 + $0xfa8] sm:$0xff] }
 0x1b4   :  { %v3093_v56 = vround.rtne.f32 %v1028_v45  ;;  %v525_v60 = vld [vmem:[#allocation2 + $0xfb0] sm:$0xff]  ;;  %v2047_v61 = vmul.f32 0.33333334, %v3088_v47  ;;  %v2048_v62 = vmul.f32 0.33333334, %v3089_v48  ;;  %v1031_v6 = vmul.f32 3.0, %v519_v46 }
 0x1b5   :  { %v2049_v63 = vmul.f32 0.33333334, %v3090_v49  ;;  %v3094_v0 = vround.rtne.f32 %v1029_v50  ;;  %v2050_v1 = vmul.f32 0.33333334, %v3091_v54  ;;  %v2051_v2 = vmul.f32 0.33333334, %v3092_v55 }
 0x1b6   :  { %v2052_v3 = vmul.f32 0.33333334, %v3093_v56  ;;  %v3095_v4 = vround.rtne.f32 %v1030_v57  ;;  %2559 = vst [vmem:[#allocation5 + $0xf40] sm:$0xff] %v2047_v61  ;;  %2560 = vst [vmem:[#allocation5 + $0xf48] sm:$0xff] %v2048_v62  ;;  %v1032_v7 = vmul.f32 3.0, %v520_v51  ;;  %v1033_v8 = vmul.f32 3.0, %v521_v52 }
 0x1b7   :  { %2561 = vst [vmem:[#allocation5 + $0xf50] sm:$0xff] %v2049_v63  ;;  %v2053_v5 = vmul.f32 0.33333334, %v3094_v0  ;;  %v526_v9 = vld [vmem:[#allocation2 + $0xfb8] sm:$0xff]  ;;  %2562 = vst [vmem:[#allocation5 + $0xf58] sm:$0xff] %v2050_v1  ;;  %v1034_v11 = vmul.f32 3.0, %v522_v53  ;;  %v3096_v15 = vround.rtne.f32 %v1031_v6 }
 0x1b8   :  { %2563 = vst [vmem:[#allocation5 + $0xf60] sm:$0xff] %v2051_v2  ;;  %2564 = vst [vmem:[#allocation5 + $0xf68] sm:$0xff] %v2052_v3  ;;  %v2054_v10 = vmul.f32 0.33333334, %v3095_v4  ;;  %v1035_v12 = vmul.f32 3.0, %v523_v58  ;;  %v1036_v13 = vmul.f32 3.0, %v524_v59  ;;  %v3097_v16 = vround.rtne.f32 %v1032_v7 }
 0x1b9   :  { %v527_v14 = vld [vmem:[#allocation2 + $0xfc0] sm:$0xff]  ;;  %2565 = vst [vmem:[#allocation5 + $0xf70] sm:$0xff] %v2053_v5  ;;  %v3098_v17 = vround.rtne.f32 %v1033_v8  ;;  %v1037_v18 = vmul.f32 3.0, %v525_v60  ;;  %v528_v19 = vld [vmem:[#allocation2 + $0xfc8] sm:$0xff]  ;;  %v529_v20 = vld [vmem:[#allocation2 + $0xfd0] sm:$0xff]  ;;  %v3099_v22 = vround.rtne.f32 %v1034_v11  ;;  %v1038_v25 = vmul.f32 3.0, %v526_v9 }
 0x1ba   :  { %v530_v21 = vld [vmem:[#allocation2 + $0xfd8] sm:$0xff]  ;;  %2566 = vst [vmem:[#allocation5 + $0xf78] sm:$0xff] %v2054_v10  ;;  %v3100_v23 = vround.rtne.f32 %v1035_v12  ;;  %v3101_v24 = vround.rtne.f32 %v1036_v13  ;;  %v531_v26 = vld [vmem:[#allocation2 + $0xfe0] sm:$0xff]  ;;  %v532_v27 = vld [vmem:[#allocation2 + $0xfe8] sm:$0xff]  ;;  %v2055_v29 = vmul.f32 0.33333334, %v3096_v15 }
 0x1bb   :  { %v533_v28 = vld [vmem:[#allocation2 + $0xff0] sm:$0xff]  ;;  %v2056_v30 = vmul.f32 0.33333334, %v3097_v16  ;;  %v2057_v31 = vmul.f32 0.33333334, %v3098_v17  ;;  %v3102_v32 = vround.rtne.f32 %v1037_v18  ;;  %v3103_v36 = vround.rtne.f32 %v1038_v25  ;;  %v534_v41 = vld [vmem:[#allocation2 + $0xff8] sm:$0xff] }
 0x1bc   :  { %v2058_v33 = vmul.f32 0.33333334, %v3099_v22  ;;  %v2059_v34 = vmul.f32 0.33333334, %v3100_v23  ;;  %v2060_v35 = vmul.f32 0.33333334, %v3101_v24 }
 0x1bd   :  { %2567 = vst [vmem:[#allocation5 + $0xf80] sm:$0xff] %v2055_v29  ;;  %2568 = vst [vmem:[#allocation5 + $0xf88] sm:$0xff] %v2056_v30  ;;  %v2061_v37 = vmul.f32 0.33333334, %v3102_v32  ;;  %v1039_v38 = vmul.f32 3.0, %v527_v14  ;;  %v1040_v39 = vmul.f32 3.0, %v528_v19 }
 0x1be   :  { %2569 = vst [vmem:[#allocation5 + $0xf90] sm:$0xff] %v2057_v31  ;;  %v1041_v40 = vmul.f32 3.0, %v529_v20  ;;  %2570 = vst [vmem:[#allocation5 + $0xf98] sm:$0xff] %v2058_v33  ;;  %v2062_v42 = vmul.f32 0.33333334, %v3103_v36  ;;  %v1042_v43 = vmul.f32 3.0, %v530_v21 }
 0x1bf   :  { %2571 = vst [vmem:[#allocation5 + $0xfa0] sm:$0xff] %v2059_v34  ;;  %2572 = vst [vmem:[#allocation5 + $0xfa8] sm:$0xff] %v2060_v35  ;;  %v1043_v44 = vmul.f32 3.0, %v531_v26  ;;  %v1044_v45 = vmul.f32 3.0, %v532_v27  ;;  %v3104_v46 = vround.rtne.f32 %v1039_v38  ;;  %v3105_v47 = vround.rtne.f32 %v1040_v39 }
 0x1c0   :  { %2573 = vst [vmem:[#allocation5 + $0xfb0] sm:$0xff] %v2061_v37  ;;  %v3106_v48 = vround.rtne.f32 %v1041_v40  ;;  %v1045_v49 = vmul.f32 3.0, %v533_v28  ;;  %2574 = vst [vmem:[#allocation5 + $0xfb8] sm:$0xff] %v2062_v42  ;;  %v3107_v50 = vround.rtne.f32 %v1042_v43  ;;  %v1046_v53 = vmul.f32 3.0, %v534_v41 }
 0x1c1   :  { %v3108_v51 = vround.rtne.f32 %v1043_v44  ;;  %v3109_v52 = vround.rtne.f32 %v1044_v45  ;;  %v2063_v54 = vmul.f32 0.33333334, %v3104_v46  ;;  %v2064_v55 = vmul.f32 0.33333334, %v3105_v47 }
 0x1c2   :  { %v2065_v56 = vmul.f32 0.33333334, %v3106_v48  ;;  %v3110_v57 = vround.rtne.f32 %v1045_v49  ;;  %v2066_v58 = vmul.f32 0.33333334, %v3107_v50  ;;  %v3111_v61 = vround.rtne.f32 %v1046_v53 }
 0x1c3   :  { %v2067_v59 = vmul.f32 0.33333334, %v3108_v51  ;;  %v2068_v60 = vmul.f32 0.33333334, %v3109_v52  ;;  %2575 = vst [vmem:[#allocation5 + $0xfc0] sm:$0xff] %v2063_v54  ;;  %2576 = vst [vmem:[#allocation5 + $0xfc8] sm:$0xff] %v2064_v55 }
 0x1c4   :  { %2577 = vst [vmem:[#allocation5 + $0xfd0] sm:$0xff] %v2065_v56  ;;  %v2069_v62 = vmul.f32 0.33333334, %v3110_v57  ;;  %2578 = vst [vmem:[#allocation5 + $0xfd8] sm:$0xff] %v2066_v58  ;;  %v2070_v63 = vmul.f32 0.33333334, %v3111_v61 }
 0x1c5   :  { %2579 = vst [vmem:[#allocation5 + $0xfe0] sm:$0xff] %v2067_v59  ;;  %2580 = vst [vmem:[#allocation5 + $0xfe8] sm:$0xff] %v2068_v60 }
 0x1c6   :  { %2581 = vst [vmem:[#allocation5 + $0xff0] sm:$0xff] %v2069_v62  ;;  %2582 = vst [vmem:[#allocation5 + $0xff8] sm:$0xff] %v2070_v63 }
 0x1c7   :  { %2587 = vsyncadd [#allocation4], 65280  ;;  %s3167_s0 = smov [#allocation5]  }
 0x1c8   :  { %s2588_s21 = sshll.u32 %s3167_s0, 4  ;;  %s2589_s21 = int_to_ptr.vmem [resolvable:$true] %s2588_s21 }
 0x1c9   :  { %s3138_s22 = scalar_lea.vmem %s2589_s21, 256  ;;  %s3142_s23 = scalar_lea.vmem %s2589_s21, 65536 }
 0x1ca   :  { %p3139_p8 = scmp.ne.s32.totalorder %s2589_s21, %s3138_s22  ;;  %p3143_p9 = scmp.lt.s32.totalorder %s2589_s21, %s2589_s21 }
 0x1cb   :  { %p3144_p10 = scmp.lt.s32.totalorder %s3142_s23, %s3138_s22 }
 0x1cd   :  { %p3145_p11 = por %p3144_p10, %p3143_p9 }
 0x1cf   :  { %p3146_p12 = pnand %p3145_p11, %p3139_p8 }
 0x1d1   :  { %3149 = shalt.err (!%p3146_p12)
}
 0x1d2   :  { %s3150_s26 = scalar_lea.hbm %s3209_s1, 256 }
 0x1d3   :  { %p3151_p13 = scmp.ne.s32.totalorder %s3209_s1, %s3150_s26  ;;  %p3154_p0 = scmp.lt.u32.totalorder %s3150_s26, %s3209_s1 }
 0x1d5   :  { %p3156_p1 = pnand %p3154_p0, %p3151_p13 }
 0x1d7   :  { %3159 = shalt.err (!%p3156_p1)
}
 0x1d8   :  { %2594 = dma.vmem_to_hbm [thread:$0]  %s2589_s21, 256, %s3209_s1, [#allocation4], %s3165_s17, %s3165_s17, %s3166_s18  }
 0x1d9   :  { %3162 = dma.done.wait [#allocation4], 65536  }
 0x1da   :  { %3163 = vsyncadd [#allocation4], 4294901760 }
 0x1db   :  { %2598 = vsyncpa [#allocation3], 1 }
 0x1dc   :  { %2599 = vsyncpa [#allocation4], 1 }

</bundles_post_ra>
